<compile_context>
chip_gen: v7x
topology: tpu7x:2x2x1
jax: 0.10.0
libtpu: 0.0.40
codegen_flags: <defaults>
</compile_context>

<pallas_src>
import functools

import jax
import jax.numpy as jnp
from jax.experimental import pallas as pl
from jax.experimental.pallas import tpu as pltpu

# ----------------------------- module hyper-params -----------------------------
IN_FEATURES = 16
OUT_FEATURES = 32
GRID_SIZE = 3
SPLINE_ORDER = 6
GRID_RANGE = (-1.0, 1.0)
N_COEFF = GRID_SIZE + SPLINE_ORDER                 # 9
N_KNOTS = GRID_SIZE + 2 * SPLINE_ORDER + 1         # 16
_CHUNK = 128                                       # one vreg lane-width of batch


# --------------------------------- Pallas kernel -------------------------------
def kan_linear_kernel(xt_ref, w_ref, knots_ref, rcp_ref, out_ref, act_ref,
                      *, spline_order: int):
    """One batch tile, processed in 128-lane chunks.

    xt_ref   : (CPT, IN, 128)   x chunks; batch on lanes, features on sublanes
    w_ref    : (OUT, (1+N_COEFF)*IN) bf16   [base_w | scaled spline_w], coeff-major
    knots_ref: (NK,)  f32 SMEM  feature-uniform knot vector
    rcp_ref  : (SPLINE_ORDER*NK,) f32 SMEM  rcp[(k-1)*NK + i] = 1/(g[i+k]-g[i])
    out_ref  : (CPT, OUT, 128)  f32
    act_ref  : ((1+N_COEFF)*IN, 128) bf16   fused activation for the current chunk
    """
    cpt, in_f, _ = xt_ref.shape
    n_knots = knots_ref.shape[0]

    @pl.loop(0, cpt)
    def _chunk(c):
        xc = xt_ref[c]                                       # (IN, 128) f32

        # ---- base branch: SiLU(x)
        act_ref[0:in_f, :] = (xc * jax.nn.sigmoid(xc)).astype(act_ref.dtype)

        # ---- order-0 bases: 1[g_j <= x < g_{j+1}] = 1[x>=g_j] - 1[x>=g_{j+1}]
        #      (sorted knots; x == last knot -> all-zero, matching torch).
        prev = (xc >= knots_ref[0]).astype(jnp.float32)
        bases = []
        for j in range(n_knots - 1):
            nxt = (xc >= knots_ref[j + 1]).astype(jnp.float32)
            bases.append(prev - nxt)
            prev = nxt

        # ---- Cox-de-Boor recursion with the de Boor identity
        #      right_j = 1 - t_{j+1},  t_j = (x - g_j) * rcp_{k,j}
        #      (divides replaced by precomputed reciprocals; scalars from SMEM).
        for k in range(1, spline_order + 1):
            off = (k - 1) * n_knots
            last = k == spline_order
            nb = len(bases) - 1
            t_prev = (xc - knots_ref[0]) * rcp_ref[off]
            new_bases = []
            for j in range(nb):
                t_next = (xc - knots_ref[j + 1]) * rcp_ref[off + j + 1]
                b = t_prev * bases[j] + (1.0 - t_next) * bases[j + 1]
                t_prev = t_next
                if last:
                    act_ref[(1 + j) * in_f:(2 + j) * in_f, :] = b.astype(act_ref.dtype)
                else:
                    new_bases.append(b)
            if not last:
                bases = new_bases

        # ---- fused matmul for this chunk: (OUT,160)bf16 @ (160,128)bf16 -> f32
        out_ref[c] = jnp.dot(w_ref[...], act_ref[...],
                             preferred_element_type=jnp.float32).astype(out_ref.dtype)


# ------------------------------ wrapper-side packing ----------------------------
def pack_kan_weights(base_w, spline_w_oic, spline_scaler):
    """-> (OUT, (1+N_COEFF)*IN) packed weight matching the kernel activation order."""
    out_f, in_f = base_w.shape
    n_coeff = spline_w_oic.shape[-1]
    scaled = spline_w_oic.astype(jnp.float32) * spline_scaler.astype(jnp.float32)[..., None]
    spline_flat = jnp.transpose(scaled, (0, 2, 1)).reshape(out_f, n_coeff * in_f)
    return jnp.concatenate([base_w.astype(jnp.float32), spline_flat], axis=1)


def pack_knot_reciprocals(knots, spline_order):
    """-> (SPLINE_ORDER*NK,) with rcp[(k-1)*NK + i] = 1/(knots[i+k]-knots[i]).

    Note: degenerate (repeated) knots would produce inf here; the module's
    uniform grid never hits this.
    """
    n_knots = knots.shape[0]
    segs = []
    for k in range(1, spline_order + 1):
        r = 1.0 / (knots[k:] - knots[:-k])                      # (NK-k,)
        segs.append(jnp.concatenate([r, jnp.zeros((k,), jnp.float32)]))
    return jnp.concatenate(segs).astype(jnp.float32)


# ----------------------------------- wrapper ------------------------------------
def kan_linear_forward(x, grid_if, base_w, spline_w_oic, spline_scaler, *, tile_b=2048):
    """x: (..., in_features) -> (..., out_features). grid_if: (IN, NK) torch layout."""
    orig_shape = x.shape
    out_f, in_f = base_w.shape
    n_coeff = spline_w_oic.shape[-1]

    xb = x.reshape(-1, in_f).astype(jnp.float32)
    batch = xb.shape[0]

    # ---- tile sizing: lane-aligned chunks, prefer >=2 tiles for v7x megacore.
    tile_b = max(_CHUNK, (tile_b // _CHUNK) * _CHUNK)
    batch_pad = pl.cdiv(batch, _CHUNK) * _CHUNK
    tile_b = min(tile_b, batch_pad)
    if batch_pad // tile_b < 2 and batch_pad >= 2 * _CHUNK:
        tile_b = max(_CHUNK, ((batch_pad // 2) // _CHUNK) * _CHUNK)
    batch_pad = pl.cdiv(batch_pad, tile_b) * tile_b
    n_chunks = batch_pad // _CHUNK
    cpt = tile_b // _CHUNK                       # chunks per grid step
    num_tiles = n_chunks // cpt

    # ---- inputs: (n_chunks, IN, 128), batch on lanes.  Pad rows are dropped later.
    xpad = jnp.pad(xb, ((0, batch_pad - batch), (0, 0)))
    xt3 = xpad.reshape(n_chunks, _CHUNK, in_f).transpose(0, 2, 1)

    # TODO(synk): exploits the module's feature-uniform grid (true as constructed);
    # a per-feature grid (after torch-style update_grid) is not supported here.
    knots = (grid_if[0] if grid_if.ndim == 2 else grid_if).astype(jnp.float32)
    n_knots = knots.shape[0]
    rcp = pack_knot_reciprocals(knots, SPLINE_ORDER)                       # (96,)
    w_packed = pack_kan_weights(base_w, spline_w_oic, spline_scaler)       # (32, 160)
    w_bf16 = w_packed.astype(jnp.bfloat16)

    out3 = pl.pallas_call(
        functools.partial(kan_linear_kernel, spline_order=SPLINE_ORDER),
        out_shape=jax.ShapeDtypeStruct((n_chunks, out_f, _CHUNK), jnp.float32),
        grid_spec=pltpu.PrefetchScalarGridSpec(
            num_scalar_prefetch=0,
            grid=(num_tiles,),
            in_specs=[
                pl.BlockSpec((cpt, in_f, _CHUNK), lambda i: (i, 0, 0)),          # x chunks
                pl.BlockSpec((out_f, (1 + n_coeff) * in_f), lambda i: (0, 0)),   # packed W
                pl.BlockSpec(memory_space=pltpu.MemorySpace.SMEM),               # knots
                pl.BlockSpec(memory_space=pltpu.MemorySpace.SMEM),               # reciprocals
            ],
            out_specs=pl.BlockSpec((cpt, out_f, _CHUNK), lambda i: (i, 0, 0)),
            scratch_shapes=[pltpu.VMEM(((1 + n_coeff) * in_f, _CHUNK), jnp.bfloat16)],
        ),
        compiler_params=pltpu.CompilerParams(dimension_semantics=("parallel",)),
    )(xt3, w_bf16, knots, rcp)

    out = out3.transpose(0, 2, 1).reshape(batch_pad, out_f)[:batch]
    return out.reshape(*orig_shape[:-1], out_f)


# ----------------------------- pure-JAX reference ------------------------------
def _b_splines_ref(x, grid_if, spline_order):
    # x: (B, IN), grid_if: (IN, NK) -- mirrors the torch implementation exactly
    xg = x[:, :, None]
    bases = ((xg >= grid_if[:, :-1]) & (xg < grid_if[:, 1:])).astype(x.dtype)
    for k in range(1, spline_order + 1):
        bases = ((xg - grid_if[:, :-(k + 1)])
                 / (grid_if[:, k:-1] - grid_if[:, :-(k + 1)]) * bases[..., :-1]
                 + (grid_if[:, k + 1:] - xg)
                 / (grid_if[:, k + 1:] - grid_if[:, 1:-k]) * bases[..., 1:])
    return bases


def kan_linear_ref(x, grid_if, base_w, spline_w_oic, spline_scaler):
    orig_shape = x.shape
    out_features, in_features = base_w.shape
    xb = x.reshape(-1, in_features).astype(jnp.float32)
    base_out = jax.nn.silu(xb) @ base_w.T
    bases = _b_splines_ref(xb, grid_if, SPLINE_ORDER)                 # (B, IN, COEFF)
    scaled_w = spline_w_oic * spline_scaler[..., None]                # (OUT, IN, COEFF)
    spline_out = bases.reshape(xb.shape[0], -1) @ scaled_w.reshape(out_features, -1).T
    return (base_out + spline_out).reshape(*orig_shape[:-1], out_features)


# ------------------------------------ main --------------------------------------
if __name__ == "__main__":
    key = jax.random.PRNGKey(0)
    kx, kb, ks, kc = jax.random.split(key, 4)

    # deterministic synthetic parameters (shapes follow KANLinear.__init__)
    h = (GRID_RANGE[1] - GRID_RANGE[0]) / GRID_SIZE
    knots = jnp.arange(-SPLINE_ORDER, GRID_SIZE + SPLINE_ORDER + 1,
                       dtype=jnp.float32) * h + GRID_RANGE[0]          # (N_KNOTS,)
    grid_if = jnp.broadcast_to(knots, (IN_FEATURES, N_KNOTS))          # torch layout

    # TODO(synk): init is deterministic but not bit-identical to torch's
    # kaiming_uniform_ / curve2coeff-lstsq initialization (forward math identical).
    base_weight = (jax.random.uniform(kb, (OUT_FEATURES, IN_FEATURES),
                                      dtype=jnp.float32) - 0.5) * 0.5
    spline_weight = jax.random.normal(
        ks, (OUT_FEATURES, IN_FEATURES, N_COEFF), dtype=jnp.float32) * 0.1
    spline_scaler = (jax.random.uniform(kc, (OUT_FEATURES, IN_FEATURES),
                                        dtype=jnp.float32) - 0.5) * 0.5

    # example input: batch=2, seq=8, features=16 -> flattened B = 16 (padded to 128)
    x = jax.random.uniform(kx, (2, 8, IN_FEATURES), dtype=jnp.float32,
                           minval=-1.0, maxval=1.0)

    out = kan_linear_forward(x, grid_if, base_weight, spline_weight, spline_scaler)
    out = jax.block_until_ready(out)

    ref = kan_linear_ref(x, grid_if, base_weight, spline_weight, spline_scaler)
    assert out.shape == (2, 8, OUT_FEATURES)
    # bf16 MXU inputs (f32 accumulation) -> looser tolerance than the f32-only v1.
    assert jnp.allclose(out, ref, rtol=3e-2, atol=3e-2), (
        f"max abs err {jnp.max(jnp.abs(out - ref))}")

    print("KERNEL_OK")
</pallas_src>

<mosaic_0001>
module attributes {stable_mosaic.version = 11 : i64} {
  func.func @kan_linear_kernel(%arg0: i32, %arg1: memref<1x16x128xf32, #tpu.memory_space<vmem>>, %arg2: memref<32x160xbf16, #tpu.memory_space<vmem>>, %arg3: memref<16xf32, #tpu.memory_space<smem>>, %arg4: memref<96xf32, #tpu.memory_space<smem>>, %arg5: memref<1x32x128xf32, #tpu.memory_space<vmem>>, %arg6: memref<160x128xbf16, #tpu.memory_space<vmem>>) attributes {dimension_semantics = [#tpu.dimension_semantics<parallel>], iteration_bounds = array<i64: 1>, scalar_prefetch = 0 : i64, scratch_operands = 1 : i64, tpu.core_type = #tpu.core_type<tc>, window_params = [{transform_indices = @transform_0, window_bounds = array<i64: 1, 16, 128>}, {pipeline_mode = #tpu.pipeline_mode<synchronous>, transform_indices = @transform_1, window_bounds = array<i64: 32, 160>}, {transform_indices = @transform_2, window_bounds = array<i64: 16>}, {transform_indices = @transform_3, window_bounds = array<i64: 96>}, {transform_indices = @transform_4, window_bounds = array<i64: 1, 32, 128>}]} {
    %c0_i32 = arith.constant 0 : i32
    %c1_i32 = arith.constant 1 : i32
    %0 = arith.muli %c0_i32, %c1_i32 : i32
    %c0_i32_0 = arith.constant 0 : i32
    %1 = arith.addi %c0_i32_0, %0 : i32
    %2 = arith.index_cast %1 : i32 to index
    %c0 = arith.constant 0 : index
    %c0_1 = arith.constant 0 : index
    %3 = vector.load %arg1[%2, %c0, %c0_1] : memref<1x16x128xf32, #tpu.memory_space<vmem>>, vector<1x16x128xf32>
    %4 = vector.shape_cast %3 : vector<1x16x128xf32> to vector<16x128xf32>
    %5 = arith.negf %4 : vector<16x128xf32>
    %6 = math.exp %5 : vector<16x128xf32>
    %cst = arith.constant 1.000000e+00 : f32
    %7 = vector.broadcast %cst : f32 to vector<16x128xf32>
    %8 = arith.addf %7, %6 : vector<16x128xf32>
    %9 = arith.divf %7, %8 : vector<16x128xf32>
    %10 = arith.mulf %4, %9 : vector<16x128xf32>
    %11 = arith.truncf %10 : vector<16x128xf32> to vector<16x128xbf16>
    %c0_2 = arith.constant 0 : index
    %c0_3 = arith.constant 0 : index
    %12 = vector.load %arg6[%c0_2, %c0_3] : memref<160x128xbf16, #tpu.memory_space<vmem>>, vector<16x128xbf16>
    tpu.vector_store %arg6[%c0_2, %c0_3], %11 {strides = array<i32>} : memref<160x128xbf16, #tpu.memory_space<vmem>>, vector<16x128xbf16>,
    %c0_4 = arith.constant 0 : index
    %13 = memref.load %arg3[%c0_4] : memref<16xf32, #tpu.memory_space<smem>>
    %14 = vector.broadcast %13 : f32 to vector<16x128xf32>
    %15 = arith.cmpf oge, %4, %14 : vector<16x128xf32>
    %16 = arith.extui %15 : vector<16x128xi1> to vector<16x128xi32>
    %17 = arith.sitofp %16 : vector<16x128xi32> to vector<16x128xf32>
    %c1 = arith.constant 1 : index
    %18 = memref.load %arg3[%c1] : memref<16xf32, #tpu.memory_space<smem>>
    %19 = vector.broadcast %18 : f32 to vector<16x128xf32>
    %20 = arith.cmpf oge, %4, %19 : vector<16x128xf32>
    %21 = arith.extui %20 : vector<16x128xi1> to vector<16x128xi32>
    %22 = arith.sitofp %21 : vector<16x128xi32> to vector<16x128xf32>
    %23 = arith.subf %17, %22 : vector<16x128xf32>
    %c2 = arith.constant 2 : index
    %24 = memref.load %arg3[%c2] : memref<16xf32, #tpu.memory_space<smem>>
    %25 = vector.broadcast %24 : f32 to vector<16x128xf32>
    %26 = arith.cmpf oge, %4, %25 : vector<16x128xf32>
    %27 = arith.extui %26 : vector<16x128xi1> to vector<16x128xi32>
    %28 = arith.sitofp %27 : vector<16x128xi32> to vector<16x128xf32>
    %29 = arith.subf %22, %28 : vector<16x128xf32>
    %c3 = arith.constant 3 : index
    %30 = memref.load %arg3[%c3] : memref<16xf32, #tpu.memory_space<smem>>
    %31 = vector.broadcast %30 : f32 to vector<16x128xf32>
    %32 = arith.cmpf oge, %4, %31 : vector<16x128xf32>
    %33 = arith.extui %32 : vector<16x128xi1> to vector<16x128xi32>
    %34 = arith.sitofp %33 : vector<16x128xi32> to vector<16x128xf32>
    %35 = arith.subf %28, %34 : vector<16x128xf32>
    %c4 = arith.constant 4 : index
    %36 = memref.load %arg3[%c4] : memref<16xf32, #tpu.memory_space<smem>>
    %37 = vector.broadcast %36 : f32 to vector<16x128xf32>
    %38 = arith.cmpf oge, %4, %37 : vector<16x128xf32>
    %39 = arith.extui %38 : vector<16x128xi1> to vector<16x128xi32>
    %40 = arith.sitofp %39 : vector<16x128xi32> to vector<16x128xf32>
    %41 = arith.subf %34, %40 : vector<16x128xf32>
    %c5 = arith.constant 5 : index
    %42 = memref.load %arg3[%c5] : memref<16xf32, #tpu.memory_space<smem>>
    %43 = vector.broadcast %42 : f32 to vector<16x128xf32>
    %44 = arith.cmpf oge, %4, %43 : vector<16x128xf32>
    %45 = arith.extui %44 : vector<16x128xi1> to vector<16x128xi32>
    %46 = arith.sitofp %45 : vector<16x128xi32> to vector<16x128xf32>
    %47 = arith.subf %40, %46 : vector<16x128xf32>
    %c6 = arith.constant 6 : index
    %48 = memref.load %arg3[%c6] : memref<16xf32, #tpu.memory_space<smem>>
    %49 = vector.broadcast %48 : f32 to vector<16x128xf32>
    %50 = arith.cmpf oge, %4, %49 : vector<16x128xf32>
    %51 = arith.extui %50 : vector<16x128xi1> to vector<16x128xi32>
    %52 = arith.sitofp %51 : vector<16x128xi32> to vector<16x128xf32>
    %53 = arith.subf %46, %52 : vector<16x128xf32>
    %c7 = arith.constant 7 : index
    %54 = memref.load %arg3[%c7] : memref<16xf32, #tpu.memory_space<smem>>
    %55 = vector.broadcast %54 : f32 to vector<16x128xf32>
    %56 = arith.cmpf oge, %4, %55 : vector<16x128xf32>
    %57 = arith.extui %56 : vector<16x128xi1> to vector<16x128xi32>
    %58 = arith.sitofp %57 : vector<16x128xi32> to vector<16x128xf32>
    %59 = arith.subf %52, %58 : vector<16x128xf32>
    %c8 = arith.constant 8 : index
    %60 = memref.load %arg3[%c8] : memref<16xf32, #tpu.memory_space<smem>>
    %61 = vector.broadcast %60 : f32 to vector<16x128xf32>
    %62 = arith.cmpf oge, %4, %61 : vector<16x128xf32>
    %63 = arith.extui %62 : vector<16x128xi1> to vector<16x128xi32>
    %64 = arith.sitofp %63 : vector<16x128xi32> to vector<16x128xf32>
    %65 = arith.subf %58, %64 : vector<16x128xf32>
    %c9 = arith.constant 9 : index
    %66 = memref.load %arg3[%c9] : memref<16xf32, #tpu.memory_space<smem>>
    %67 = vector.broadcast %66 : f32 to vector<16x128xf32>
    %68 = arith.cmpf oge, %4, %67 : vector<16x128xf32>
    %69 = arith.extui %68 : vector<16x128xi1> to vector<16x128xi32>
    %70 = arith.sitofp %69 : vector<16x128xi32> to vector<16x128xf32>
    %71 = arith.subf %64, %70 : vector<16x128xf32>
    %c10 = arith.constant 10 : index
    %72 = memref.load %arg3[%c10] : memref<16xf32, #tpu.memory_space<smem>>
    %73 = vector.broadcast %72 : f32 to vector<16x128xf32>
    %74 = arith.cmpf oge, %4, %73 : vector<16x128xf32>
    %75 = arith.extui %74 : vector<16x128xi1> to vector<16x128xi32>
    %76 = arith.sitofp %75 : vector<16x128xi32> to vector<16x128xf32>
    %77 = arith.subf %70, %76 : vector<16x128xf32>
    %c11 = arith.constant 11 : index
    %78 = memref.load %arg3[%c11] : memref<16xf32, #tpu.memory_space<smem>>
    %79 = vector.broadcast %78 : f32 to vector<16x128xf32>
    %80 = arith.cmpf oge, %4, %79 : vector<16x128xf32>
    %81 = arith.extui %80 : vector<16x128xi1> to vector<16x128xi32>
    %82 = arith.sitofp %81 : vector<16x128xi32> to vector<16x128xf32>
    %83 = arith.subf %76, %82 : vector<16x128xf32>
    %c12 = arith.constant 12 : index
    %84 = memref.load %arg3[%c12] : memref<16xf32, #tpu.memory_space<smem>>
    %85 = vector.broadcast %84 : f32 to vector<16x128xf32>
    %86 = arith.cmpf oge, %4, %85 : vector<16x128xf32>
    %87 = arith.extui %86 : vector<16x128xi1> to vector<16x128xi32>
    %88 = arith.sitofp %87 : vector<16x128xi32> to vector<16x128xf32>
    %89 = arith.subf %82, %88 : vector<16x128xf32>
    %c13 = arith.constant 13 : index
    %90 = memref.load %arg3[%c13] : memref<16xf32, #tpu.memory_space<smem>>
    %91 = vector.broadcast %90 : f32 to vector<16x128xf32>
    %92 = arith.cmpf oge, %4, %91 : vector<16x128xf32>
    %93 = arith.extui %92 : vector<16x128xi1> to vector<16x128xi32>
    %94 = arith.sitofp %93 : vector<16x128xi32> to vector<16x128xf32>
    %95 = arith.subf %88, %94 : vector<16x128xf32>
    %c14 = arith.constant 14 : index
    %96 = memref.load %arg3[%c14] : memref<16xf32, #tpu.memory_space<smem>>
    %97 = vector.broadcast %96 : f32 to vector<16x128xf32>
    %98 = arith.cmpf oge, %4, %97 : vector<16x128xf32>
    %99 = arith.extui %98 : vector<16x128xi1> to vector<16x128xi32>
    %100 = arith.sitofp %99 : vector<16x128xi32> to vector<16x128xf32>
    %101 = arith.subf %94, %100 : vector<16x128xf32>
    %c15 = arith.constant 15 : index
    %102 = memref.load %arg3[%c15] : memref<16xf32, #tpu.memory_space<smem>>
    %103 = vector.broadcast %102 : f32 to vector<16x128xf32>
    %104 = arith.cmpf oge, %4, %103 : vector<16x128xf32>
    %105 = arith.extui %104 : vector<16x128xi1> to vector<16x128xi32>
    %106 = arith.sitofp %105 : vector<16x128xi32> to vector<16x128xf32>
    %107 = arith.subf %100, %106 : vector<16x128xf32>
    %c0_5 = arith.constant 0 : index
    %108 = memref.load %arg3[%c0_5] : memref<16xf32, #tpu.memory_space<smem>>
    %109 = vector.broadcast %108 : f32 to vector<16x128xf32>
    %110 = arith.subf %4, %109 : vector<16x128xf32>
    %c0_6 = arith.constant 0 : index
    %111 = memref.load %arg4[%c0_6] : memref<96xf32, #tpu.memory_space<smem>>
    %112 = vector.broadcast %111 : f32 to vector<16x128xf32>
    %113 = arith.mulf %110, %112 : vector<16x128xf32>
    %c1_7 = arith.constant 1 : index
    %114 = memref.load %arg3[%c1_7] : memref<16xf32, #tpu.memory_space<smem>>
    %115 = vector.broadcast %114 : f32 to vector<16x128xf32>
    %116 = arith.subf %4, %115 : vector<16x128xf32>
    %c1_8 = arith.constant 1 : index
    %117 = memref.load %arg4[%c1_8] : memref<96xf32, #tpu.memory_space<smem>>
    %118 = vector.broadcast %117 : f32 to vector<16x128xf32>
    %119 = arith.mulf %116, %118 : vector<16x128xf32>
    %120 = arith.mulf %113, %23 : vector<16x128xf32>
    %cst_9 = arith.constant 1.000000e+00 : f32
    %121 = vector.broadcast %cst_9 : f32 to vector<16x128xf32>
    %122 = arith.subf %121, %119 : vector<16x128xf32>
    %123 = arith.mulf %122, %29 : vector<16x128xf32>
    %124 = arith.addf %120, %123 : vector<16x128xf32>
    %c2_10 = arith.constant 2 : index
    %125 = memref.load %arg3[%c2_10] : memref<16xf32, #tpu.memory_space<smem>>
    %126 = vector.broadcast %125 : f32 to vector<16x128xf32>
    %127 = arith.subf %4, %126 : vector<16x128xf32>
    %c2_11 = arith.constant 2 : index
    %128 = memref.load %arg4[%c2_11] : memref<96xf32, #tpu.memory_space<smem>>
    %129 = vector.broadcast %128 : f32 to vector<16x128xf32>
    %130 = arith.mulf %127, %129 : vector<16x128xf32>
    %131 = arith.mulf %119, %29 : vector<16x128xf32>
    %cst_12 = arith.constant 1.000000e+00 : f32
    %132 = vector.broadcast %cst_12 : f32 to vector<16x128xf32>
    %133 = arith.subf %132, %130 : vector<16x128xf32>
    %134 = arith.mulf %133, %35 : vector<16x128xf32>
    %135 = arith.addf %131, %134 : vector<16x128xf32>
    %c3_13 = arith.constant 3 : index
    %136 = memref.load %arg3[%c3_13] : memref<16xf32, #tpu.memory_space<smem>>
    %137 = vector.broadcast %136 : f32 to vector<16x128xf32>
    %138 = arith.subf %4, %137 : vector<16x128xf32>
    %c3_14 = arith.constant 3 : index
    %139 = memref.load %arg4[%c3_14] : memref<96xf32, #tpu.memory_space<smem>>
    %140 = vector.broadcast %139 : f32 to vector<16x128xf32>
    %141 = arith.mulf %138, %140 : vector<16x128xf32>
    %142 = arith.mulf %130, %35 : vector<16x128xf32>
    %cst_15 = arith.constant 1.000000e+00 : f32
    %143 = vector.broadcast %cst_15 : f32 to vector<16x128xf32>
    %144 = arith.subf %143, %141 : vector<16x128xf32>
    %145 = arith.mulf %144, %41 : vector<16x128xf32>
    %146 = arith.addf %142, %145 : vector<16x128xf32>
    %c4_16 = arith.constant 4 : index
    %147 = memref.load %arg3[%c4_16] : memref<16xf32, #tpu.memory_space<smem>>
    %148 = vector.broadcast %147 : f32 to vector<16x128xf32>
    %149 = arith.subf %4, %148 : vector<16x128xf32>
    %c4_17 = arith.constant 4 : index
    %150 = memref.load %arg4[%c4_17] : memref<96xf32, #tpu.memory_space<smem>>
    %151 = vector.broadcast %150 : f32 to vector<16x128xf32>
    %152 = arith.mulf %149, %151 : vector<16x128xf32>
    %153 = arith.mulf %141, %41 : vector<16x128xf32>
    %cst_18 = arith.constant 1.000000e+00 : f32
    %154 = vector.broadcast %cst_18 : f32 to vector<16x128xf32>
    %155 = arith.subf %154, %152 : vector<16x128xf32>
    %156 = arith.mulf %155, %47 : vector<16x128xf32>
    %157 = arith.addf %153, %156 : vector<16x128xf32>
    %c5_19 = arith.constant 5 : index
    %158 = memref.load %arg3[%c5_19] : memref<16xf32, #tpu.memory_space<smem>>
    %159 = vector.broadcast %158 : f32 to vector<16x128xf32>
    %160 = arith.subf %4, %159 : vector<16x128xf32>
    %c5_20 = arith.constant 5 : index
    %161 = memref.load %arg4[%c5_20] : memref<96xf32, #tpu.memory_space<smem>>
    %162 = vector.broadcast %161 : f32 to vector<16x128xf32>
    %163 = arith.mulf %160, %162 : vector<16x128xf32>
    %164 = arith.mulf %152, %47 : vector<16x128xf32>
    %cst_21 = arith.constant 1.000000e+00 : f32
    %165 = vector.broadcast %cst_21 : f32 to vector<16x128xf32>
    %166 = arith.subf %165, %163 : vector<16x128xf32>
    %167 = arith.mulf %166, %53 : vector<16x128xf32>
    %168 = arith.addf %164, %167 : vector<16x128xf32>
    %c6_22 = arith.constant 6 : index
    %169 = memref.load %arg3[%c6_22] : memref<16xf32, #tpu.memory_space<smem>>
    %170 = vector.broadcast %169 : f32 to vector<16x128xf32>
    %171 = arith.subf %4, %170 : vector<16x128xf32>
    %c6_23 = arith.constant 6 : index
    %172 = memref.load %arg4[%c6_23] : memref<96xf32, #tpu.memory_space<smem>>
    %173 = vector.broadcast %172 : f32 to vector<16x128xf32>
    %174 = arith.mulf %171, %173 : vector<16x128xf32>
    %175 = arith.mulf %163, %53 : vector<16x128xf32>
    %cst_24 = arith.constant 1.000000e+00 : f32
    %176 = vector.broadcast %cst_24 : f32 to vector<16x128xf32>
    %177 = arith.subf %176, %174 : vector<16x128xf32>
    %178 = arith.mulf %177, %59 : vector<16x128xf32>
    %179 = arith.addf %175, %178 : vector<16x128xf32>
    %c7_25 = arith.constant 7 : index
    %180 = memref.load %arg3[%c7_25] : memref<16xf32, #tpu.memory_space<smem>>
    %181 = vector.broadcast %180 : f32 to vector<16x128xf32>
    %182 = arith.subf %4, %181 : vector<16x128xf32>
    %c7_26 = arith.constant 7 : index
    %183 = memref.load %arg4[%c7_26] : memref<96xf32, #tpu.memory_space<smem>>
    %184 = vector.broadcast %183 : f32 to vector<16x128xf32>
    %185 = arith.mulf %182, %184 : vector<16x128xf32>
    %186 = arith.mulf %174, %59 : vector<16x128xf32>
    %cst_27 = arith.constant 1.000000e+00 : f32
    %187 = vector.broadcast %cst_27 : f32 to vector<16x128xf32>
    %188 = arith.subf %187, %185 : vector<16x128xf32>
    %189 = arith.mulf %188, %65 : vector<16x128xf32>
    %190 = arith.addf %186, %189 : vector<16x128xf32>
    %c8_28 = arith.constant 8 : index
    %191 = memref.load %arg3[%c8_28] : memref<16xf32, #tpu.memory_space<smem>>
    %192 = vector.broadcast %191 : f32 to vector<16x128xf32>
    %193 = arith.subf %4, %192 : vector<16x128xf32>
    %c8_29 = arith.constant 8 : index
    %194 = memref.load %arg4[%c8_29] : memref<96xf32, #tpu.memory_space<smem>>
    %195 = vector.broadcast %194 : f32 to vector<16x128xf32>
    %196 = arith.mulf %193, %195 : vector<16x128xf32>
    %197 = arith.mulf %185, %65 : vector<16x128xf32>
    %cst_30 = arith.constant 1.000000e+00 : f32
    %198 = vector.broadcast %cst_30 : f32 to vector<16x128xf32>
    %199 = arith.subf %198, %196 : vector<16x128xf32>
    %200 = arith.mulf %199, %71 : vector<16x128xf32>
    %201 = arith.addf %197, %200 : vector<16x128xf32>
    %c9_31 = arith.constant 9 : index
    %202 = memref.load %arg3[%c9_31] : memref<16xf32, #tpu.memory_space<smem>>
    %203 = vector.broadcast %202 : f32 to vector<16x128xf32>
    %204 = arith.subf %4, %203 : vector<16x128xf32>
    %c9_32 = arith.constant 9 : index
    %205 = memref.load %arg4[%c9_32] : memref<96xf32, #tpu.memory_space<smem>>
    %206 = vector.broadcast %205 : f32 to vector<16x128xf32>
    %207 = arith.mulf %204, %206 : vector<16x128xf32>
    %208 = arith.mulf %196, %71 : vector<16x128xf32>
    %cst_33 = arith.constant 1.000000e+00 : f32
    %209 = vector.broadcast %cst_33 : f32 to vector<16x128xf32>
    %210 = arith.subf %209, %207 : vector<16x128xf32>
    %211 = arith.mulf %210, %77 : vector<16x128xf32>
    %212 = arith.addf %208, %211 : vector<16x128xf32>
    %c10_34 = arith.constant 10 : index
    %213 = memref.load %arg3[%c10_34] : memref<16xf32, #tpu.memory_space<smem>>
    %214 = vector.broadcast %213 : f32 to vector<16x128xf32>
    %215 = arith.subf %4, %214 : vector<16x128xf32>
    %c10_35 = arith.constant 10 : index
    %216 = memref.load %arg4[%c10_35] : memref<96xf32, #tpu.memory_space<smem>>
    %217 = vector.broadcast %216 : f32 to vector<16x128xf32>
    %218 = arith.mulf %215, %217 : vector<16x128xf32>
    %219 = arith.mulf %207, %77 : vector<16x128xf32>
    %cst_36 = arith.constant 1.000000e+00 : f32
    %220 = vector.broadcast %cst_36 : f32 to vector<16x128xf32>
    %221 = arith.subf %220, %218 : vector<16x128xf32>
    %222 = arith.mulf %221, %83 : vector<16x128xf32>
    %223 = arith.addf %219, %222 : vector<16x128xf32>
    %c11_37 = arith.constant 11 : index
    %224 = memref.load %arg3[%c11_37] : memref<16xf32, #tpu.memory_space<smem>>
    %225 = vector.broadcast %224 : f32 to vector<16x128xf32>
    %226 = arith.subf %4, %225 : vector<16x128xf32>
    %c11_38 = arith.constant 11 : index
    %227 = memref.load %arg4[%c11_38] : memref<96xf32, #tpu.memory_space<smem>>
    %228 = vector.broadcast %227 : f32 to vector<16x128xf32>
    %229 = arith.mulf %226, %228 : vector<16x128xf32>
    %230 = arith.mulf %218, %83 : vector<16x128xf32>
    %cst_39 = arith.constant 1.000000e+00 : f32
    %231 = vector.broadcast %cst_39 : f32 to vector<16x128xf32>
    %232 = arith.subf %231, %229 : vector<16x128xf32>
    %233 = arith.mulf %232, %89 : vector<16x128xf32>
    %234 = arith.addf %230, %233 : vector<16x128xf32>
    %c12_40 = arith.constant 12 : index
    %235 = memref.load %arg3[%c12_40] : memref<16xf32, #tpu.memory_space<smem>>
    %236 = vector.broadcast %235 : f32 to vector<16x128xf32>
    %237 = arith.subf %4, %236 : vector<16x128xf32>
    %c12_41 = arith.constant 12 : index
    %238 = memref.load %arg4[%c12_41] : memref<96xf32, #tpu.memory_space<smem>>
    %239 = vector.broadcast %238 : f32 to vector<16x128xf32>
    %240 = arith.mulf %237, %239 : vector<16x128xf32>
    %241 = arith.mulf %229, %89 : vector<16x128xf32>
    %cst_42 = arith.constant 1.000000e+00 : f32
    %242 = vector.broadcast %cst_42 : f32 to vector<16x128xf32>
    %243 = arith.subf %242, %240 : vector<16x128xf32>
    %244 = arith.mulf %243, %95 : vector<16x128xf32>
    %245 = arith.addf %241, %244 : vector<16x128xf32>
    %c13_43 = arith.constant 13 : index
    %246 = memref.load %arg3[%c13_43] : memref<16xf32, #tpu.memory_space<smem>>
    %247 = vector.broadcast %246 : f32 to vector<16x128xf32>
    %248 = arith.subf %4, %247 : vector<16x128xf32>
    %c13_44 = arith.constant 13 : index
    %249 = memref.load %arg4[%c13_44] : memref<96xf32, #tpu.memory_space<smem>>
    %250 = vector.broadcast %249 : f32 to vector<16x128xf32>
    %251 = arith.mulf %248, %250 : vector<16x128xf32>
    %252 = arith.mulf %240, %95 : vector<16x128xf32>
    %cst_45 = arith.constant 1.000000e+00 : f32
    %253 = vector.broadcast %cst_45 : f32 to vector<16x128xf32>
    %254 = arith.subf %253, %251 : vector<16x128xf32>
    %255 = arith.mulf %254, %101 : vector<16x128xf32>
    %256 = arith.addf %252, %255 : vector<16x128xf32>
    %c14_46 = arith.constant 14 : index
    %257 = memref.load %arg3[%c14_46] : memref<16xf32, #tpu.memory_space<smem>>
    %258 = vector.broadcast %257 : f32 to vector<16x128xf32>
    %259 = arith.subf %4, %258 : vector<16x128xf32>
    %c14_47 = arith.constant 14 : index
    %260 = memref.load %arg4[%c14_47] : memref<96xf32, #tpu.memory_space<smem>>
    %261 = vector.broadcast %260 : f32 to vector<16x128xf32>
    %262 = arith.mulf %259, %261 : vector<16x128xf32>
    %263 = arith.mulf %251, %101 : vector<16x128xf32>
    %cst_48 = arith.constant 1.000000e+00 : f32
    %264 = vector.broadcast %cst_48 : f32 to vector<16x128xf32>
    %265 = arith.subf %264, %262 : vector<16x128xf32>
    %266 = arith.mulf %265, %107 : vector<16x128xf32>
    %267 = arith.addf %263, %266 : vector<16x128xf32>
    %c0_49 = arith.constant 0 : index
    %268 = memref.load %arg3[%c0_49] : memref<16xf32, #tpu.memory_space<smem>>
    %269 = vector.broadcast %268 : f32 to vector<16x128xf32>
    %270 = arith.subf %4, %269 : vector<16x128xf32>
    %c16 = arith.constant 16 : index
    %271 = memref.load %arg4[%c16] : memref<96xf32, #tpu.memory_space<smem>>
    %272 = vector.broadcast %271 : f32 to vector<16x128xf32>
    %273 = arith.mulf %270, %272 : vector<16x128xf32>
    %c1_50 = arith.constant 1 : index
    %274 = memref.load %arg3[%c1_50] : memref<16xf32, #tpu.memory_space<smem>>
    %275 = vector.broadcast %274 : f32 to vector<16x128xf32>
    %276 = arith.subf %4, %275 : vector<16x128xf32>
    %c17 = arith.constant 17 : index
    %277 = memref.load %arg4[%c17] : memref<96xf32, #tpu.memory_space<smem>>
    %278 = vector.broadcast %277 : f32 to vector<16x128xf32>
    %279 = arith.mulf %276, %278 : vector<16x128xf32>
    %280 = arith.mulf %273, %124 : vector<16x128xf32>
    %cst_51 = arith.constant 1.000000e+00 : f32
    %281 = vector.broadcast %cst_51 : f32 to vector<16x128xf32>
    %282 = arith.subf %281, %279 : vector<16x128xf32>
    %283 = arith.mulf %282, %135 : vector<16x128xf32>
    %284 = arith.addf %280, %283 : vector<16x128xf32>
    %c2_52 = arith.constant 2 : index
    %285 = memref.load %arg3[%c2_52] : memref<16xf32, #tpu.memory_space<smem>>
    %286 = vector.broadcast %285 : f32 to vector<16x128xf32>
    %287 = arith.subf %4, %286 : vector<16x128xf32>
    %c18 = arith.constant 18 : index
    %288 = memref.load %arg4[%c18] : memref<96xf32, #tpu.memory_space<smem>>
    %289 = vector.broadcast %288 : f32 to vector<16x128xf32>
    %290 = arith.mulf %287, %289 : vector<16x128xf32>
    %291 = arith.mulf %279, %135 : vector<16x128xf32>
    %cst_53 = arith.constant 1.000000e+00 : f32
    %292 = vector.broadcast %cst_53 : f32 to vector<16x128xf32>
    %293 = arith.subf %292, %290 : vector<16x128xf32>
    %294 = arith.mulf %293, %146 : vector<16x128xf32>
    %295 = arith.addf %291, %294 : vector<16x128xf32>
    %c3_54 = arith.constant 3 : index
    %296 = memref.load %arg3[%c3_54] : memref<16xf32, #tpu.memory_space<smem>>
    %297 = vector.broadcast %296 : f32 to vector<16x128xf32>
    %298 = arith.subf %4, %297 : vector<16x128xf32>
    %c19 = arith.constant 19 : index
    %299 = memref.load %arg4[%c19] : memref<96xf32, #tpu.memory_space<smem>>
    %300 = vector.broadcast %299 : f32 to vector<16x128xf32>
    %301 = arith.mulf %298, %300 : vector<16x128xf32>
    %302 = arith.mulf %290, %146 : vector<16x128xf32>
    %cst_55 = arith.constant 1.000000e+00 : f32
    %303 = vector.broadcast %cst_55 : f32 to vector<16x128xf32>
    %304 = arith.subf %303, %301 : vector<16x128xf32>
    %305 = arith.mulf %304, %157 : vector<16x128xf32>
    %306 = arith.addf %302, %305 : vector<16x128xf32>
    %c4_56 = arith.constant 4 : index
    %307 = memref.load %arg3[%c4_56] : memref<16xf32, #tpu.memory_space<smem>>
    %308 = vector.broadcast %307 : f32 to vector<16x128xf32>
    %309 = arith.subf %4, %308 : vector<16x128xf32>
    %c20 = arith.constant 20 : index
    %310 = memref.load %arg4[%c20] : memref<96xf32, #tpu.memory_space<smem>>
    %311 = vector.broadcast %310 : f32 to vector<16x128xf32>
    %312 = arith.mulf %309, %311 : vector<16x128xf32>
    %313 = arith.mulf %301, %157 : vector<16x128xf32>
    %cst_57 = arith.constant 1.000000e+00 : f32
    %314 = vector.broadcast %cst_57 : f32 to vector<16x128xf32>
    %315 = arith.subf %314, %312 : vector<16x128xf32>
    %316 = arith.mulf %315, %168 : vector<16x128xf32>
    %317 = arith.addf %313, %316 : vector<16x128xf32>
    %c5_58 = arith.constant 5 : index
    %318 = memref.load %arg3[%c5_58] : memref<16xf32, #tpu.memory_space<smem>>
    %319 = vector.broadcast %318 : f32 to vector<16x128xf32>
    %320 = arith.subf %4, %319 : vector<16x128xf32>
    %c21 = arith.constant 21 : index
    %321 = memref.load %arg4[%c21] : memref<96xf32, #tpu.memory_space<smem>>
    %322 = vector.broadcast %321 : f32 to vector<16x128xf32>
    %323 = arith.mulf %320, %322 : vector<16x128xf32>
    %324 = arith.mulf %312, %168 : vector<16x128xf32>
    %cst_59 = arith.constant 1.000000e+00 : f32
    %325 = vector.broadcast %cst_59 : f32 to vector<16x128xf32>
    %326 = arith.subf %325, %323 : vector<16x128xf32>
    %327 = arith.mulf %326, %179 : vector<16x128xf32>
    %328 = arith.addf %324, %327 : vector<16x128xf32>
    %c6_60 = arith.constant 6 : index
    %329 = memref.load %arg3[%c6_60] : memref<16xf32, #tpu.memory_space<smem>>
    %330 = vector.broadcast %329 : f32 to vector<16x128xf32>
    %331 = arith.subf %4, %330 : vector<16x128xf32>
    %c22 = arith.constant 22 : index
    %332 = memref.load %arg4[%c22] : memref<96xf32, #tpu.memory_space<smem>>
    %333 = vector.broadcast %332 : f32 to vector<16x128xf32>
    %334 = arith.mulf %331, %333 : vector<16x128xf32>
    %335 = arith.mulf %323, %179 : vector<16x128xf32>
    %cst_61 = arith.constant 1.000000e+00 : f32
    %336 = vector.broadcast %cst_61 : f32 to vector<16x128xf32>
    %337 = arith.subf %336, %334 : vector<16x128xf32>
    %338 = arith.mulf %337, %190 : vector<16x128xf32>
    %339 = arith.addf %335, %338 : vector<16x128xf32>
    %c7_62 = arith.constant 7 : index
    %340 = memref.load %arg3[%c7_62] : memref<16xf32, #tpu.memory_space<smem>>
    %341 = vector.broadcast %340 : f32 to vector<16x128xf32>
    %342 = arith.subf %4, %341 : vector<16x128xf32>
    %c23 = arith.constant 23 : index
    %343 = memref.load %arg4[%c23] : memref<96xf32, #tpu.memory_space<smem>>
    %344 = vector.broadcast %343 : f32 to vector<16x128xf32>
    %345 = arith.mulf %342, %344 : vector<16x128xf32>
    %346 = arith.mulf %334, %190 : vector<16x128xf32>
    %cst_63 = arith.constant 1.000000e+00 : f32
    %347 = vector.broadcast %cst_63 : f32 to vector<16x128xf32>
    %348 = arith.subf %347, %345 : vector<16x128xf32>
    %349 = arith.mulf %348, %201 : vector<16x128xf32>
    %350 = arith.addf %346, %349 : vector<16x128xf32>
    %c8_64 = arith.constant 8 : index
    %351 = memref.load %arg3[%c8_64] : memref<16xf32, #tpu.memory_space<smem>>
    %352 = vector.broadcast %351 : f32 to vector<16x128xf32>
    %353 = arith.subf %4, %352 : vector<16x128xf32>
    %c24 = arith.constant 24 : index
    %354 = memref.load %arg4[%c24] : memref<96xf32, #tpu.memory_space<smem>>
    %355 = vector.broadcast %354 : f32 to vector<16x128xf32>
    %356 = arith.mulf %353, %355 : vector<16x128xf32>
    %357 = arith.mulf %345, %201 : vector<16x128xf32>
    %cst_65 = arith.constant 1.000000e+00 : f32
    %358 = vector.broadcast %cst_65 : f32 to vector<16x128xf32>
    %359 = arith.subf %358, %356 : vector<16x128xf32>
    %360 = arith.mulf %359, %212 : vector<16x128xf32>
    %361 = arith.addf %357, %360 : vector<16x128xf32>
    %c9_66 = arith.constant 9 : index
    %362 = memref.load %arg3[%c9_66] : memref<16xf32, #tpu.memory_space<smem>>
    %363 = vector.broadcast %362 : f32 to vector<16x128xf32>
    %364 = arith.subf %4, %363 : vector<16x128xf32>
    %c25 = arith.constant 25 : index
    %365 = memref.load %arg4[%c25] : memref<96xf32, #tpu.memory_space<smem>>
    %366 = vector.broadcast %365 : f32 to vector<16x128xf32>
    %367 = arith.mulf %364, %366 : vector<16x128xf32>
    %368 = arith.mulf %356, %212 : vector<16x128xf32>
    %cst_67 = arith.constant 1.000000e+00 : f32
    %369 = vector.broadcast %cst_67 : f32 to vector<16x128xf32>
    %370 = arith.subf %369, %367 : vector<16x128xf32>
    %371 = arith.mulf %370, %223 : vector<16x128xf32>
    %372 = arith.addf %368, %371 : vector<16x128xf32>
    %c10_68 = arith.constant 10 : index
    %373 = memref.load %arg3[%c10_68] : memref<16xf32, #tpu.memory_space<smem>>
    %374 = vector.broadcast %373 : f32 to vector<16x128xf32>
    %375 = arith.subf %4, %374 : vector<16x128xf32>
    %c26 = arith.constant 26 : index
    %376 = memref.load %arg4[%c26] : memref<96xf32, #tpu.memory_space<smem>>
    %377 = vector.broadcast %376 : f32 to vector<16x128xf32>
    %378 = arith.mulf %375, %377 : vector<16x128xf32>
    %379 = arith.mulf %367, %223 : vector<16x128xf32>
    %cst_69 = arith.constant 1.000000e+00 : f32
    %380 = vector.broadcast %cst_69 : f32 to vector<16x128xf32>
    %381 = arith.subf %380, %378 : vector<16x128xf32>
    %382 = arith.mulf %381, %234 : vector<16x128xf32>
    %383 = arith.addf %379, %382 : vector<16x128xf32>
    %c11_70 = arith.constant 11 : index
    %384 = memref.load %arg3[%c11_70] : memref<16xf32, #tpu.memory_space<smem>>
    %385 = vector.broadcast %384 : f32 to vector<16x128xf32>
    %386 = arith.subf %4, %385 : vector<16x128xf32>
    %c27 = arith.constant 27 : index
    %387 = memref.load %arg4[%c27] : memref<96xf32, #tpu.memory_space<smem>>
    %388 = vector.broadcast %387 : f32 to vector<16x128xf32>
    %389 = arith.mulf %386, %388 : vector<16x128xf32>
    %390 = arith.mulf %378, %234 : vector<16x128xf32>
    %cst_71 = arith.constant 1.000000e+00 : f32
    %391 = vector.broadcast %cst_71 : f32 to vector<16x128xf32>
    %392 = arith.subf %391, %389 : vector<16x128xf32>
    %393 = arith.mulf %392, %245 : vector<16x128xf32>
    %394 = arith.addf %390, %393 : vector<16x128xf32>
    %c12_72 = arith.constant 12 : index
    %395 = memref.load %arg3[%c12_72] : memref<16xf32, #tpu.memory_space<smem>>
    %396 = vector.broadcast %395 : f32 to vector<16x128xf32>
    %397 = arith.subf %4, %396 : vector<16x128xf32>
    %c28 = arith.constant 28 : index
    %398 = memref.load %arg4[%c28] : memref<96xf32, #tpu.memory_space<smem>>
    %399 = vector.broadcast %398 : f32 to vector<16x128xf32>
    %400 = arith.mulf %397, %399 : vector<16x128xf32>
    %401 = arith.mulf %389, %245 : vector<16x128xf32>
    %cst_73 = arith.constant 1.000000e+00 : f32
    %402 = vector.broadcast %cst_73 : f32 to vector<16x128xf32>
    %403 = arith.subf %402, %400 : vector<16x128xf32>
    %404 = arith.mulf %403, %256 : vector<16x128xf32>
    %405 = arith.addf %401, %404 : vector<16x128xf32>
    %c13_74 = arith.constant 13 : index
    %406 = memref.load %arg3[%c13_74] : memref<16xf32, #tpu.memory_space<smem>>
    %407 = vector.broadcast %406 : f32 to vector<16x128xf32>
    %408 = arith.subf %4, %407 : vector<16x128xf32>
    %c29 = arith.constant 29 : index
    %409 = memref.load %arg4[%c29] : memref<96xf32, #tpu.memory_space<smem>>
    %410 = vector.broadcast %409 : f32 to vector<16x128xf32>
    %411 = arith.mulf %408, %410 : vector<16x128xf32>
    %412 = arith.mulf %400, %256 : vector<16x128xf32>
    %cst_75 = arith.constant 1.000000e+00 : f32
    %413 = vector.broadcast %cst_75 : f32 to vector<16x128xf32>
    %414 = arith.subf %413, %411 : vector<16x128xf32>
    %415 = arith.mulf %414, %267 : vector<16x128xf32>
    %416 = arith.addf %412, %415 : vector<16x128xf32>
    %c0_76 = arith.constant 0 : index
    %417 = memref.load %arg3[%c0_76] : memref<16xf32, #tpu.memory_space<smem>>
    %418 = vector.broadcast %417 : f32 to vector<16x128xf32>
    %419 = arith.subf %4, %418 : vector<16x128xf32>
    %c32 = arith.constant 32 : index
    %420 = memref.load %arg4[%c32] : memref<96xf32, #tpu.memory_space<smem>>
    %421 = vector.broadcast %420 : f32 to vector<16x128xf32>
    %422 = arith.mulf %419, %421 : vector<16x128xf32>
    %c1_77 = arith.constant 1 : index
    %423 = memref.load %arg3[%c1_77] : memref<16xf32, #tpu.memory_space<smem>>
    %424 = vector.broadcast %423 : f32 to vector<16x128xf32>
    %425 = arith.subf %4, %424 : vector<16x128xf32>
    %c33 = arith.constant 33 : index
    %426 = memref.load %arg4[%c33] : memref<96xf32, #tpu.memory_space<smem>>
    %427 = vector.broadcast %426 : f32 to vector<16x128xf32>
    %428 = arith.mulf %425, %427 : vector<16x128xf32>
    %429 = arith.mulf %422, %284 : vector<16x128xf32>
    %cst_78 = arith.constant 1.000000e+00 : f32
    %430 = vector.broadcast %cst_78 : f32 to vector<16x128xf32>
    %431 = arith.subf %430, %428 : vector<16x128xf32>
    %432 = arith.mulf %431, %295 : vector<16x128xf32>
    %433 = arith.addf %429, %432 : vector<16x128xf32>
    %c2_79 = arith.constant 2 : index
    %434 = memref.load %arg3[%c2_79] : memref<16xf32, #tpu.memory_space<smem>>
    %435 = vector.broadcast %434 : f32 to vector<16x128xf32>
    %436 = arith.subf %4, %435 : vector<16x128xf32>
    %c34 = arith.constant 34 : index
    %437 = memref.load %arg4[%c34] : memref<96xf32, #tpu.memory_space<smem>>
    %438 = vector.broadcast %437 : f32 to vector<16x128xf32>
    %439 = arith.mulf %436, %438 : vector<16x128xf32>
    %440 = arith.mulf %428, %295 : vector<16x128xf32>
    %cst_80 = arith.constant 1.000000e+00 : f32
    %441 = vector.broadcast %cst_80 : f32 to vector<16x128xf32>
    %442 = arith.subf %441, %439 : vector<16x128xf32>
    %443 = arith.mulf %442, %306 : vector<16x128xf32>
    %444 = arith.addf %440, %443 : vector<16x128xf32>
    %c3_81 = arith.constant 3 : index
    %445 = memref.load %arg3[%c3_81] : memref<16xf32, #tpu.memory_space<smem>>
    %446 = vector.broadcast %445 : f32 to vector<16x128xf32>
    %447 = arith.subf %4, %446 : vector<16x128xf32>
    %c35 = arith.constant 35 : index
    %448 = memref.load %arg4[%c35] : memref<96xf32, #tpu.memory_space<smem>>
    %449 = vector.broadcast %448 : f32 to vector<16x128xf32>
    %450 = arith.mulf %447, %449 : vector<16x128xf32>
    %451 = arith.mulf %439, %306 : vector<16x128xf32>
    %cst_82 = arith.constant 1.000000e+00 : f32
    %452 = vector.broadcast %cst_82 : f32 to vector<16x128xf32>
    %453 = arith.subf %452, %450 : vector<16x128xf32>
    %454 = arith.mulf %453, %317 : vector<16x128xf32>
    %455 = arith.addf %451, %454 : vector<16x128xf32>
    %c4_83 = arith.constant 4 : index
    %456 = memref.load %arg3[%c4_83] : memref<16xf32, #tpu.memory_space<smem>>
    %457 = vector.broadcast %456 : f32 to vector<16x128xf32>
    %458 = arith.subf %4, %457 : vector<16x128xf32>
    %c36 = arith.constant 36 : index
    %459 = memref.load %arg4[%c36] : memref<96xf32, #tpu.memory_space<smem>>
    %460 = vector.broadcast %459 : f32 to vector<16x128xf32>
    %461 = arith.mulf %458, %460 : vector<16x128xf32>
    %462 = arith.mulf %450, %317 : vector<16x128xf32>
    %cst_84 = arith.constant 1.000000e+00 : f32
    %463 = vector.broadcast %cst_84 : f32 to vector<16x128xf32>
    %464 = arith.subf %463, %461 : vector<16x128xf32>
    %465 = arith.mulf %464, %328 : vector<16x128xf32>
    %466 = arith.addf %462, %465 : vector<16x128xf32>
    %c5_85 = arith.constant 5 : index
    %467 = memref.load %arg3[%c5_85] : memref<16xf32, #tpu.memory_space<smem>>
    %468 = vector.broadcast %467 : f32 to vector<16x128xf32>
    %469 = arith.subf %4, %468 : vector<16x128xf32>
    %c37 = arith.constant 37 : index
    %470 = memref.load %arg4[%c37] : memref<96xf32, #tpu.memory_space<smem>>
    %471 = vector.broadcast %470 : f32 to vector<16x128xf32>
    %472 = arith.mulf %469, %471 : vector<16x128xf32>
    %473 = arith.mulf %461, %328 : vector<16x128xf32>
    %cst_86 = arith.constant 1.000000e+00 : f32
    %474 = vector.broadcast %cst_86 : f32 to vector<16x128xf32>
    %475 = arith.subf %474, %472 : vector<16x128xf32>
    %476 = arith.mulf %475, %339 : vector<16x128xf32>
    %477 = arith.addf %473, %476 : vector<16x128xf32>
    %c6_87 = arith.constant 6 : index
    %478 = memref.load %arg3[%c6_87] : memref<16xf32, #tpu.memory_space<smem>>
    %479 = vector.broadcast %478 : f32 to vector<16x128xf32>
    %480 = arith.subf %4, %479 : vector<16x128xf32>
    %c38 = arith.constant 38 : index
    %481 = memref.load %arg4[%c38] : memref<96xf32, #tpu.memory_space<smem>>
    %482 = vector.broadcast %481 : f32 to vector<16x128xf32>
    %483 = arith.mulf %480, %482 : vector<16x128xf32>
    %484 = arith.mulf %472, %339 : vector<16x128xf32>
    %cst_88 = arith.constant 1.000000e+00 : f32
    %485 = vector.broadcast %cst_88 : f32 to vector<16x128xf32>
    %486 = arith.subf %485, %483 : vector<16x128xf32>
    %487 = arith.mulf %486, %350 : vector<16x128xf32>
    %488 = arith.addf %484, %487 : vector<16x128xf32>
    %c7_89 = arith.constant 7 : index
    %489 = memref.load %arg3[%c7_89] : memref<16xf32, #tpu.memory_space<smem>>
    %490 = vector.broadcast %489 : f32 to vector<16x128xf32>
    %491 = arith.subf %4, %490 : vector<16x128xf32>
    %c39 = arith.constant 39 : index
    %492 = memref.load %arg4[%c39] : memref<96xf32, #tpu.memory_space<smem>>
    %493 = vector.broadcast %492 : f32 to vector<16x128xf32>
    %494 = arith.mulf %491, %493 : vector<16x128xf32>
    %495 = arith.mulf %483, %350 : vector<16x128xf32>
    %cst_90 = arith.constant 1.000000e+00 : f32
    %496 = vector.broadcast %cst_90 : f32 to vector<16x128xf32>
    %497 = arith.subf %496, %494 : vector<16x128xf32>
    %498 = arith.mulf %497, %361 : vector<16x128xf32>
    %499 = arith.addf %495, %498 : vector<16x128xf32>
    %c8_91 = arith.constant 8 : index
    %500 = memref.load %arg3[%c8_91] : memref<16xf32, #tpu.memory_space<smem>>
    %501 = vector.broadcast %500 : f32 to vector<16x128xf32>
    %502 = arith.subf %4, %501 : vector<16x128xf32>
    %c40 = arith.constant 40 : index
    %503 = memref.load %arg4[%c40] : memref<96xf32, #tpu.memory_space<smem>>
    %504 = vector.broadcast %503 : f32 to vector<16x128xf32>
    %505 = arith.mulf %502, %504 : vector<16x128xf32>
    %506 = arith.mulf %494, %361 : vector<16x128xf32>
    %cst_92 = arith.constant 1.000000e+00 : f32
    %507 = vector.broadcast %cst_92 : f32 to vector<16x128xf32>
    %508 = arith.subf %507, %505 : vector<16x128xf32>
    %509 = arith.mulf %508, %372 : vector<16x128xf32>
    %510 = arith.addf %506, %509 : vector<16x128xf32>
    %c9_93 = arith.constant 9 : index
    %511 = memref.load %arg3[%c9_93] : memref<16xf32, #tpu.memory_space<smem>>
    %512 = vector.broadcast %511 : f32 to vector<16x128xf32>
    %513 = arith.subf %4, %512 : vector<16x128xf32>
    %c41 = arith.constant 41 : index
    %514 = memref.load %arg4[%c41] : memref<96xf32, #tpu.memory_space<smem>>
    %515 = vector.broadcast %514 : f32 to vector<16x128xf32>
    %516 = arith.mulf %513, %515 : vector<16x128xf32>
    %517 = arith.mulf %505, %372 : vector<16x128xf32>
    %cst_94 = arith.constant 1.000000e+00 : f32
    %518 = vector.broadcast %cst_94 : f32 to vector<16x128xf32>
    %519 = arith.subf %518, %516 : vector<16x128xf32>
    %520 = arith.mulf %519, %383 : vector<16x128xf32>
    %521 = arith.addf %517, %520 : vector<16x128xf32>
    %c10_95 = arith.constant 10 : index
    %522 = memref.load %arg3[%c10_95] : memref<16xf32, #tpu.memory_space<smem>>
    %523 = vector.broadcast %522 : f32 to vector<16x128xf32>
    %524 = arith.subf %4, %523 : vector<16x128xf32>
    %c42 = arith.constant 42 : index
    %525 = memref.load %arg4[%c42] : memref<96xf32, #tpu.memory_space<smem>>
    %526 = vector.broadcast %525 : f32 to vector<16x128xf32>
    %527 = arith.mulf %524, %526 : vector<16x128xf32>
    %528 = arith.mulf %516, %383 : vector<16x128xf32>
    %cst_96 = arith.constant 1.000000e+00 : f32
    %529 = vector.broadcast %cst_96 : f32 to vector<16x128xf32>
    %530 = arith.subf %529, %527 : vector<16x128xf32>
    %531 = arith.mulf %530, %394 : vector<16x128xf32>
    %532 = arith.addf %528, %531 : vector<16x128xf32>
    %c11_97 = arith.constant 11 : index
    %533 = memref.load %arg3[%c11_97] : memref<16xf32, #tpu.memory_space<smem>>
    %534 = vector.broadcast %533 : f32 to vector<16x128xf32>
    %535 = arith.subf %4, %534 : vector<16x128xf32>
    %c43 = arith.constant 43 : index
    %536 = memref.load %arg4[%c43] : memref<96xf32, #tpu.memory_space<smem>>
    %537 = vector.broadcast %536 : f32 to vector<16x128xf32>
    %538 = arith.mulf %535, %537 : vector<16x128xf32>
    %539 = arith.mulf %527, %394 : vector<16x128xf32>
    %cst_98 = arith.constant 1.000000e+00 : f32
    %540 = vector.broadcast %cst_98 : f32 to vector<16x128xf32>
    %541 = arith.subf %540, %538 : vector<16x128xf32>
    %542 = arith.mulf %541, %405 : vector<16x128xf32>
    %543 = arith.addf %539, %542 : vector<16x128xf32>
    %c12_99 = arith.constant 12 : index
    %544 = memref.load %arg3[%c12_99] : memref<16xf32, #tpu.memory_space<smem>>
    %545 = vector.broadcast %544 : f32 to vector<16x128xf32>
    %546 = arith.subf %4, %545 : vector<16x128xf32>
    %c44 = arith.constant 44 : index
    %547 = memref.load %arg4[%c44] : memref<96xf32, #tpu.memory_space<smem>>
    %548 = vector.broadcast %547 : f32 to vector<16x128xf32>
    %549 = arith.mulf %546, %548 : vector<16x128xf32>
    %550 = arith.mulf %538, %405 : vector<16x128xf32>
    %cst_100 = arith.constant 1.000000e+00 : f32
    %551 = vector.broadcast %cst_100 : f32 to vector<16x128xf32>
    %552 = arith.subf %551, %549 : vector<16x128xf32>
    %553 = arith.mulf %552, %416 : vector<16x128xf32>
    %554 = arith.addf %550, %553 : vector<16x128xf32>
    %c0_101 = arith.constant 0 : index
    %555 = memref.load %arg3[%c0_101] : memref<16xf32, #tpu.memory_space<smem>>
    %556 = vector.broadcast %555 : f32 to vector<16x128xf32>
    %557 = arith.subf %4, %556 : vector<16x128xf32>
    %c48 = arith.constant 48 : index
    %558 = memref.load %arg4[%c48] : memref<96xf32, #tpu.memory_space<smem>>
    %559 = vector.broadcast %558 : f32 to vector<16x128xf32>
    %560 = arith.mulf %557, %559 : vector<16x128xf32>
    %c1_102 = arith.constant 1 : index
    %561 = memref.load %arg3[%c1_102] : memref<16xf32, #tpu.memory_space<smem>>
    %562 = vector.broadcast %561 : f32 to vector<16x128xf32>
    %563 = arith.subf %4, %562 : vector<16x128xf32>
    %c49 = arith.constant 49 : index
    %564 = memref.load %arg4[%c49] : memref<96xf32, #tpu.memory_space<smem>>
    %565 = vector.broadcast %564 : f32 to vector<16x128xf32>
    %566 = arith.mulf %563, %565 : vector<16x128xf32>
    %567 = arith.mulf %560, %433 : vector<16x128xf32>
    %cst_103 = arith.constant 1.000000e+00 : f32
    %568 = vector.broadcast %cst_103 : f32 to vector<16x128xf32>
    %569 = arith.subf %568, %566 : vector<16x128xf32>
    %570 = arith.mulf %569, %444 : vector<16x128xf32>
    %571 = arith.addf %567, %570 : vector<16x128xf32>
    %c2_104 = arith.constant 2 : index
    %572 = memref.load %arg3[%c2_104] : memref<16xf32, #tpu.memory_space<smem>>
    %573 = vector.broadcast %572 : f32 to vector<16x128xf32>
    %574 = arith.subf %4, %573 : vector<16x128xf32>
    %c50 = arith.constant 50 : index
    %575 = memref.load %arg4[%c50] : memref<96xf32, #tpu.memory_space<smem>>
    %576 = vector.broadcast %575 : f32 to vector<16x128xf32>
    %577 = arith.mulf %574, %576 : vector<16x128xf32>
    %578 = arith.mulf %566, %444 : vector<16x128xf32>
    %cst_105 = arith.constant 1.000000e+00 : f32
    %579 = vector.broadcast %cst_105 : f32 to vector<16x128xf32>
    %580 = arith.subf %579, %577 : vector<16x128xf32>
    %581 = arith.mulf %580, %455 : vector<16x128xf32>
    %582 = arith.addf %578, %581 : vector<16x128xf32>
    %c3_106 = arith.constant 3 : index
    %583 = memref.load %arg3[%c3_106] : memref<16xf32, #tpu.memory_space<smem>>
    %584 = vector.broadcast %583 : f32 to vector<16x128xf32>
    %585 = arith.subf %4, %584 : vector<16x128xf32>
    %c51 = arith.constant 51 : index
    %586 = memref.load %arg4[%c51] : memref<96xf32, #tpu.memory_space<smem>>
    %587 = vector.broadcast %586 : f32 to vector<16x128xf32>
    %588 = arith.mulf %585, %587 : vector<16x128xf32>
    %589 = arith.mulf %577, %455 : vector<16x128xf32>
    %cst_107 = arith.constant 1.000000e+00 : f32
    %590 = vector.broadcast %cst_107 : f32 to vector<16x128xf32>
    %591 = arith.subf %590, %588 : vector<16x128xf32>
    %592 = arith.mulf %591, %466 : vector<16x128xf32>
    %593 = arith.addf %589, %592 : vector<16x128xf32>
    %c4_108 = arith.constant 4 : index
    %594 = memref.load %arg3[%c4_108] : memref<16xf32, #tpu.memory_space<smem>>
    %595 = vector.broadcast %594 : f32 to vector<16x128xf32>
    %596 = arith.subf %4, %595 : vector<16x128xf32>
    %c52 = arith.constant 52 : index
    %597 = memref.load %arg4[%c52] : memref<96xf32, #tpu.memory_space<smem>>
    %598 = vector.broadcast %597 : f32 to vector<16x128xf32>
    %599 = arith.mulf %596, %598 : vector<16x128xf32>
    %600 = arith.mulf %588, %466 : vector<16x128xf32>
    %cst_109 = arith.constant 1.000000e+00 : f32
    %601 = vector.broadcast %cst_109 : f32 to vector<16x128xf32>
    %602 = arith.subf %601, %599 : vector<16x128xf32>
    %603 = arith.mulf %602, %477 : vector<16x128xf32>
    %604 = arith.addf %600, %603 : vector<16x128xf32>
    %c5_110 = arith.constant 5 : index
    %605 = memref.load %arg3[%c5_110] : memref<16xf32, #tpu.memory_space<smem>>
    %606 = vector.broadcast %605 : f32 to vector<16x128xf32>
    %607 = arith.subf %4, %606 : vector<16x128xf32>
    %c53 = arith.constant 53 : index
    %608 = memref.load %arg4[%c53] : memref<96xf32, #tpu.memory_space<smem>>
    %609 = vector.broadcast %608 : f32 to vector<16x128xf32>
    %610 = arith.mulf %607, %609 : vector<16x128xf32>
    %611 = arith.mulf %599, %477 : vector<16x128xf32>
    %cst_111 = arith.constant 1.000000e+00 : f32
    %612 = vector.broadcast %cst_111 : f32 to vector<16x128xf32>
    %613 = arith.subf %612, %610 : vector<16x128xf32>
    %614 = arith.mulf %613, %488 : vector<16x128xf32>
    %615 = arith.addf %611, %614 : vector<16x128xf32>
    %c6_112 = arith.constant 6 : index
    %616 = memref.load %arg3[%c6_112] : memref<16xf32, #tpu.memory_space<smem>>
    %617 = vector.broadcast %616 : f32 to vector<16x128xf32>
    %618 = arith.subf %4, %617 : vector<16x128xf32>
    %c54 = arith.constant 54 : index
    %619 = memref.load %arg4[%c54] : memref<96xf32, #tpu.memory_space<smem>>
    %620 = vector.broadcast %619 : f32 to vector<16x128xf32>
    %621 = arith.mulf %618, %620 : vector<16x128xf32>
    %622 = arith.mulf %610, %488 : vector<16x128xf32>
    %cst_113 = arith.constant 1.000000e+00 : f32
    %623 = vector.broadcast %cst_113 : f32 to vector<16x128xf32>
    %624 = arith.subf %623, %621 : vector<16x128xf32>
    %625 = arith.mulf %624, %499 : vector<16x128xf32>
    %626 = arith.addf %622, %625 : vector<16x128xf32>
    %c7_114 = arith.constant 7 : index
    %627 = memref.load %arg3[%c7_114] : memref<16xf32, #tpu.memory_space<smem>>
    %628 = vector.broadcast %627 : f32 to vector<16x128xf32>
    %629 = arith.subf %4, %628 : vector<16x128xf32>
    %c55 = arith.constant 55 : index
    %630 = memref.load %arg4[%c55] : memref<96xf32, #tpu.memory_space<smem>>
    %631 = vector.broadcast %630 : f32 to vector<16x128xf32>
    %632 = arith.mulf %629, %631 : vector<16x128xf32>
    %633 = arith.mulf %621, %499 : vector<16x128xf32>
    %cst_115 = arith.constant 1.000000e+00 : f32
    %634 = vector.broadcast %cst_115 : f32 to vector<16x128xf32>
    %635 = arith.subf %634, %632 : vector<16x128xf32>
    %636 = arith.mulf %635, %510 : vector<16x128xf32>
    %637 = arith.addf %633, %636 : vector<16x128xf32>
    %c8_116 = arith.constant 8 : index
    %638 = memref.load %arg3[%c8_116] : memref<16xf32, #tpu.memory_space<smem>>
    %639 = vector.broadcast %638 : f32 to vector<16x128xf32>
    %640 = arith.subf %4, %639 : vector<16x128xf32>
    %c56 = arith.constant 56 : index
    %641 = memref.load %arg4[%c56] : memref<96xf32, #tpu.memory_space<smem>>
    %642 = vector.broadcast %641 : f32 to vector<16x128xf32>
    %643 = arith.mulf %640, %642 : vector<16x128xf32>
    %644 = arith.mulf %632, %510 : vector<16x128xf32>
    %cst_117 = arith.constant 1.000000e+00 : f32
    %645 = vector.broadcast %cst_117 : f32 to vector<16x128xf32>
    %646 = arith.subf %645, %643 : vector<16x128xf32>
    %647 = arith.mulf %646, %521 : vector<16x128xf32>
    %648 = arith.addf %644, %647 : vector<16x128xf32>
    %c9_118 = arith.constant 9 : index
    %649 = memref.load %arg3[%c9_118] : memref<16xf32, #tpu.memory_space<smem>>
    %650 = vector.broadcast %649 : f32 to vector<16x128xf32>
    %651 = arith.subf %4, %650 : vector<16x128xf32>
    %c57 = arith.constant 57 : index
    %652 = memref.load %arg4[%c57] : memref<96xf32, #tpu.memory_space<smem>>
    %653 = vector.broadcast %652 : f32 to vector<16x128xf32>
    %654 = arith.mulf %651, %653 : vector<16x128xf32>
    %655 = arith.mulf %643, %521 : vector<16x128xf32>
    %cst_119 = arith.constant 1.000000e+00 : f32
    %656 = vector.broadcast %cst_119 : f32 to vector<16x128xf32>
    %657 = arith.subf %656, %654 : vector<16x128xf32>
    %658 = arith.mulf %657, %532 : vector<16x128xf32>
    %659 = arith.addf %655, %658 : vector<16x128xf32>
    %c10_120 = arith.constant 10 : index
    %660 = memref.load %arg3[%c10_120] : memref<16xf32, #tpu.memory_space<smem>>
    %661 = vector.broadcast %660 : f32 to vector<16x128xf32>
    %662 = arith.subf %4, %661 : vector<16x128xf32>
    %c58 = arith.constant 58 : index
    %663 = memref.load %arg4[%c58] : memref<96xf32, #tpu.memory_space<smem>>
    %664 = vector.broadcast %663 : f32 to vector<16x128xf32>
    %665 = arith.mulf %662, %664 : vector<16x128xf32>
    %666 = arith.mulf %654, %532 : vector<16x128xf32>
    %cst_121 = arith.constant 1.000000e+00 : f32
    %667 = vector.broadcast %cst_121 : f32 to vector<16x128xf32>
    %668 = arith.subf %667, %665 : vector<16x128xf32>
    %669 = arith.mulf %668, %543 : vector<16x128xf32>
    %670 = arith.addf %666, %669 : vector<16x128xf32>
    %c11_122 = arith.constant 11 : index
    %671 = memref.load %arg3[%c11_122] : memref<16xf32, #tpu.memory_space<smem>>
    %672 = vector.broadcast %671 : f32 to vector<16x128xf32>
    %673 = arith.subf %4, %672 : vector<16x128xf32>
    %c59 = arith.constant 59 : index
    %674 = memref.load %arg4[%c59] : memref<96xf32, #tpu.memory_space<smem>>
    %675 = vector.broadcast %674 : f32 to vector<16x128xf32>
    %676 = arith.mulf %673, %675 : vector<16x128xf32>
    %677 = arith.mulf %665, %543 : vector<16x128xf32>
    %cst_123 = arith.constant 1.000000e+00 : f32
    %678 = vector.broadcast %cst_123 : f32 to vector<16x128xf32>
    %679 = arith.subf %678, %676 : vector<16x128xf32>
    %680 = arith.mulf %679, %554 : vector<16x128xf32>
    %681 = arith.addf %677, %680 : vector<16x128xf32>
    %c0_124 = arith.constant 0 : index
    %682 = memref.load %arg3[%c0_124] : memref<16xf32, #tpu.memory_space<smem>>
    %683 = vector.broadcast %682 : f32 to vector<16x128xf32>
    %684 = arith.subf %4, %683 : vector<16x128xf32>
    %c64 = arith.constant 64 : index
    %685 = memref.load %arg4[%c64] : memref<96xf32, #tpu.memory_space<smem>>
    %686 = vector.broadcast %685 : f32 to vector<16x128xf32>
    %687 = arith.mulf %684, %686 : vector<16x128xf32>
    %c1_125 = arith.constant 1 : index
    %688 = memref.load %arg3[%c1_125] : memref<16xf32, #tpu.memory_space<smem>>
    %689 = vector.broadcast %688 : f32 to vector<16x128xf32>
    %690 = arith.subf %4, %689 : vector<16x128xf32>
    %c65 = arith.constant 65 : index
    %691 = memref.load %arg4[%c65] : memref<96xf32, #tpu.memory_space<smem>>
    %692 = vector.broadcast %691 : f32 to vector<16x128xf32>
    %693 = arith.mulf %690, %692 : vector<16x128xf32>
    %694 = arith.mulf %687, %571 : vector<16x128xf32>
    %cst_126 = arith.constant 1.000000e+00 : f32
    %695 = vector.broadcast %cst_126 : f32 to vector<16x128xf32>
    %696 = arith.subf %695, %693 : vector<16x128xf32>
    %697 = arith.mulf %696, %582 : vector<16x128xf32>
    %698 = arith.addf %694, %697 : vector<16x128xf32>
    %c2_127 = arith.constant 2 : index
    %699 = memref.load %arg3[%c2_127] : memref<16xf32, #tpu.memory_space<smem>>
    %700 = vector.broadcast %699 : f32 to vector<16x128xf32>
    %701 = arith.subf %4, %700 : vector<16x128xf32>
    %c66 = arith.constant 66 : index
    %702 = memref.load %arg4[%c66] : memref<96xf32, #tpu.memory_space<smem>>
    %703 = vector.broadcast %702 : f32 to vector<16x128xf32>
    %704 = arith.mulf %701, %703 : vector<16x128xf32>
    %705 = arith.mulf %693, %582 : vector<16x128xf32>
    %cst_128 = arith.constant 1.000000e+00 : f32
    %706 = vector.broadcast %cst_128 : f32 to vector<16x128xf32>
    %707 = arith.subf %706, %704 : vector<16x128xf32>
    %708 = arith.mulf %707, %593 : vector<16x128xf32>
    %709 = arith.addf %705, %708 : vector<16x128xf32>
    %c3_129 = arith.constant 3 : index
    %710 = memref.load %arg3[%c3_129] : memref<16xf32, #tpu.memory_space<smem>>
    %711 = vector.broadcast %710 : f32 to vector<16x128xf32>
    %712 = arith.subf %4, %711 : vector<16x128xf32>
    %c67 = arith.constant 67 : index
    %713 = memref.load %arg4[%c67] : memref<96xf32, #tpu.memory_space<smem>>
    %714 = vector.broadcast %713 : f32 to vector<16x128xf32>
    %715 = arith.mulf %712, %714 : vector<16x128xf32>
    %716 = arith.mulf %704, %593 : vector<16x128xf32>
    %cst_130 = arith.constant 1.000000e+00 : f32
    %717 = vector.broadcast %cst_130 : f32 to vector<16x128xf32>
    %718 = arith.subf %717, %715 : vector<16x128xf32>
    %719 = arith.mulf %718, %604 : vector<16x128xf32>
    %720 = arith.addf %716, %719 : vector<16x128xf32>
    %c4_131 = arith.constant 4 : index
    %721 = memref.load %arg3[%c4_131] : memref<16xf32, #tpu.memory_space<smem>>
    %722 = vector.broadcast %721 : f32 to vector<16x128xf32>
    %723 = arith.subf %4, %722 : vector<16x128xf32>
    %c68 = arith.constant 68 : index
    %724 = memref.load %arg4[%c68] : memref<96xf32, #tpu.memory_space<smem>>
    %725 = vector.broadcast %724 : f32 to vector<16x128xf32>
    %726 = arith.mulf %723, %725 : vector<16x128xf32>
    %727 = arith.mulf %715, %604 : vector<16x128xf32>
    %cst_132 = arith.constant 1.000000e+00 : f32
    %728 = vector.broadcast %cst_132 : f32 to vector<16x128xf32>
    %729 = arith.subf %728, %726 : vector<16x128xf32>
    %730 = arith.mulf %729, %615 : vector<16x128xf32>
    %731 = arith.addf %727, %730 : vector<16x128xf32>
    %c5_133 = arith.constant 5 : index
    %732 = memref.load %arg3[%c5_133] : memref<16xf32, #tpu.memory_space<smem>>
    %733 = vector.broadcast %732 : f32 to vector<16x128xf32>
    %734 = arith.subf %4, %733 : vector<16x128xf32>
    %c69 = arith.constant 69 : index
    %735 = memref.load %arg4[%c69] : memref<96xf32, #tpu.memory_space<smem>>
    %736 = vector.broadcast %735 : f32 to vector<16x128xf32>
    %737 = arith.mulf %734, %736 : vector<16x128xf32>
    %738 = arith.mulf %726, %615 : vector<16x128xf32>
    %cst_134 = arith.constant 1.000000e+00 : f32
    %739 = vector.broadcast %cst_134 : f32 to vector<16x128xf32>
    %740 = arith.subf %739, %737 : vector<16x128xf32>
    %741 = arith.mulf %740, %626 : vector<16x128xf32>
    %742 = arith.addf %738, %741 : vector<16x128xf32>
    %c6_135 = arith.constant 6 : index
    %743 = memref.load %arg3[%c6_135] : memref<16xf32, #tpu.memory_space<smem>>
    %744 = vector.broadcast %743 : f32 to vector<16x128xf32>
    %745 = arith.subf %4, %744 : vector<16x128xf32>
    %c70 = arith.constant 70 : index
    %746 = memref.load %arg4[%c70] : memref<96xf32, #tpu.memory_space<smem>>
    %747 = vector.broadcast %746 : f32 to vector<16x128xf32>
    %748 = arith.mulf %745, %747 : vector<16x128xf32>
    %749 = arith.mulf %737, %626 : vector<16x128xf32>
    %cst_136 = arith.constant 1.000000e+00 : f32
    %750 = vector.broadcast %cst_136 : f32 to vector<16x128xf32>
    %751 = arith.subf %750, %748 : vector<16x128xf32>
    %752 = arith.mulf %751, %637 : vector<16x128xf32>
    %753 = arith.addf %749, %752 : vector<16x128xf32>
    %c7_137 = arith.constant 7 : index
    %754 = memref.load %arg3[%c7_137] : memref<16xf32, #tpu.memory_space<smem>>
    %755 = vector.broadcast %754 : f32 to vector<16x128xf32>
    %756 = arith.subf %4, %755 : vector<16x128xf32>
    %c71 = arith.constant 71 : index
    %757 = memref.load %arg4[%c71] : memref<96xf32, #tpu.memory_space<smem>>
    %758 = vector.broadcast %757 : f32 to vector<16x128xf32>
    %759 = arith.mulf %756, %758 : vector<16x128xf32>
    %760 = arith.mulf %748, %637 : vector<16x128xf32>
    %cst_138 = arith.constant 1.000000e+00 : f32
    %761 = vector.broadcast %cst_138 : f32 to vector<16x128xf32>
    %762 = arith.subf %761, %759 : vector<16x128xf32>
    %763 = arith.mulf %762, %648 : vector<16x128xf32>
    %764 = arith.addf %760, %763 : vector<16x128xf32>
    %c8_139 = arith.constant 8 : index
    %765 = memref.load %arg3[%c8_139] : memref<16xf32, #tpu.memory_space<smem>>
    %766 = vector.broadcast %765 : f32 to vector<16x128xf32>
    %767 = arith.subf %4, %766 : vector<16x128xf32>
    %c72 = arith.constant 72 : index
    %768 = memref.load %arg4[%c72] : memref<96xf32, #tpu.memory_space<smem>>
    %769 = vector.broadcast %768 : f32 to vector<16x128xf32>
    %770 = arith.mulf %767, %769 : vector<16x128xf32>
    %771 = arith.mulf %759, %648 : vector<16x128xf32>
    %cst_140 = arith.constant 1.000000e+00 : f32
    %772 = vector.broadcast %cst_140 : f32 to vector<16x128xf32>
    %773 = arith.subf %772, %770 : vector<16x128xf32>
    %774 = arith.mulf %773, %659 : vector<16x128xf32>
    %775 = arith.addf %771, %774 : vector<16x128xf32>
    %c9_141 = arith.constant 9 : index
    %776 = memref.load %arg3[%c9_141] : memref<16xf32, #tpu.memory_space<smem>>
    %777 = vector.broadcast %776 : f32 to vector<16x128xf32>
    %778 = arith.subf %4, %777 : vector<16x128xf32>
    %c73 = arith.constant 73 : index
    %779 = memref.load %arg4[%c73] : memref<96xf32, #tpu.memory_space<smem>>
    %780 = vector.broadcast %779 : f32 to vector<16x128xf32>
    %781 = arith.mulf %778, %780 : vector<16x128xf32>
    %782 = arith.mulf %770, %659 : vector<16x128xf32>
    %cst_142 = arith.constant 1.000000e+00 : f32
    %783 = vector.broadcast %cst_142 : f32 to vector<16x128xf32>
    %784 = arith.subf %783, %781 : vector<16x128xf32>
    %785 = arith.mulf %784, %670 : vector<16x128xf32>
    %786 = arith.addf %782, %785 : vector<16x128xf32>
    %c10_143 = arith.constant 10 : index
    %787 = memref.load %arg3[%c10_143] : memref<16xf32, #tpu.memory_space<smem>>
    %788 = vector.broadcast %787 : f32 to vector<16x128xf32>
    %789 = arith.subf %4, %788 : vector<16x128xf32>
    %c74 = arith.constant 74 : index
    %790 = memref.load %arg4[%c74] : memref<96xf32, #tpu.memory_space<smem>>
    %791 = vector.broadcast %790 : f32 to vector<16x128xf32>
    %792 = arith.mulf %789, %791 : vector<16x128xf32>
    %793 = arith.mulf %781, %670 : vector<16x128xf32>
    %cst_144 = arith.constant 1.000000e+00 : f32
    %794 = vector.broadcast %cst_144 : f32 to vector<16x128xf32>
    %795 = arith.subf %794, %792 : vector<16x128xf32>
    %796 = arith.mulf %795, %681 : vector<16x128xf32>
    %797 = arith.addf %793, %796 : vector<16x128xf32>
    %c0_145 = arith.constant 0 : index
    %798 = memref.load %arg3[%c0_145] : memref<16xf32, #tpu.memory_space<smem>>
    %799 = vector.broadcast %798 : f32 to vector<16x128xf32>
    %800 = arith.subf %4, %799 : vector<16x128xf32>
    %c80 = arith.constant 80 : index
    %801 = memref.load %arg4[%c80] : memref<96xf32, #tpu.memory_space<smem>>
    %802 = vector.broadcast %801 : f32 to vector<16x128xf32>
    %803 = arith.mulf %800, %802 : vector<16x128xf32>
    %c1_146 = arith.constant 1 : index
    %804 = memref.load %arg3[%c1_146] : memref<16xf32, #tpu.memory_space<smem>>
    %805 = vector.broadcast %804 : f32 to vector<16x128xf32>
    %806 = arith.subf %4, %805 : vector<16x128xf32>
    %c81 = arith.constant 81 : index
    %807 = memref.load %arg4[%c81] : memref<96xf32, #tpu.memory_space<smem>>
    %808 = vector.broadcast %807 : f32 to vector<16x128xf32>
    %809 = arith.mulf %806, %808 : vector<16x128xf32>
    %810 = arith.mulf %803, %698 : vector<16x128xf32>
    %cst_147 = arith.constant 1.000000e+00 : f32
    %811 = vector.broadcast %cst_147 : f32 to vector<16x128xf32>
    %812 = arith.subf %811, %809 : vector<16x128xf32>
    %813 = arith.mulf %812, %709 : vector<16x128xf32>
    %814 = arith.addf %810, %813 : vector<16x128xf32>
    %815 = arith.truncf %814 : vector<16x128xf32> to vector<16x128xbf16>
    %c16_148 = arith.constant 16 : index
    %c0_149 = arith.constant 0 : index
    %816 = vector.load %arg6[%c16_148, %c0_149] : memref<160x128xbf16, #tpu.memory_space<vmem>>, vector<16x128xbf16>
    tpu.vector_store %arg6[%c16_148, %c0_149], %815 {strides = array<i32>} : memref<160x128xbf16, #tpu.memory_space<vmem>>, vector<16x128xbf16>,
    %c2_150 = arith.constant 2 : index
    %817 = memref.load %arg3[%c2_150] : memref<16xf32, #tpu.memory_space<smem>>
    %818 = vector.broadcast %817 : f32 to vector<16x128xf32>
    %819 = arith.subf %4, %818 : vector<16x128xf32>
    %c82 = arith.constant 82 : index
    %820 = memref.load %arg4[%c82] : memref<96xf32, #tpu.memory_space<smem>>
    %821 = vector.broadcast %820 : f32 to vector<16x128xf32>
    %822 = arith.mulf %819, %821 : vector<16x128xf32>
    %823 = arith.mulf %809, %709 : vector<16x128xf32>
    %cst_151 = arith.constant 1.000000e+00 : f32
    %824 = vector.broadcast %cst_151 : f32 to vector<16x128xf32>
    %825 = arith.subf %824, %822 : vector<16x128xf32>
    %826 = arith.mulf %825, %720 : vector<16x128xf32>
    %827 = arith.addf %823, %826 : vector<16x128xf32>
    %828 = arith.truncf %827 : vector<16x128xf32> to vector<16x128xbf16>
    %c32_152 = arith.constant 32 : index
    %c0_153 = arith.constant 0 : index
    %829 = vector.load %arg6[%c32_152, %c0_153] : memref<160x128xbf16, #tpu.memory_space<vmem>>, vector<16x128xbf16>
    tpu.vector_store %arg6[%c32_152, %c0_153], %828 {strides = array<i32>} : memref<160x128xbf16, #tpu.memory_space<vmem>>, vector<16x128xbf16>,
    %c3_154 = arith.constant 3 : index
    %830 = memref.load %arg3[%c3_154] : memref<16xf32, #tpu.memory_space<smem>>
    %831 = vector.broadcast %830 : f32 to vector<16x128xf32>
    %832 = arith.subf %4, %831 : vector<16x128xf32>
    %c83 = arith.constant 83 : index
    %833 = memref.load %arg4[%c83] : memref<96xf32, #tpu.memory_space<smem>>
    %834 = vector.broadcast %833 : f32 to vector<16x128xf32>
    %835 = arith.mulf %832, %834 : vector<16x128xf32>
    %836 = arith.mulf %822, %720 : vector<16x128xf32>
    %cst_155 = arith.constant 1.000000e+00 : f32
    %837 = vector.broadcast %cst_155 : f32 to vector<16x128xf32>
    %838 = arith.subf %837, %835 : vector<16x128xf32>
    %839 = arith.mulf %838, %731 : vector<16x128xf32>
    %840 = arith.addf %836, %839 : vector<16x128xf32>
    %841 = arith.truncf %840 : vector<16x128xf32> to vector<16x128xbf16>
    %c48_156 = arith.constant 48 : index
    %c0_157 = arith.constant 0 : index
    %842 = vector.load %arg6[%c48_156, %c0_157] : memref<160x128xbf16, #tpu.memory_space<vmem>>, vector<16x128xbf16>
    tpu.vector_store %arg6[%c48_156, %c0_157], %841 {strides = array<i32>} : memref<160x128xbf16, #tpu.memory_space<vmem>>, vector<16x128xbf16>,
    %c4_158 = arith.constant 4 : index
    %843 = memref.load %arg3[%c4_158] : memref<16xf32, #tpu.memory_space<smem>>
    %844 = vector.broadcast %843 : f32 to vector<16x128xf32>
    %845 = arith.subf %4, %844 : vector<16x128xf32>
    %c84 = arith.constant 84 : index
    %846 = memref.load %arg4[%c84] : memref<96xf32, #tpu.memory_space<smem>>
    %847 = vector.broadcast %846 : f32 to vector<16x128xf32>
    %848 = arith.mulf %845, %847 : vector<16x128xf32>
    %849 = arith.mulf %835, %731 : vector<16x128xf32>
    %cst_159 = arith.constant 1.000000e+00 : f32
    %850 = vector.broadcast %cst_159 : f32 to vector<16x128xf32>
    %851 = arith.subf %850, %848 : vector<16x128xf32>
    %852 = arith.mulf %851, %742 : vector<16x128xf32>
    %853 = arith.addf %849, %852 : vector<16x128xf32>
    %854 = arith.truncf %853 : vector<16x128xf32> to vector<16x128xbf16>
    %c64_160 = arith.constant 64 : index
    %c0_161 = arith.constant 0 : index
    %855 = vector.load %arg6[%c64_160, %c0_161] : memref<160x128xbf16, #tpu.memory_space<vmem>>, vector<16x128xbf16>
    tpu.vector_store %arg6[%c64_160, %c0_161], %854 {strides = array<i32>} : memref<160x128xbf16, #tpu.memory_space<vmem>>, vector<16x128xbf16>,
    %c5_162 = arith.constant 5 : index
    %856 = memref.load %arg3[%c5_162] : memref<16xf32, #tpu.memory_space<smem>>
    %857 = vector.broadcast %856 : f32 to vector<16x128xf32>
    %858 = arith.subf %4, %857 : vector<16x128xf32>
    %c85 = arith.constant 85 : index
    %859 = memref.load %arg4[%c85] : memref<96xf32, #tpu.memory_space<smem>>
    %860 = vector.broadcast %859 : f32 to vector<16x128xf32>
    %861 = arith.mulf %858, %860 : vector<16x128xf32>
    %862 = arith.mulf %848, %742 : vector<16x128xf32>
    %cst_163 = arith.constant 1.000000e+00 : f32
    %863 = vector.broadcast %cst_163 : f32 to vector<16x128xf32>
    %864 = arith.subf %863, %861 : vector<16x128xf32>
    %865 = arith.mulf %864, %753 : vector<16x128xf32>
    %866 = arith.addf %862, %865 : vector<16x128xf32>
    %867 = arith.truncf %866 : vector<16x128xf32> to vector<16x128xbf16>
    %c80_164 = arith.constant 80 : index
    %c0_165 = arith.constant 0 : index
    %868 = vector.load %arg6[%c80_164, %c0_165] : memref<160x128xbf16, #tpu.memory_space<vmem>>, vector<16x128xbf16>
    tpu.vector_store %arg6[%c80_164, %c0_165], %867 {strides = array<i32>} : memref<160x128xbf16, #tpu.memory_space<vmem>>, vector<16x128xbf16>,
    %c6_166 = arith.constant 6 : index
    %869 = memref.load %arg3[%c6_166] : memref<16xf32, #tpu.memory_space<smem>>
    %870 = vector.broadcast %869 : f32 to vector<16x128xf32>
    %871 = arith.subf %4, %870 : vector<16x128xf32>
    %c86 = arith.constant 86 : index
    %872 = memref.load %arg4[%c86] : memref<96xf32, #tpu.memory_space<smem>>
    %873 = vector.broadcast %872 : f32 to vector<16x128xf32>
    %874 = arith.mulf %871, %873 : vector<16x128xf32>
    %875 = arith.mulf %861, %753 : vector<16x128xf32>
    %cst_167 = arith.constant 1.000000e+00 : f32
    %876 = vector.broadcast %cst_167 : f32 to vector<16x128xf32>
    %877 = arith.subf %876, %874 : vector<16x128xf32>
    %878 = arith.mulf %877, %764 : vector<16x128xf32>
    %879 = arith.addf %875, %878 : vector<16x128xf32>
    %880 = arith.truncf %879 : vector<16x128xf32> to vector<16x128xbf16>
    %c96 = arith.constant 96 : index
    %c0_168 = arith.constant 0 : index
    %881 = vector.load %arg6[%c96, %c0_168] : memref<160x128xbf16, #tpu.memory_space<vmem>>, vector<16x128xbf16>
    tpu.vector_store %arg6[%c96, %c0_168], %880 {strides = array<i32>} : memref<160x128xbf16, #tpu.memory_space<vmem>>, vector<16x128xbf16>,
    %c7_169 = arith.constant 7 : index
    %882 = memref.load %arg3[%c7_169] : memref<16xf32, #tpu.memory_space<smem>>
    %883 = vector.broadcast %882 : f32 to vector<16x128xf32>
    %884 = arith.subf %4, %883 : vector<16x128xf32>
    %c87 = arith.constant 87 : index
    %885 = memref.load %arg4[%c87] : memref<96xf32, #tpu.memory_space<smem>>
    %886 = vector.broadcast %885 : f32 to vector<16x128xf32>
    %887 = arith.mulf %884, %886 : vector<16x128xf32>
    %888 = arith.mulf %874, %764 : vector<16x128xf32>
    %cst_170 = arith.constant 1.000000e+00 : f32
    %889 = vector.broadcast %cst_170 : f32 to vector<16x128xf32>
    %890 = arith.subf %889, %887 : vector<16x128xf32>
    %891 = arith.mulf %890, %775 : vector<16x128xf32>
    %892 = arith.addf %888, %891 : vector<16x128xf32>
    %893 = arith.truncf %892 : vector<16x128xf32> to vector<16x128xbf16>
    %c112 = arith.constant 112 : index
    %c0_171 = arith.constant 0 : index
    %894 = vector.load %arg6[%c112, %c0_171] : memref<160x128xbf16, #tpu.memory_space<vmem>>, vector<16x128xbf16>
    tpu.vector_store %arg6[%c112, %c0_171], %893 {strides = array<i32>} : memref<160x128xbf16, #tpu.memory_space<vmem>>, vector<16x128xbf16>,
    %c8_172 = arith.constant 8 : index
    %895 = memref.load %arg3[%c8_172] : memref<16xf32, #tpu.memory_space<smem>>
    %896 = vector.broadcast %895 : f32 to vector<16x128xf32>
    %897 = arith.subf %4, %896 : vector<16x128xf32>
    %c88 = arith.constant 88 : index
    %898 = memref.load %arg4[%c88] : memref<96xf32, #tpu.memory_space<smem>>
    %899 = vector.broadcast %898 : f32 to vector<16x128xf32>
    %900 = arith.mulf %897, %899 : vector<16x128xf32>
    %901 = arith.mulf %887, %775 : vector<16x128xf32>
    %cst_173 = arith.constant 1.000000e+00 : f32
    %902 = vector.broadcast %cst_173 : f32 to vector<16x128xf32>
    %903 = arith.subf %902, %900 : vector<16x128xf32>
    %904 = arith.mulf %903, %786 : vector<16x128xf32>
    %905 = arith.addf %901, %904 : vector<16x128xf32>
    %906 = arith.truncf %905 : vector<16x128xf32> to vector<16x128xbf16>
    %c128 = arith.constant 128 : index
    %c0_174 = arith.constant 0 : index
    %907 = vector.load %arg6[%c128, %c0_174] : memref<160x128xbf16, #tpu.memory_space<vmem>>, vector<16x128xbf16>
    tpu.vector_store %arg6[%c128, %c0_174], %906 {strides = array<i32>} : memref<160x128xbf16, #tpu.memory_space<vmem>>, vector<16x128xbf16>,
    %c9_175 = arith.constant 9 : index
    %908 = memref.load %arg3[%c9_175] : memref<16xf32, #tpu.memory_space<smem>>
    %909 = vector.broadcast %908 : f32 to vector<16x128xf32>
    %910 = arith.subf %4, %909 : vector<16x128xf32>
    %c89 = arith.constant 89 : index
    %911 = memref.load %arg4[%c89] : memref<96xf32, #tpu.memory_space<smem>>
    %912 = vector.broadcast %911 : f32 to vector<16x128xf32>
    %913 = arith.mulf %910, %912 : vector<16x128xf32>
    %914 = arith.mulf %900, %786 : vector<16x128xf32>
    %cst_176 = arith.constant 1.000000e+00 : f32
    %915 = vector.broadcast %cst_176 : f32 to vector<16x128xf32>
    %916 = arith.subf %915, %913 : vector<16x128xf32>
    %917 = arith.mulf %916, %797 : vector<16x128xf32>
    %918 = arith.addf %914, %917 : vector<16x128xf32>
    %919 = arith.truncf %918 : vector<16x128xf32> to vector<16x128xbf16>
    %c144 = arith.constant 144 : index
    %c0_177 = arith.constant 0 : index
    %920 = vector.load %arg6[%c144, %c0_177] : memref<160x128xbf16, #tpu.memory_space<vmem>>, vector<16x128xbf16>
    tpu.vector_store %arg6[%c144, %c0_177], %919 {strides = array<i32>} : memref<160x128xbf16, #tpu.memory_space<vmem>>, vector<16x128xbf16>,
    %c0_178 = arith.constant 0 : index
    %c0_179 = arith.constant 0 : index
    %921 = vector.load %arg2[%c0_178, %c0_179] : memref<32x160xbf16, #tpu.memory_space<vmem>>, vector<32x160xbf16>
    %c0_180 = arith.constant 0 : index
    %c0_181 = arith.constant 0 : index
    %922 = vector.load %arg6[%c0_180, %c0_181] : memref<160x128xbf16, #tpu.memory_space<vmem>>, vector<160x128xbf16>
    %cst_182 = arith.constant dense<0.000000e+00> : vector<32x128xf32>
    %923 = tpu.matmul %921, %922, %cst_182 {dimension_numbers = #tpu.dot_dimension_numbers<[1], [0], [0], [1], [0, 0, 1, 1], [], []>} : vector<32x160xbf16>, vector<160x128xbf16>, vector<32x128xf32> -> vector<32x128xf32>
    %924 = arith.index_cast %1 : i32 to index
    %c0_183 = arith.constant 0 : index
    %c0_184 = arith.constant 0 : index
    %925 = vector.load %arg5[%924, %c0_183, %c0_184] : memref<1x32x128xf32, #tpu.memory_space<vmem>>, vector<1x32x128xf32>
    %926 = vector.shape_cast %925 : vector<1x32x128xf32> to vector<32x128xf32>
    %927 = vector.shape_cast %923 : vector<32x128xf32> to vector<1x32x128xf32>
    tpu.vector_store %arg5[%924, %c0_183, %c0_184], %927 {strides = array<i32>} : memref<1x32x128xf32, #tpu.memory_space<vmem>>, vector<1x32x128xf32>,
    %c1_i32_185 = arith.constant 1 : i32
    return
  }
  func.func @transform_0(%arg0: i32) -> (i32, i32, i32) {
    %c0_i32 = arith.constant 0 : i32
    %c0_i32_0 = arith.constant 0 : i32
    %c0_i32_1 = arith.constant 0 : i32
    return %arg0, %c0_i32, %c0_i32_0 : i32, i32, i32
  }
  func.func @transform_1(%arg0: i32) -> (i32, i32) {
    %c0_i32 = arith.constant 0 : i32
    %c0_i32_0 = arith.constant 0 : i32
    %c0_i32_1 = arith.constant 0 : i32
    return %c0_i32, %c0_i32_0 : i32, i32
  }
  func.func @transform_2(%arg0: i32) -> i32 {
    %c0_i32 = arith.constant 0 : i32
    %c0_i32_0 = arith.constant 0 : i32
    return %c0_i32 : i32
  }
  func.func @transform_3(%arg0: i32) -> i32 {
    %c0_i32 = arith.constant 0 : i32
    %c0_i32_0 = arith.constant 0 : i32
    return %c0_i32 : i32
  }
  func.func @transform_4(%arg0: i32) -> (i32, i32, i32) {
    %c0_i32 = arith.constant 0 : i32
    %c0_i32_0 = arith.constant 0 : i32
    %c0_i32_1 = arith.constant 0 : i32
    return %arg0, %c0_i32, %c0_i32_0 : i32, i32, i32
  }
}

</mosaic_0001>

<bundles_post_ra>
// kernel: tpu_custom_call.1
= control target key start
LH: loop header
LB: loop body
LE: loop exit
PB: predicated region body
PF: predicated region fallthrough
CT: control target
= control target key end

     0   :  { %9 = vsyncpa [#allocation4], 0  ;;  %s3197_s0 = inlined_call_operand.hbm [shape: f32[1,16,128], index: 0, kind: input, shape index: {}]   ;;  %s3198_s1 = inlined_call_operand.hbm [shape: bf16[32,160], index: 1, kind: input, shape index: {}]   ;;  %s3199_s2 = inlined_call_operand.vmem [shape: f32[16], index: 2, kind: input, shape index: {}]   ;;  %s3200_s3 = inlined_call_operand.vmem [shape: f32[96], index: 3, kind: input, shape index: {}]   ;;  %s3201_s4 = inlined_call_operand.hbm [shape: f32[1,32,128], index: 4, kind: output, shape index: {}]  }
   0x1   :  { %10 = vsyncpa [#allocation8], 0 }
   0x2   :  { %11 = vsyncpa [#allocation6], 0 }
   0x3   :  { %12 = vsyncpa [#allocation11], 0 }
   0x4   :  { %13 = vsyncpa [#allocation5], 0  ;;  %s1576_s15 = smov [#allocation3]   ;;  %s1476_s19 = scalar_lea.hbm %s3197_s0, 256 }
   0x5   :  { %s19_s16 = sshll.u32 %s1576_s15, 4  ;;  %p1477_p0 = scmp.ne.s32.totalorder %s3197_s0, %s1476_s19  ;;  %s20_s16 = int_to_ptr.vmem [resolvable:$true] %s19_s16 }
   0x6   :  { %p1480_p1 = scmp.lt.u32.totalorder %s1476_s19, %s3197_s0 }
   0x8   :  { %p1482_p2 = pnand %p1480_p1, %p1477_p0 }
   0xa   :  { %1485 = shalt.err (!%p1482_p2)
}
   0xb   :  { %s1486_s24 = scalar_lea.vmem %s20_s16, 256  ;;  %p1491_p4 = scmp.lt.s32.totalorder %s20_s16, %s20_s16 }
   0xc   :  { %p1487_p3 = scmp.ne.s32.totalorder %s20_s16, %s1486_s24  ;;  %p1492_p5 = scmp.lt.s32.totalorder %s1486_s24, %s1486_s24 }
   0xe   :  { %p1493_p6 = por %p1492_p5, %p1491_p4 }
  0x10   :  { %p1494_p7 = pnand %p1493_p6, %p1487_p3 }
  0x12   :  { %1497 = shalt.err (!%p1494_p7)
}
  0x13   :  { %s1577_s25 = smov 128   ;;  %s1578_s26 = smov 8  }
  0x14   :  { %25 = dma.hbm_to_vmem [thread:$0]  %s3197_s0, 256, %s20_s16, [#allocation4], %s1577_s25, %s1577_s25, %s1578_s26  }
  0x15   :  { %s1579_s29 = smov [#allocation7]   ;;  %s44_s7 = sshll.u32 %s3199_s2, 4  ;;  %s45_s7 = int_to_ptr.vmem [resolvable:$true] %s44_s7 }
  0x16   :  { %s31_s30 = sshll.u32 %s1579_s29, 4  ;;  %s1498_s10 = scalar_lea.hbm %s3198_s1, 512  ;;  %s32_s30 = int_to_ptr.vmem [resolvable:$true] %s31_s30 }
  0x17   :  { %p1499_p8 = scmp.ne.s32.totalorder %s3198_s1, %s1498_s10  ;;  %p1502_p9 = scmp.lt.u32.totalorder %s1498_s10, %s3198_s1 }
  0x19   :  { %p1504_p10 = pnand %p1502_p9, %p1499_p8 }
  0x1b   :  { %1507 = shalt.err (!%p1504_p10)
}
  0x1c   :  { %s1508_s0 = scalar_lea.vmem %s32_s30, 512  ;;  %p1513_p12 = scmp.lt.s32.totalorder %s32_s30, %s32_s30 }
  0x1d   :  { %p1509_p11 = scmp.ne.s32.totalorder %s32_s30, %s1508_s0  ;;  %p1514_p13 = scmp.lt.s32.totalorder %s1508_s0, %s1508_s0 }
  0x1f   :  { %p1515_p0 = por %p1514_p13, %p1513_p12 }
  0x21   :  { %p1516_p1 = pnand %p1515_p0, %p1509_p11 }
  0x23   :  { %1519 = shalt.err (!%p1516_p1)
}
  0x24   :  { %37 = dma.hbm_to_vmem [thread:$0]  %s3198_s1, 512, %s32_s30, [#allocation8], %s1577_s25, %s1577_s25, %s1578_s26  }
  0x25   :  { %s54_s18 = sshll.u32 %s3200_s3, 4  ;;  %s1520_s19 = scalar_lea.vmem %s45_s7, 16  ;;  %s55_s18 = int_to_ptr.vmem [resolvable:$true] %s54_s18 }
  0x26   :  { %p1521_p2 = scmp.ne.s32.totalorder %s45_s7, %s1520_s19  ;;  %p1525_p3 = scmp.lt.s32.totalorder %s45_s7, %s45_s7 }
  0x27   :  { %p1526_p4 = scmp.lt.s32.totalorder %s1520_s19, %s1520_s19 }
  0x29   :  { %p1527_p5 = por %p1526_p4, %p1525_p3 }
  0x2b   :  { %p1528_p6 = pnand %p1527_p5, %p1521_p2 }
  0x2d   :  { %1531 = shalt.err (!%p1528_p6)
}
  0x2e   :  { %s1580_s20 = smov [#allocation9]   ;;  %s1532_s21 = scalar_lea.vmem %s55_s18, 16 }
  0x2f   :  { %47 = dma.vmem_to_smem %s45_s7, 16, %s1580_s20, [#allocation6]  }
  0x30   :  { %p1533_p7 = scmp.ne.s32.totalorder %s55_s18, %s1532_s21  ;;  %p1537_p8 = scmp.lt.s32.totalorder %s55_s18, %s55_s18 }
  0x31   :  { %p1538_p9 = scmp.lt.s32.totalorder %s1532_s21, %s1532_s21 }
  0x33   :  { %p1539_p10 = por %p1538_p9, %p1537_p8 }
  0x35   :  { %p1540_p11 = pnand %p1539_p10, %p1533_p7 }
  0x37   :  { %1543 = shalt.err (!%p1540_p11)
}
  0x38   :  { %s1581_s1 = smov [#allocation10]  }
  0x39   :  { %57 = dma.vmem_to_smem %s55_s18, 16, %s1581_s1, [#allocation11]  }
  0x3a   :  { %1566 = dma.done.wait [#allocation4], 256  }
  0x3b   :  { %1567 = vsyncadd [#allocation4], 4294967040 }
  0x3c   :  { %1568 = dma.done.wait [#allocation8], 512  }
  0x3d   :  { %1569 = vsyncadd [#allocation8], 4294966784 }
  0x3e   :  { %1570 = dma.done.wait [#allocation6], 16  }
  0x3f   :  { %1571 = vsyncadd [#allocation6], 4294967280 }
  0x40   :  { %1572 = dma.done.wait [#allocation11], 16  }
  0x41   :  { %1573 = vsyncadd [#allocation11], 4294967280 }
  0x42   :  { %70 = sfence }
  0x43   :  { %v1646_v0 = vld [vmem:[#allocation3] sm:$0xff]  ;;  %v1648_v1 = vld [vmem:[#allocation3 + $0x8] sm:$0xff]  ;;  %s90_s3 = sld [smem:[#allocation9]]  ;;  %v1582_v2 = vmov 0   ;;  %s1296_s22 = sld [smem:[#allocation9 + $0x1]]  ;;  %v3202_v8 = vmov 0.0  }
  0x44   :  { %1219 = vmatprep.subr.bf16.mxu0 %v1582_v2  ;;  %1429 = vmatprep.subr.bf16.mxu1 %v1582_v2  ;;  %v1292_v3 = vmul.f32 -1.442695, %v1646_v0  ;;  %v1293_v4 = vmul.f32 -1.442695, %v1648_v1  ;;  %s1299_s23 = sld [smem:[#allocation9 + $0x2]]  ;;  %s1302_s24 = sld [smem:[#allocation9 + $0x3]] }
  0x45   :  { %s1654_s27 = sld [smem:[#allocation9 + $0x4]]  ;;  %s1656_s28 = sld [smem:[#allocation9 + $0x5]] }
  0x46   :  { %1464 = vpow2.f32 %v1292_v3  ;;  %s1690_s29 = sld [smem:[#allocation9 + $0x6]]  ;;  %s1700_s30 = sld [smem:[#allocation9 + $0x7]] }
  0x47   :  { %1466 = vpow2.f32 %v1293_v4  ;;  %s1726_s5 = sld [smem:[#allocation10]]  ;;  %s1734_s6 = sld [smem:[#allocation10 + $0x1]] }
  0x48   :  { %s1740_s7 = sld [smem:[#allocation10 + $0x2]]  ;;  %s1768_s8 = sld [smem:[#allocation10 + $0x3]] }
  0x49   :  { %v1658_v5 = vstv %s90_s3  ;;  %v1664_v6 = vstv %s1296_s22  ;;  %s1820_s9 = sld [smem:[#allocation10 + $0x4]]  ;;  %s1831_s10 = sld [smem:[#allocation10 + $0x5]] }
  0x4a   :  { %vm92_vm0 = vcmp.ge.f32.partialorder %v1646_v0, %v1658_v5  ;;  %vm93_vm1 = vcmp.ge.f32.partialorder %v1648_v1, %v1658_v5  ;;  %v1668_v7 = vsub.f32 %v1646_v0, %v1658_v5  ;;  %vm100_vm2 = vcmp.ge.f32.partialorder %v1646_v0, %v1664_v6  ;;  %s1845_s11 = sld [smem:[#allocation10 + $0x6]]  ;;  %s1872_s12 = sld [smem:[#allocation10 + $0x10]] }
  0x4b   :  { %v1671_v9 = vsel %vm92_vm0, 1.0, %v3202_v8  ;;  %v1674_v10 = vsel %vm93_vm1, 1.0, %v3202_v8  ;;  %vm101_vm3 = vcmp.ge.f32.partialorder %v1648_v1, %v1664_v6  ;;  %v1681_v11 = vsel %vm100_vm2, 1.0, %v3202_v8  ;;  %s1894_s13 = sld [smem:[#allocation10 + $0x11]]  ;;  %s1896_s14 = sld [smem:[#allocation10 + $0x12]] }
  0x4c   :  { %v1684_v12 = vsel %vm101_vm3, 1.0, %v3202_v8  ;;  %v1686_v13 = vstv %s1299_s23  ;;  %v1688_v14 = vstv %s1302_s24  ;;  %v106_v15 = vsub.f32 %v1671_v9, %v1681_v11  ;;  %s1917_s0 = sld [smem:[#allocation10 + $0x13]]  ;;  %s1928_s2 = sld [smem:[#allocation10 + $0x14]] }
  0x4d   :  { %v107_v16 = vsub.f32 %v1674_v10, %v1684_v12  ;;  %vm110_vm4 = vcmp.ge.f32.partialorder %v1646_v0, %v1686_v13  ;;  %vm111_vm5 = vcmp.ge.f32.partialorder %v1648_v1, %v1686_v13  ;;  %vm120_vm6 = vcmp.ge.f32.partialorder %v1646_v0, %v1688_v14  ;;  %s1946_s15 = sld [smem:[#allocation10 + $0x15]]  ;;  %s1951_s16 = sld [smem:[#allocation10 + $0x20]] }
  0x4e   :  { %v1300_v17 = vsel %vm110_vm4, 1.0, %v3202_v8  ;;  %v1301_v18 = vsel %vm111_vm5, 1.0, %v3202_v8  ;;  %vm121_vm7 = vcmp.ge.f32.partialorder %v1648_v1, %v1688_v14  ;;  %v1303_v21 = vsel %vm120_vm6, 1.0, %v3202_v8  ;;  %s1960_s17 = sld [smem:[#allocation10 + $0x21]]  ;;  %s1962_s18 = sld [smem:[#allocation10 + $0x22]] }
  0x4f   :  { %v1709_v19 = vsub.f32 %v1681_v11, %v1300_v17  ;;  %v1712_v20 = vsub.f32 %v1684_v12, %v1301_v18  ;;  %v1304_v22 = vsel %vm121_vm7, 1.0, %v3202_v8  ;;  %v1716_v24 = vsub.f32 %v1300_v17, %v1303_v21  ;;  %s1973_s19 = sld [smem:[#allocation10 + $0x23]]  ;;  %s1980_s20 = sld [smem:[#allocation10 + $0x24]] }
  0x50   :  { %v1465_v23 = vpop.eup %1464  ;;  %v1718_v25 = vsub.f32 %v1301_v18, %v1304_v22  ;;  %v1721_v26 = vstv %s1654_s27  ;;  %v1724_v27 = vstv %s1656_s28  ;;  %v1751_v38 = vstv %s1690_s29  ;;  %s1990_s21 = sld [smem:[#allocation10 + $0x30]]  ;;  %s1992_s1 = sld [smem:[#allocation10 + $0x31]] }
  0x51   :  { %v1467_v28 = vpop.eup %1466  ;;  %v80_v29 = vadd.f32 1.0, %v1465_v23  ;;  %vm130_vm8 = vcmp.ge.f32.partialorder %v1646_v0, %v1721_v26  ;;  %vm131_vm9 = vcmp.ge.f32.partialorder %v1648_v1, %v1721_v26  ;;  %vm140_vm10 = vcmp.ge.f32.partialorder %v1646_v0, %v1724_v27  ;;  %s2001_s3 = sld [smem:[#allocation10 + $0x32]]  ;;  %s2004_s22 = sld [smem:[#allocation10 + $0x33]] }
  0x52   :  { %v81_v30 = vadd.f32 1.0, %v1467_v28  ;;  %v1306_v31 = vsel %vm130_vm8, 1.0, %v3202_v8  ;;  %v1307_v32 = vsel %vm131_vm9, 1.0, %v3202_v8  ;;  %vm141_vm11 = vcmp.ge.f32.partialorder %v1648_v1, %v1724_v27  ;;  %s2018_s23 = sld [smem:[#allocation10 + $0x40]]  ;;  %s2020_s24 = sld [smem:[#allocation10 + $0x41]] }
  0x53   :  { %1468 = vrcp.f32 %v80_v29  ;;  %v1742_v33 = vsub.f32 %v1303_v21, %v1306_v31  ;;  %v1744_v34 = vsub.f32 %v1304_v22, %v1307_v32  ;;  %v1309_v35 = vsel %vm140_vm10, 1.0, %v3202_v8  ;;  %s2024_s27 = sld [smem:[#allocation10 + $0x42]]  ;;  %s2026_s28 = sld [smem:[#allocation10 + $0x50]] }
  0x54   :  { %1470 = vrcp.f32 %v81_v30  ;;  %v1310_v36 = vsel %vm141_vm11, 1.0, %v3202_v8  ;;  %v1748_v37 = vsub.f32 %v1306_v31, %v1309_v35  ;;  %vm150_vm12 = vcmp.ge.f32.partialorder %v1646_v0, %v1751_v38  ;;  %s2046_s29 = sld [smem:[#allocation10 + $0x51]] }
  0x55   :  { %v1753_v39 = vsub.f32 %v1307_v32, %v1310_v36  ;;  %vm151_vm13 = vcmp.ge.f32.partialorder %v1648_v1, %v1751_v38  ;;  %v1760_v40 = vstv %s1700_s30  ;;  %v1312_v41 = vsel %vm150_vm12, 1.0, %v3202_v8  ;;  %s2048_s30 = sld [smem:[#allocation9 + $0x8]] }
  0x56   :  { %v1313_v42 = vsel %vm151_vm13, 1.0, %v3202_v8  ;;  %vm160_vm14 = vcmp.ge.f32.partialorder %v1646_v0, %v1760_v40  ;;  %vm161_vm15 = vcmp.ge.f32.partialorder %v1648_v1, %v1760_v40  ;;  %v1770_v43 = vsub.f32 %v1309_v35, %v1312_v41 }
  0x57   :  { %v1772_v44 = vsub.f32 %v1310_v36, %v1313_v42  ;;  %v1775_v45 = vsel %vm160_vm14, 1.0, %v3202_v8  ;;  %v1778_v46 = vsel %vm161_vm15, 1.0, %v3202_v8  ;;  %v1788_v49 = vsub.f32 %v1648_v1, %v1658_v5 }
  0x58   :  { %v1781_v47 = vsub.f32 %v1312_v41, %v1775_v45  ;;  %v1784_v48 = vsub.f32 %v1313_v42, %v1778_v46  ;;  %v251_v50 = vstv %s1726_s5  ;;  %v1794_v52 = vsub.f32 %v1646_v0, %v1664_v6  ;;  %s2070_s5 = sld [smem:[#allocation10 + $0x7]] }
  0x59   :  { %v252_v51 = vmul.f32 %v251_v50, %v1668_v7  ;;  %v1798_v53 = vsub.f32 %v1648_v1, %v1664_v6  ;;  %v257_v54 = vstv %s1734_s6  ;;  %v253_v55 = vmul.f32 %v251_v50, %v1788_v49  ;;  %s2076_s6 = sld [smem:[#allocation10 + $0x16]] }
  0x5a   :  { %v1804_v56 = vsub.f32 %v1646_v0, %v1686_v13  ;;  %v1808_v57 = vsub.f32 %v1648_v1, %v1686_v13  ;;  %v271_v58 = vstv %s1740_s7  ;;  %v258_v59 = vmul.f32 %v257_v54, %v1794_v52  ;;  %s2088_s7 = sld [smem:[#allocation10 + $0x25]] }
  0x5b   :  { %v259_v60 = vmul.f32 %v257_v54, %v1798_v53  ;;  %v260_v61 = vmul.f32 %v252_v51, %v106_v15  ;;  %v1818_v62 = vsub.f32 %v1646_v0, %v1688_v14  ;;  %v261_v63 = vmul.f32 %v253_v55, %v107_v16 }
  0x5c   :  { %v272_v3 = vmul.f32 %v271_v58, %v1804_v56  ;;  %v273_v4 = vmul.f32 %v271_v58, %v1808_v57  ;;  %v1829_v5 = vsub.f32 %v1648_v1, %v1688_v14  ;;  %v262_v9 = vsub.f32 1.0, %v258_v59 }
  0x5d   :  { %v1469_v6 = vpop.eup %1468  ;;  %v263_v11 = vsub.f32 1.0, %v259_v60  ;;  %v274_v13 = vmul.f32 %v258_v59, %v1709_v19  ;;  %v275_v15 = vmul.f32 %v259_v60, %v1712_v20  ;;  %v285_v18 = vstv %s1768_s8  ;;  %s2098_s8 = sld [smem:[#allocation10 + $0x34]] }
  0x5e   :  { %v1471_v17 = vpop.eup %1470  ;;  %v86_v10 = vmul.f32 %v1469_v6, %v1646_v0  ;;  %v276_v12 = vsub.f32 1.0, %v272_v3  ;;  %v277_v16 = vsub.f32 1.0, %v273_v4  ;;  %v264_v14 = vmul.f32 %v262_v9, %v1709_v19 }
  0x5f   :  { %v87_v21 = vmul.f32 %v1471_v17, %v1648_v1  ;;  %v265_v22 = vmul.f32 %v263_v11, %v1712_v20  ;;  %v286_v23 = vmul.f32 %v285_v18, %v1818_v62  ;;  %v287_v30 = vmul.f32 %v285_v18, %v1829_v5 }
  0x60   :  { %v278_v28 = vmul.f32 %v276_v12, %v1716_v24  ;;  %v279_v29 = vmul.f32 %v277_v16, %v1718_v25  ;;  %v288_v31 = vmul.f32 %v272_v3, %v1716_v24  ;;  %v1847_v35 = vadd.f32 %v264_v14, %v260_v61 }
  0x61   :  { %v88_v32 = vpack.c.bf16 %v87_v21, %v86_v10  ;;  %v1849_v36 = vadd.f32 %v265_v22, %v261_v63  ;;  %v289_v19 = vmul.f32 %v273_v4, %v1718_v25  ;;  %v290_v42 = vsub.f32 1.0, %v286_v23 }
  0x62   :  { %v1852_v20 = vadd.f32 %v278_v28, %v274_v13  ;;  %v1854_v41 = vadd.f32 %v279_v29, %v275_v15  ;;  %v291_v50 = vsub.f32 1.0, %v287_v30  ;;  %v1858_v24 = vsub.f32 %v1646_v0, %v1721_v26 }
  0x63   :  { %1220 = vmatpush1.bf16.msra.mxu0 %v88_v32  ;;  %1439 = vmatpush1.bf16.msra.mxu1 %v88_v32  ;;  %v1862_v51 = vsub.f32 %v1648_v1, %v1721_v26  ;;  %v299_v54 = vstv %s1820_s9  ;;  %v302_v25 = vmul.f32 %v286_v23, %v1742_v33  ;;  %v292_v55 = vmul.f32 %v290_v42, %v1742_v33  ;;  %s2109_s9 = sld [smem:[#allocation10 + $0x43]] }
  0x64   :  { %1221 = vmatprep.subr.bf16.mxu0 %v1582_v2  ;;  %1430 = vmatprep.subr.bf16.mxu1 %v1582_v2  ;;  %v293_v58 = vmul.f32 %v291_v50, %v1744_v34  ;;  %v303_v59 = vmul.f32 %v287_v30, %v1744_v34  ;;  %v313_v60 = vstv %s1831_s10  ;;  %v300_v61 = vmul.f32 %v299_v54, %v1858_v24  ;;  %s2149_s10 = sld [smem:[#allocation10 + $0x52]] }
  0x65   :  { %v301_v26 = vmul.f32 %v299_v54, %v1862_v51  ;;  %v1878_v63 = vsub.f32 %v1646_v0, %v1724_v27  ;;  %v1882_v3 = vsub.f32 %v1648_v1, %v1724_v27  ;;  %v294_v33 = vadd.f32 %v292_v55, %v288_v31 }
  0x66   :  { %v1884_v4 = vadd.f32 %v293_v58, %v289_v19  ;;  %v1888_v34 = vsub.f32 %v1646_v0, %v1751_v38  ;;  %v1892_v6 = vsub.f32 %v1648_v1, %v1751_v38  ;;  %v304_v9 = vsub.f32 1.0, %v300_v61 }
  0x67   :  { %v305_v11 = vsub.f32 1.0, %v301_v26  ;;  %v314_v27 = vmul.f32 %v313_v60, %v1878_v63  ;;  %v315_v13 = vmul.f32 %v313_v60, %v1882_v3  ;;  %v316_v15 = vmul.f32 %v300_v61, %v1748_v37 }
  0x68   :  { %v317_v17 = vmul.f32 %v301_v26, %v1753_v39  ;;  %v327_v10 = vstv %s1845_s11  ;;  %v1905_v12 = vsub.f32 %v1646_v0, %v1760_v40  ;;  %v306_v38 = vmul.f32 %v304_v9, %v1748_v37  ;;  %s2164_s11 = sld [smem:[#allocation9 + $0x9]] }
  0x69   :  { %v307_v16 = vmul.f32 %v305_v11, %v1753_v39  ;;  %v318_v18 = vsub.f32 1.0, %v314_v27  ;;  %v319_v21 = vsub.f32 1.0, %v315_v13  ;;  %v1910_v14 = vmul.f32 %v327_v10, %v1888_v34 }
  0x6a   :  { %v1913_v22 = vmul.f32 %v327_v10, %v1892_v6  ;;  %v330_v23 = vmul.f32 %v314_v27, %v1770_v43  ;;  %v331_v28 = vmul.f32 %v315_v13, %v1772_v44  ;;  %v308_v29 = vadd.f32 %v306_v38, %v302_v25 }
  0x6b   :  { %v309_v37 = vadd.f32 %v307_v16, %v303_v59  ;;  %v320_v39 = vmul.f32 %v318_v18, %v1770_v43  ;;  %v321_v30 = vmul.f32 %v319_v21, %v1772_v44  ;;  %v332_v31 = vsub.f32 1.0, %v1910_v14 }
  0x6c   :  { %v333_v32 = vsub.f32 1.0, %v1913_v22  ;;  %v1925_v19 = vsub.f32 %v1648_v1, %v1760_v40  ;;  %v451_v42 = vstv %s1872_s12  ;;  %v455_v58 = vstv %s1894_s13  ;;  %s2166_s12 = sld [smem:[#allocation10 + $0x8]]  ;;  %s2209_s13 = sld [smem:[#allocation10 + $0x17]] }
  0x6d   :  { %v322_v50 = vadd.f32 %v320_v39, %v316_v15  ;;  %v323_v54 = vadd.f32 %v321_v30, %v317_v17  ;;  %v452_v25 = vmul.f32 %v451_v42, %v1668_v7  ;;  %v453_v55 = vmul.f32 %v451_v42, %v1788_v49 }
  0x6e   :  { %v334_v43 = vmul.f32 %v332_v31, %v1781_v47  ;;  %v335_v44 = vmul.f32 %v333_v32, %v1784_v48  ;;  %v467_v59 = vstv %s1896_s14  ;;  %v456_v60 = vmul.f32 %v455_v58, %v1794_v52  ;;  %s2224_s14 = sld [smem:[#allocation10 + $0x26]] }
  0x6f   :  { %v457_v40 = vmul.f32 %v455_v58, %v1798_v53  ;;  %v458_v61 = vmul.f32 %v452_v25, %v1847_v35  ;;  %v459_v26 = vmul.f32 %v453_v55, %v1849_v36  ;;  %v468_v27 = vmul.f32 %v467_v59, %v1804_v56 }
  0x70   :  { %v1940_v9 = vadd.f32 %v334_v43, %v330_v23  ;;  %v1942_v11 = vadd.f32 %v335_v44, %v331_v28  ;;  %v469_v13 = vmul.f32 %v467_v59, %v1808_v57  ;;  %v460_v15 = vsub.f32 1.0, %v456_v60 }
  0x71   :  { %v461_v17 = vsub.f32 1.0, %v457_v40  ;;  %v470_v10 = vmul.f32 %v456_v60, %v1852_v20  ;;  %v471_v38 = vmul.f32 %v457_v40, %v1854_v41  ;;  %v472_v35 = vsub.f32 1.0, %v468_v27 }
  0x72   :  { %v473_v16 = vsub.f32 1.0, %v469_v13  ;;  %v479_v36 = vstv %s1917_s0  ;;  %v482_v18 = vmul.f32 %v468_v27, %v294_v33  ;;  %v462_v21 = vmul.f32 %v460_v15, %v1852_v20  ;;  %s2253_s0 = sld [smem:[#allocation10 + $0x35]] }
  0x73   :  { %v463_v23 = vmul.f32 %v461_v17, %v1854_v41  ;;  %v480_v28 = vmul.f32 %v479_v36, %v1818_v62  ;;  %v481_v39 = vmul.f32 %v479_v36, %v1829_v5  ;;  %v474_v30 = vmul.f32 %v472_v35, %v294_v33 }
  0x74   :  { %v475_v31 = vmul.f32 %v473_v16, %v1884_v4  ;;  %v483_v32 = vmul.f32 %v469_v13, %v1884_v4  ;;  %v491_v42 = vstv %s1928_s2  ;;  %v464_v25 = vadd.f32 %v462_v21, %v458_v61  ;;  %s2269_s2 = sld [smem:[#allocation10 + $0x44]] }
  0x75   :  { %v465_v55 = vadd.f32 %v463_v23, %v459_v26  ;;  %v484_v20 = vsub.f32 1.0, %v480_v28  ;;  %v485_v43 = vsub.f32 1.0, %v481_v39  ;;  %v476_v41 = vadd.f32 %v474_v30, %v470_v10 }
  0x76   :  { %v477_v44 = vadd.f32 %v475_v31, %v471_v38  ;;  %v492_v58 = vmul.f32 %v491_v42, %v1858_v24  ;;  %v493_v33 = vmul.f32 %v491_v42, %v1862_v51  ;;  %v494_v4 = vmul.f32 %v480_v28, %v308_v29 }
  0x77   :  { %v486_v59 = vmul.f32 %v484_v20, %v308_v29  ;;  %v487_v60 = vmul.f32 %v485_v43, %v309_v37  ;;  %v495_v40 = vmul.f32 %v481_v39, %v309_v37  ;;  %v503_v15 = vstv %s1946_s15  ;;  %s2282_s15 = sld [smem:[#allocation10 + $0x53]] }
  0x78   :  { %v496_v27 = vsub.f32 1.0, %v492_v58  ;;  %v497_v13 = vsub.f32 1.0, %v493_v33  ;;  %v506_v17 = vmul.f32 %v492_v58, %v322_v50  ;;  %v1968_v26 = vmul.f32 %v503_v15, %v1878_v63 }
  0x79   :  { %v488_v35 = vadd.f32 %v486_v59, %v482_v18  ;;  %v489_v61 = vadd.f32 %v487_v60, %v483_v32  ;;  %v1971_v10 = vmul.f32 %v503_v15, %v1882_v3  ;;  %v507_v29 = vmul.f32 %v493_v33, %v323_v54 }
  0x7a   :  { %v498_v38 = vmul.f32 %v496_v27, %v322_v50  ;;  %v499_v16 = vmul.f32 %v497_v13, %v323_v54  ;;  %v611_v37 = vstv %s1951_s16  ;;  %v508_v36 = vsub.f32 1.0, %v1968_v26  ;;  %s2299_s16 = sld [smem:[#allocation9 + $0xa]] }
  0x7b   :  { %v509_v21 = vsub.f32 1.0, %v1971_v10  ;;  %v612_v18 = vmul.f32 %v611_v37, %v1668_v7  ;;  %v613_v23 = vmul.f32 %v611_v37, %v1788_v49  ;;  %v615_v30 = vstv %s1960_s17  ;;  %s2301_s17 = sld [smem:[#allocation10 + $0x9]] }
  0x7c   :  { %v500_v28 = vadd.f32 %v498_v38, %v494_v4  ;;  %v501_v39 = vadd.f32 %v499_v16, %v495_v40  ;;  %v627_v31 = vstv %s1962_s18  ;;  %v510_v32 = vmul.f32 %v508_v36, %v1940_v9  ;;  %s2341_s18 = sld [smem:[#allocation10 + $0x18]] }
  0x7d   :  { %v511_v50 = vmul.f32 %v509_v21, %v1942_v11  ;;  %v616_v54 = vmul.f32 %v615_v30, %v1794_v52  ;;  %v617_v42 = vmul.f32 %v615_v30, %v1798_v53  ;;  %v618_v20 = vmul.f32 %v612_v18, %v464_v25 }
  0x7e   :  { %v619_v43 = vmul.f32 %v613_v23, %v465_v55  ;;  %v628_v58 = vmul.f32 %v627_v31, %v1804_v56  ;;  %v629_v33 = vmul.f32 %v627_v31, %v1808_v57  ;;  %v1994_v59 = vadd.f32 %v510_v32, %v506_v17 }
  0x7f   :  { %v1996_v60 = vadd.f32 %v511_v50, %v507_v29  ;;  %v620_v4 = vsub.f32 1.0, %v616_v54  ;;  %v621_v40 = vsub.f32 1.0, %v617_v42  ;;  %v630_v27 = vmul.f32 %v616_v54, %v476_v41 }
  0x80   :  { %v631_v13 = vmul.f32 %v617_v42, %v477_v44  ;;  %v632_v25 = vsub.f32 1.0, %v628_v58  ;;  %v633_v15 = vsub.f32 1.0, %v629_v33  ;;  %v639_v16 = vstv %s1973_s19  ;;  %s2353_s19 = sld [smem:[#allocation10 + $0x27]] }
  0x81   :  { %v622_v55 = vmul.f32 %v620_v4, %v476_v41  ;;  %v623_v38 = vmul.f32 %v621_v40, %v477_v44  ;;  %v642_v37 = vmul.f32 %v628_v58, %v488_v35  ;;  %v640_v18 = vmul.f32 %v639_v16, %v1818_v62 }
  0x82   :  { %v634_v36 = vmul.f32 %v632_v25, %v488_v35  ;;  %v635_v21 = vmul.f32 %v633_v15, %v489_v61  ;;  %v641_v17 = vmul.f32 %v639_v16, %v1829_v5  ;;  %v643_v30 = vmul.f32 %v629_v33, %v489_v61 }
  0x83   :  { %v624_v29 = vadd.f32 %v622_v55, %v618_v20  ;;  %v625_v23 = vadd.f32 %v623_v38, %v619_v43  ;;  %v651_v31 = vstv %s1980_s20  ;;  %v644_v41 = vsub.f32 1.0, %v640_v18  ;;  %s2387_s20 = sld [smem:[#allocation10 + $0x36]] }
  0x84   :  { %v636_v32 = vadd.f32 %v634_v36, %v630_v27  ;;  %v637_v50 = vadd.f32 %v635_v21, %v631_v13  ;;  %v645_v44 = vsub.f32 1.0, %v641_v17  ;;  %v2007_v35 = vmul.f32 %v651_v31, %v1858_v24 }
  0x85   :  { %v2010_v54 = vmul.f32 %v651_v31, %v1862_v51  ;;  %v654_v42 = vmul.f32 %v640_v18, %v500_v28  ;;  %v655_v58 = vmul.f32 %v641_v17, %v501_v39  ;;  %v646_v4 = vmul.f32 %v644_v41, %v500_v28 }
  0x86   :  { %v647_v20 = vmul.f32 %v645_v44, %v501_v39  ;;  %v759_v40 = vstv %s1990_s21  ;;  %v763_v43 = vstv %s1992_s1  ;;  %v656_v61 = vsub.f32 1.0, %v2007_v35  ;;  %s2408_s21 = sld [smem:[#allocation10 + $0x45]]  ;;  %s2423_s1 = sld [smem:[#allocation9 + $0x4]] }
  0x87   :  { %v657_v33 = vsub.f32 1.0, %v2010_v54  ;;  %v760_v27 = vmul.f32 %v759_v40, %v1668_v7  ;;  %v761_v13 = vmul.f32 %v759_v40, %v1788_v49  ;;  %v648_v25 = vadd.f32 %v646_v4, %v642_v37 }
  0x88   :  { %v649_v15 = vadd.f32 %v647_v20, %v643_v30  ;;  %v764_v28 = vmul.f32 %v763_v43, %v1794_v52  ;;  %v765_v39 = vmul.f32 %v763_v43, %v1798_v53  ;;  %v658_v55 = vmul.f32 %v656_v61, %v1994_v59 }
  0x89   :  { %v659_v38 = vmul.f32 %v657_v33, %v1996_v60  ;;  %v766_v16 = vmul.f32 %v760_v27, %v624_v29  ;;  %v767_v36 = vmul.f32 %v761_v13, %v625_v23  ;;  %v775_v17 = vstv %s2001_s3  ;;  %s2425_s3 = sld [smem:[#allocation10 + $0x54]] }
  0x8a   :  { %v768_v21 = vsub.f32 1.0, %v764_v28  ;;  %v769_v18 = vsub.f32 1.0, %v765_v39  ;;  %v778_v37 = vmul.f32 %v764_v28, %v636_v32  ;;  %v2031_v30 = vadd.f32 %v658_v55, %v654_v42 }
  0x8b   :  { %v2033_v31 = vadd.f32 %v659_v38, %v655_v58  ;;  %v776_v41 = vmul.f32 %v775_v17, %v1804_v56  ;;  %v777_v44 = vmul.f32 %v775_v17, %v1808_v57  ;;  %v779_v40 = vmul.f32 %v765_v39, %v637_v50 }
  0x8c   :  { %v770_v4 = vmul.f32 %v768_v21, %v636_v32  ;;  %v771_v20 = vmul.f32 %v769_v18, %v637_v50  ;;  %v787_v43 = vstv %s2004_s22  ;;  %v895_v55 = vstv %s2018_s23  ;;  %s2444_s22 = sld [smem:[#allocation9 + $0xb]]  ;;  %s2451_s23 = sld [smem:[#allocation10 + $0xa]] }
  0x8d   :  { %v780_v29 = vsub.f32 1.0, %v776_v41  ;;  %v781_v23 = vsub.f32 1.0, %v777_v44  ;;  %v2039_v61 = vmul.f32 %v787_v43, %v1818_v62  ;;  %v2042_v42 = vmul.f32 %v787_v43, %v1829_v5 }
  0x8e   :  { %v772_v58 = vadd.f32 %v770_v4, %v766_v16  ;;  %v773_v33 = vadd.f32 %v771_v20, %v767_v36  ;;  %v790_v27 = vmul.f32 %v776_v41, %v648_v25  ;;  %v791_v13 = vmul.f32 %v777_v44, %v649_v15 }
  0x8f   :  { %v782_v32 = vmul.f32 %v780_v29, %v648_v25  ;;  %v783_v28 = vmul.f32 %v781_v23, %v649_v15  ;;  %v792_v50 = vsub.f32 1.0, %v2039_v61  ;;  %v793_v39 = vsub.f32 1.0, %v2042_v42 }
  0x90   :  { %v899_v38 = vstv %s2020_s24  ;;  %v911_v21 = vstv %s2024_s27  ;;  %v1019_v18 = vstv %s2026_s28  ;;  %v896_v25 = vmul.f32 %v895_v55, %v1668_v7  ;;  %s2483_s24 = sld [smem:[#allocation10 + $0x19]]  ;;  %s2510_s27 = sld [smem:[#allocation10 + $0x28]] }
  0x91   :  { %v784_v17 = vadd.f32 %v782_v32, %v778_v37  ;;  %v785_v43 = vadd.f32 %v783_v28, %v779_v40  ;;  %v794_v16 = vmul.f32 %v792_v50, %v2031_v30  ;;  %v795_v36 = vmul.f32 %v793_v39, %v2033_v31  ;;  %s2531_s28 = sld [smem:[#allocation10 + $0x37]] }
  0x92   :  { %v897_v15 = vmul.f32 %v895_v55, %v1788_v49  ;;  %v900_v41 = vmul.f32 %v899_v38, %v1794_v52  ;;  %v901_v44 = vmul.f32 %v899_v38, %v1798_v53  ;;  %v2065_v29 = vmul.f32 %v911_v21, %v1804_v56 }
  0x93   :  { %v2060_v4 = vadd.f32 %v794_v16, %v790_v27  ;;  %v2062_v20 = vadd.f32 %v795_v36, %v791_v13  ;;  %v2068_v37 = vmul.f32 %v911_v21, %v1808_v57  ;;  %v902_v40 = vmul.f32 %v896_v25, %v772_v58 }
  0x94   :  { %v903_v23 = vmul.f32 %v897_v15, %v773_v33  ;;  %v904_v32 = vsub.f32 1.0, %v900_v41  ;;  %v905_v28 = vsub.f32 1.0, %v901_v44  ;;  %v914_v50 = vmul.f32 %v900_v41, %v784_v17 }
  0x95   :  { %v915_v39 = vmul.f32 %v901_v44, %v785_v43  ;;  %v916_v27 = vsub.f32 1.0, %v2065_v29  ;;  %v917_v13 = vsub.f32 1.0, %v2068_v37  ;;  %v1020_v16 = vmul.f32 %v1019_v18, %v1668_v7 }
  0x96   :  { %v906_v55 = vmul.f32 %v904_v32, %v784_v17  ;;  %v907_v38 = vmul.f32 %v905_v28, %v785_v43  ;;  %v1021_v21 = vmul.f32 %v1019_v18, %v1788_v49  ;;  %v1023_v36 = vstv %s2046_s29  ;;  %s2556_s29 = sld [smem:[#allocation10 + $0x46]] }
  0x97   :  { %v918_v58 = vmul.f32 %v916_v27, %v2060_v4  ;;  %v919_v33 = vmul.f32 %v917_v13, %v2062_v20  ;;  %v169_v25 = vstv %s2048_s30  ;;  %v2083_v44 = vmul.f32 %v1023_v36, %v1794_v52  ;;  %s2568_s30 = sld [smem:[#allocation9 + $0x5]] }
  0x98   :  { %v908_v15 = vadd.f32 %v906_v55, %v902_v40  ;;  %v909_v41 = vadd.f32 %v907_v38, %v903_v23  ;;  %v2086_v17 = vmul.f32 %v1023_v36, %v1798_v53  ;;  %vm170_vm0 = vcmp.ge.f32.partialorder %v1646_v0, %v169_v25 }
  0x99   :  { %v2090_v7 = vadd.f32 %v918_v58, %v914_v50  ;;  %v2092_v49 = vadd.f32 %v919_v33, %v915_v39  ;;  %vm171_vm1 = vcmp.ge.f32.partialorder %v1648_v1, %v169_v25  ;;  %v1028_v40 = vsub.f32 1.0, %v2083_v44 }
  0x9a   :  { %v1026_v18 = vmul.f32 %v1020_v16, %v908_v15  ;;  %v1027_v43 = vmul.f32 %v1021_v21, %v909_v41  ;;  %v1029_v52 = vsub.f32 1.0, %v2086_v17  ;;  %v2101_v53 = vsel %vm170_vm0, 1.0, %v3202_v8 }
  0x9b   :  { %v2104_v23 = vsel %vm171_vm1, 1.0, %v3202_v8  ;;  %v341_v32 = vstv %s2070_s5  ;;  %v344_v28 = vmul.f32 %v1910_v14, %v1781_v47  ;;  %v1030_v50 = vmul.f32 %v1028_v40, %v2090_v7  ;;  %s2581_s5 = sld [smem:[#allocation10 + $0x55]] }
  0x9c   :  { %v1031_v39 = vmul.f32 %v1029_v52, %v2092_v49  ;;  %v2115_v27 = vsub.f32 %v1775_v45, %v2101_v53  ;;  %v2119_v13 = vsub.f32 %v1778_v46, %v2104_v23  ;;  %v2122_v55 = vmul.f32 %v341_v32, %v1905_v12 }
  0x9d   :  { %v2125_v47 = vmul.f32 %v341_v32, %v1925_v19  ;;  %v345_v14 = vmul.f32 %v1913_v22, %v1784_v48  ;;  %v2130_v38 = vsub.f32 %v1646_v0, %v169_v25  ;;  %v1032_v16 = vadd.f32 %v1030_v50, %v1026_v18 }
  0x9e   :  { %v1033_v45 = vadd.f32 %v1031_v39, %v1027_v43  ;;  %v2133_v21 = vsub.f32 %v1648_v1, %v169_v25  ;;  %v515_v46 = vstv %s2076_s6  ;;  %v346_v58 = vsub.f32 1.0, %v2122_v55  ;;  %s2590_s6 = sld [smem:[#allocation9 + $0xc]] }
  0x9f   :  { %v347_v33 = vsub.f32 1.0, %v2125_v47  ;;  %v2139_v36 = vmul.f32 %v515_v46, %v1888_v34  ;;  %v2142_v15 = vmul.f32 %v515_v46, %v1892_v6  ;;  %v518_v22 = vmul.f32 %v1968_v26, %v1940_v9 }
  0xa0   :  { %v1034_v48 = vpack.c.bf16 %v1033_v45, %v1032_v16  ;;  %v519_v25 = vmul.f32 %v1971_v10, %v1942_v11  ;;  %v663_v41 = vstv %s2088_s7  ;;  %v348_v18 = vmul.f32 %v346_v58, %v2115_v27  ;;  %s2622_s7 = sld [smem:[#allocation10 + $0xb]] }
  0xa1   :  { %v349_v43 = vmul.f32 %v347_v33, %v2119_v13  ;;  %v520_v40 = vsub.f32 1.0, %v2139_v36  ;;  %v521_v52 = vsub.f32 1.0, %v2142_v15  ;;  %v2156_v32 = vmul.f32 %v663_v41, %v1878_v63 }
  0xa2   :  { %1222 = vmatpush1.bf16.msra.mxu0 %v1034_v48  ;;  %1440 = vmatpush1.bf16.msra.mxu1 %v1034_v48  ;;  %v2159_v9 = vmul.f32 %v663_v41, %v1882_v3  ;;  %v666_v11 = vmul.f32 %v2007_v35, %v1994_v59  ;;  %v799_v26 = vstv %s2098_s8  ;;  %v350_v10 = vadd.f32 %v348_v18, %v344_v28  ;;  %s2629_s8 = sld [smem:[#allocation10 + $0x1a]] }
  0xa3   :  { %1223 = vmatprep.subr.bf16.mxu0 %v1582_v2  ;;  %1431 = vmatprep.subr.bf16.mxu1 %v1582_v2  ;;  %v2170_v50 = vadd.f32 %v349_v43, %v345_v14  ;;  %v667_v39 = vmul.f32 %v2010_v54, %v1996_v60  ;;  %v923_v16 = vstv %s2109_s9  ;;  %v668_v45 = vsub.f32 1.0, %v2156_v32  ;;  %s2657_s9 = sld [smem:[#allocation10 + $0x29]] }
  0xa4   :  { %v669_v59 = vsub.f32 1.0, %v2159_v9  ;;  %v2178_v35 = vmul.f32 %v799_v26, %v1858_v24  ;;  %v2181_v46 = vmul.f32 %v799_v26, %v1862_v51  ;;  %v522_v58 = vmul.f32 %v520_v40, %v350_v10 }
  0xa5   :  { %v523_v28 = vmul.f32 %v521_v52, %v2170_v50  ;;  %v802_v14 = vmul.f32 %v2039_v61, %v2031_v30  ;;  %v803_v60 = vmul.f32 %v2042_v42, %v2033_v31  ;;  %v2191_v48 = vmul.f32 %v923_v16, %v1818_v62 }
  0xa6   :  { %v804_v54 = vsub.f32 1.0, %v2178_v35  ;;  %v805_v33 = vsub.f32 1.0, %v2181_v46  ;;  %v2194_v41 = vmul.f32 %v923_v16, %v1829_v5  ;;  %v524_v18 = vadd.f32 %v522_v58, %v518_v22 }
  0xa7   :  { %v2196_v43 = vadd.f32 %v523_v28, %v519_v25  ;;  %v926_v30 = vmul.f32 %v2065_v29, %v2060_v4  ;;  %v927_v31 = vmul.f32 %v2068_v37, %v2062_v20  ;;  %v928_v61 = vsub.f32 1.0, %v2191_v48 }
  0xa8   :  { %v929_v42 = vsub.f32 1.0, %v2194_v41  ;;  %v1041_v40 = vstv %s2149_s10  ;;  %v2207_v52 = vmul.f32 %v2083_v44, %v2090_v7  ;;  %v670_v22 = vmul.f32 %v668_v45, %v524_v18  ;;  %s2675_s10 = sld [smem:[#allocation10 + $0x38]] }
  0xa9   :  { %v671_v25 = vmul.f32 %v669_v59, %v2196_v43  ;;  %v2213_v26 = vmul.f32 %v1041_v40, %v1804_v56  ;;  %v2216_v4 = vmul.f32 %v1041_v40, %v1808_v57  ;;  %v1045_v20 = vmul.f32 %v2086_v17, %v2092_v49 }
  0xaa   :  { %v179_v29 = vstv %s2164_s11  ;;  %v355_v37 = vstv %s2166_s12  ;;  %v358_v44 = vmul.f32 %v2122_v55, %v2115_v27  ;;  %v672_v7 = vadd.f32 %v670_v22, %v666_v11  ;;  %s2714_s11 = sld [smem:[#allocation10 + $0x47]]  ;;  %s2721_s12 = sld [smem:[#allocation9 + $0x6]] }
  0xab   :  { %v673_v16 = vadd.f32 %v671_v25, %v667_v39  ;;  %v1046_v45 = vsub.f32 1.0, %v2213_v26  ;;  %v1047_v56 = vsub.f32 1.0, %v2216_v4  ;;  %vm180_vm2 = vcmp.ge.f32.partialorder %v1646_v0, %v179_v29 }
  0xac   :  { %vm181_vm3 = vcmp.ge.f32.partialorder %v1648_v1, %v179_v29  ;;  %v2231_v57 = vmul.f32 %v355_v37, %v2130_v38  ;;  %v2234_v17 = vmul.f32 %v355_v37, %v2133_v21  ;;  %v806_v49 = vmul.f32 %v804_v54, %v672_v7 }
  0xad   :  { %v807_v27 = vmul.f32 %v805_v33, %v673_v16  ;;  %v2237_v55 = vsel %vm180_vm2, 1.0, %v3202_v8  ;;  %v2240_v11 = vsel %vm181_vm3, 1.0, %v3202_v8  ;;  %v359_v58 = vmul.f32 %v2125_v47, %v2119_v13 }
  0xae   :  { %v2244_v39 = vsub.f32 %v2101_v53, %v2237_v55  ;;  %v2248_v59 = vsub.f32 %v2104_v23, %v2240_v11  ;;  %v360_v28 = vsub.f32 1.0, %v2231_v57  ;;  %v808_v54 = vadd.f32 %v806_v49, %v802_v14 }
  0xaf   :  { %v809_v33 = vadd.f32 %v807_v27, %v803_v60  ;;  %v361_v40 = vsub.f32 1.0, %v2234_v17  ;;  %v2257_v22 = vsub.f32 %v1646_v0, %v179_v29  ;;  %v2261_v23 = vsub.f32 %v1648_v1, %v179_v29 }
  0xb0   :  { %v362_v53 = vmul.f32 %v360_v28, %v2244_v39  ;;  %v527_v25 = vstv %s2209_s13  ;;  %v530_v13 = vmul.f32 %v2139_v36, %v350_v10  ;;  %v930_v47 = vmul.f32 %v928_v61, %v808_v54  ;;  %s2727_s13 = sld [smem:[#allocation10 + $0x56]] }
  0xb1   :  { %v931_v37 = vmul.f32 %v929_v42, %v809_v33  ;;  %v363_v8 = vmul.f32 %v361_v40, %v2248_v59  ;;  %v2267_v14 = vmul.f32 %v527_v25, %v1905_v12  ;;  %v2274_v0 = vmul.f32 %v527_v25, %v1925_v19 }
  0xb2   :  { %v2271_v60 = vadd.f32 %v362_v53, %v358_v44  ;;  %v531_v1 = vmul.f32 %v2142_v15, %v2170_v50  ;;  %v675_v29 = vstv %s2224_s14  ;;  %v932_v49 = vadd.f32 %v930_v47, %v926_v30  ;;  %s2749_s14 = sld [smem:[#allocation9 + $0xd]] }
  0xb3   :  { %v933_v36 = vadd.f32 %v931_v37, %v927_v31  ;;  %v2279_v10 = vadd.f32 %v363_v8, %v359_v58  ;;  %v532_v61 = vsub.f32 1.0, %v2267_v14  ;;  %v533_v42 = vsub.f32 1.0, %v2274_v0 }
  0xb4   :  { %v2286_v44 = vmul.f32 %v675_v29, %v1888_v34  ;;  %v2289_v27 = vmul.f32 %v675_v29, %v1892_v6  ;;  %v678_v15 = vmul.f32 %v2156_v32, %v524_v18  ;;  %v1048_v50 = vmul.f32 %v1046_v45, %v932_v49 }
  0xb5   :  { %v1049_v30 = vmul.f32 %v1047_v56, %v933_v36  ;;  %v534_v31 = vmul.f32 %v532_v61, %v2271_v60  ;;  %v679_v8 = vmul.f32 %v2159_v9, %v2196_v43  ;;  %v535_v58 = vmul.f32 %v533_v42, %v2279_v10 }
  0xb6   :  { %v680_v28 = vsub.f32 1.0, %v2286_v44  ;;  %v681_v40 = vsub.f32 1.0, %v2289_v27  ;;  %v811_v53 = vstv %s2253_s0  ;;  %v1050_v32 = vadd.f32 %v1048_v50, %v2207_v52  ;;  %s2766_s0 = sld [smem:[#allocation10 + $0xc]] }
  0xb7   :  { %v1051_v18 = vadd.f32 %v1049_v30, %v1045_v20  ;;  %v2304_v45 = vadd.f32 %v534_v31, %v530_v13  ;;  %v2307_v56 = vmul.f32 %v811_v53, %v1878_v63  ;;  %v2309_v9 = vadd.f32 %v535_v58, %v531_v1 }
  0xb8   :  { %v2312_v43 = vmul.f32 %v811_v53, %v1882_v3  ;;  %v814_v25 = vmul.f32 %v2178_v35, %v672_v7  ;;  %v815_v47 = vmul.f32 %v2181_v46, %v673_v16  ;;  %v935_v20 = vstv %s2269_s2  ;;  %s2784_s2 = sld [smem:[#allocation10 + $0x1b]] }
  0xb9   :  { %v1052_v37 = vpack.c.bf16 %v1051_v18, %v1050_v32  ;;  %v682_v29 = vmul.f32 %v680_v28, %v2304_v45  ;;  %v816_v52 = vsub.f32 1.0, %v2307_v56  ;;  %v683_v13 = vmul.f32 %v681_v40, %v2309_v9  ;;  %v2358_v40 = vld [vmem:[#allocation3] sm:$0xff] }
  0xba   :  { %v817_v61 = vsub.f32 1.0, %v2312_v43  ;;  %v2322_v1 = vmul.f32 %v935_v20, %v1858_v24  ;;  %v2325_v42 = vmul.f32 %v935_v20, %v1862_v51  ;;  %v938_v46 = vmul.f32 %v2191_v48, %v808_v54 }
  0xbb   :  { %1224 = vmatpush1.bf16.msra.mxu0 %v1052_v37  ;;  %1441 = vmatpush1.bf16.msra.mxu1 %v1052_v37  ;;  %v2327_v35 = vadd.f32 %v682_v29, %v678_v15  ;;  %v939_v7 = vmul.f32 %v2194_v41, %v809_v33  ;;  %v1059_v16 = vstv %s2282_s15  ;;  %v2334_v24 = vadd.f32 %v683_v13, %v679_v8  ;;  %s2798_s15 = sld [smem:[#allocation10 + $0x2a]] }
  0xbc   :  { %1225 = vmatprep.subr.bf16.mxu0 %v1582_v2  ;;  %1432 = vmatprep.subr.bf16.mxu1 %v1582_v2  ;;  %v940_v51 = vsub.f32 1.0, %v2322_v1  ;;  %v941_v50 = vsub.f32 1.0, %v2325_v42  ;;  %v2339_v15 = vmul.f32 %v1059_v16, %v1818_v62  ;;  %v2345_v41 = vmul.f32 %v1059_v16, %v1829_v5  ;;  %v2361_v5 = vld [vmem:[#allocation3 + $0x8] sm:$0xff] }
  0xbd   :  { %v818_v48 = vmul.f32 %v816_v52, %v2327_v35  ;;  %v1062_v54 = vmul.f32 %v2213_v26, %v932_v49  ;;  %v1063_v33 = vmul.f32 %v2216_v4, %v933_v36  ;;  %v819_v30 = vmul.f32 %v817_v61, %v2334_v24 }
  0xbe   :  { %v1064_v31 = vsub.f32 1.0, %v2339_v15  ;;  %v189_v8 = vstv %s2299_s16  ;;  %v369_v58 = vstv %s2301_s17  ;;  %v1065_v28 = vsub.f32 1.0, %v2345_v41  ;;  %s2845_s16 = sld [smem:[#allocation10 + $0x39]]  ;;  %s2860_s17 = sld [smem:[#allocation10 + $0x48]] }
  0xbf   :  { %v2355_v62 = vadd.f32 %v818_v48, %v814_v25  ;;  %vm190_vm4 = vcmp.ge.f32.partialorder %v2358_v40, %v189_v8  ;;  %vm191_vm5 = vcmp.ge.f32.partialorder %v2361_v5, %v189_v8  ;;  %v2364_v26 = vadd.f32 %v819_v30, %v815_v47 }
  0xc0   :  { %v3204_v4 = vmov 0.0   ;;  %v2373_v53 = vmul.f32 %v369_v58, %v2257_v22  ;;  %v2385_v47 = vmul.f32 %v369_v58, %v2261_v23  ;;  %v372_v29 = vmul.f32 %v2231_v57, %v2244_v39 }
  0xc1   :  { %v2367_v49 = vsel %vm190_vm4, 1.0, %v3204_v4  ;;  %v2370_v36 = vsel %vm191_vm5, 1.0, %v3204_v4  ;;  %v942_v32 = vmul.f32 %v940_v51, %v2355_v62  ;;  %v943_v37 = vmul.f32 %v941_v50, %v2364_v26 }
  0xc2   :  { %v2378_v18 = vsub.f32 %v2237_v55, %v2367_v49  ;;  %v2382_v25 = vsub.f32 %v2240_v11, %v2370_v36  ;;  %v373_v52 = vmul.f32 %v2234_v17, %v2248_v59  ;;  %v374_v55 = vsub.f32 1.0, %v2373_v53 }
  0xc3   :  { %v2395_v20 = vadd.f32 %v942_v32, %v938_v46  ;;  %v375_v11 = vsub.f32 1.0, %v2385_v47  ;;  %v2399_v13 = vsub.f32 %v2358_v40, %v189_v8  ;;  %v2402_v61 = vsub.f32 %v2361_v5, %v189_v8 }
  0xc4   :  { %v945_v16 = vadd.f32 %v943_v37, %v939_v7  ;;  %v376_v51 = vmul.f32 %v374_v55, %v2378_v18  ;;  %v539_v57 = vstv %s2341_s18  ;;  %v542_v17 = vmul.f32 %v2267_v14, %v2271_v60  ;;  %s2871_s18 = sld [smem:[#allocation9 + $0x7]] }
  0xc5   :  { %v1066_v39 = vmul.f32 %v1064_v31, %v2395_v20  ;;  %v377_v59 = vmul.f32 %v375_v11, %v2382_v25  ;;  %v2413_v46 = vmul.f32 %v539_v57, %v2130_v38  ;;  %v2416_v50 = vmul.f32 %v539_v57, %v2133_v21 }
  0xc6   :  { %v1067_v48 = vmul.f32 %v1065_v28, %v945_v16  ;;  %v2418_v7 = vadd.f32 %v376_v51, %v372_v29  ;;  %v543_v30 = vmul.f32 %v2274_v0, %v2279_v10  ;;  %v687_v14 = vstv %s2353_s19  ;;  %s2885_s19 = sld [smem:[#allocation10 + $0x57]] }
  0xc7   :  { %v1068_v60 = vadd.f32 %v1066_v39, %v1062_v54  ;;  %v2427_v31 = vadd.f32 %v377_v59, %v373_v52  ;;  %v544_v8 = vsub.f32 1.0, %v2413_v46  ;;  %v545_v58 = vsub.f32 1.0, %v2416_v50 }
  0xc8   :  { %v1069_v32 = vadd.f32 %v1067_v48, %v1063_v33  ;;  %v2432_v28 = vmul.f32 %v687_v14, %v1905_v12  ;;  %v2435_v37 = vmul.f32 %v687_v14, %v1925_v19  ;;  %v690_v0 = vmul.f32 %v2286_v44, %v2304_v45 }
  0xc9   :  { %v546_v10 = vmul.f32 %v544_v8, %v2418_v7  ;;  %v547_v54 = vmul.f32 %v545_v58, %v2427_v31  ;;  %v691_v29 = vmul.f32 %v2289_v27, %v2309_v9  ;;  %v823_v52 = vstv %s2387_s20  ;;  %s2896_s20 = sld [smem:[#allocation9 + $0xe]] }
  0xca   :  { %v1070_v33 = vpack.c.bf16 %v1069_v32, %v1068_v60  ;;  %v692_v55 = vsub.f32 1.0, %v2432_v28  ;;  %v693_v11 = vsub.f32 1.0, %v2435_v37  ;;  %v2449_v51 = vmul.f32 %v823_v52, %v1888_v34 }
  0xcb   :  { %v2453_v44 = vadd.f32 %v546_v10, %v542_v17  ;;  %v2455_v45 = vadd.f32 %v547_v54, %v543_v30  ;;  %v2458_v27 = vmul.f32 %v823_v52, %v1892_v6  ;;  %v826_v9 = vmul.f32 %v2307_v56, %v2327_v35 }
  0xcc   :  { %1226 = vmatpush1.bf16.msra.mxu0 %v1070_v33  ;;  %1442 = vmatpush1.bf16.msra.mxu1 %v1070_v33  ;;  %v827_v57 = vmul.f32 %v2312_v43, %v2334_v24  ;;  %v828_v39 = vsub.f32 1.0, %v2449_v51  ;;  %v947_v59 = vstv %s2408_s21  ;;  %v950_v17 = vmul.f32 %v2322_v1, %v2355_v62  ;;  %s2925_s21 = sld [smem:[#allocation10 + $0xd]] }
  0xcd   :  { %1227 = vmatprep.subr.bf16.mxu0 %v1582_v2  ;;  %1433 = vmatprep.subr.bf16.mxu1 %v1582_v2  ;;  %v694_v48 = vmul.f32 %v692_v55, %v2453_v44  ;;  %v695_v56 = vmul.f32 %v693_v11, %v2455_v45  ;;  %v829_v35 = vsub.f32 1.0, %v2458_v27  ;;  %v2474_v30 = vmul.f32 %v947_v59, %v1878_v63 }
  0xce   :  { %v2477_v43 = vmul.f32 %v947_v59, %v1882_v3  ;;  %v951_v1 = vmul.f32 %v2325_v42, %v2364_v26  ;;  %v1073_v24 = vstv %s2423_s1  ;;  %v1077_v62 = vstv %s2425_s3  ;;  %s2934_s1 = sld [smem:[#allocation10 + $0x1c]]  ;;  %s2954_s3 = sld [smem:[#allocation10 + $0x2b]] }
  0xcf   :  { %v2485_v14 = vadd.f32 %v694_v48, %v690_v0  ;;  %v2487_v60 = vadd.f32 %v695_v56, %v691_v29  ;;  %v952_v8 = vsub.f32 1.0, %v2474_v30  ;;  %v1074_v63 = vsub.f32 %v2358_v40, %v1073_v24 }
  0xd0   :  { %v953_v3 = vsub.f32 1.0, %v2477_v43  ;;  %v1075_v58 = vsub.f32 %v2361_v5, %v1073_v24  ;;  %v1080_v42 = vmul.f32 %v2339_v15, %v2395_v20  ;;  %v1081_v26 = vmul.f32 %v2345_v41, %v945_v16 }
  0xd1   :  { %v830_v32 = vmul.f32 %v828_v39, %v2485_v14  ;;  %v831_v0 = vmul.f32 %v829_v35, %v2487_v60  ;;  %v2498_v10 = vmul.f32 %v1077_v62, %v1074_v63  ;;  %v2501_v54 = vstv %s2444_s22  ;;  %s2990_s22 = sld [smem:[#allocation10 + $0x3a]] }
  0xd2   :  { %v2503_v29 = vmul.f32 %v1077_v62, %v1075_v58  ;;  %vm200_vm6 = vcmp.ge.f32.partialorder %v2358_v40, %v2501_v54  ;;  %vm201_vm7 = vcmp.ge.f32.partialorder %v2361_v5, %v2501_v54  ;;  %v383_v52 = vstv %s2451_s23  ;;  %s3010_s23 = sld [smem:[#allocation10 + $0x49]] }
  0xd3   :  { %v2512_v15 = vadd.f32 %v830_v32, %v826_v9  ;;  %v2514_v41 = vadd.f32 %v831_v0, %v827_v57  ;;  %v1082_v20 = vsub.f32 1.0, %v2498_v10  ;;  %v2518_v16 = vsel %vm200_vm6, 1.0, %v3204_v4 }
  0xd4   :  { %v1083_v33 = vsub.f32 1.0, %v2503_v29  ;;  %v2522_v55 = vsel %vm201_vm7, 1.0, %v3204_v4  ;;  %v2526_v11 = vsub.f32 %v2367_v49, %v2518_v16  ;;  %v2529_v9 = vmul.f32 %v383_v52, %v2399_v13 }
  0xd5   :  { %v954_v57 = vmul.f32 %v952_v8, %v2512_v15  ;;  %v955_v39 = vmul.f32 %v953_v3, %v2514_v41  ;;  %v2537_v59 = vsub.f32 %v2370_v36, %v2522_v55  ;;  %v2540_v48 = vmul.f32 %v383_v52, %v2402_v61 }
  0xd6   :  { %v386_v49 = vmul.f32 %v2373_v53, %v2378_v18  ;;  %v387_v56 = vmul.f32 %v2385_v47, %v2382_v25  ;;  %v388_v35 = vsub.f32 1.0, %v2529_v9  ;;  %v551_v24 = vstv %s2483_s24  ;;  %s3022_s24 = sld [smem:[#allocation9 + $0x8]] }
  0xd7   :  { %v2548_v62 = vadd.f32 %v954_v57, %v950_v17  ;;  %v2550_v8 = vadd.f32 %v955_v39, %v951_v1  ;;  %v389_v36 = vsub.f32 1.0, %v2540_v48  ;;  %v2554_v63 = vmul.f32 %v551_v24, %v2257_v22 }
  0xd8   :  { %v390_v53 = vmul.f32 %v388_v35, %v2526_v11  ;;  %v2560_v18 = vmul.f32 %v551_v24, %v2261_v23  ;;  %v554_v25 = vmul.f32 %v2413_v46, %v2418_v7  ;;  %v555_v32 = vmul.f32 %v2416_v50, %v2427_v31 }
  0xd9   :  { %v1084_v47 = vmul.f32 %v1082_v20, %v2548_v62  ;;  %v1085_v17 = vmul.f32 %v1083_v33, %v2550_v8  ;;  %v391_v1 = vmul.f32 %v389_v36, %v2537_v59  ;;  %v556_v3 = vsub.f32 1.0, %v2554_v63 }
  0xda   :  { %v2570_v58 = vadd.f32 %v390_v53, %v386_v49  ;;  %v557_v0 = vsub.f32 1.0, %v2560_v18  ;;  %v699_v52 = vstv %s2510_s27  ;;  %v702_v50 = vmul.f32 %v2432_v28, %v2453_v44  ;;  %s3024_s27 = sld [smem:[#allocation10 + $0x58]] }
  0xdb   :  { %v1086_v46 = vadd.f32 %v1084_v47, %v1080_v42  ;;  %v1087_v7 = vadd.f32 %v1085_v17, %v1081_v26  ;;  %v2576_v20 = vadd.f32 %v391_v1, %v387_v56  ;;  %v2579_v33 = vmul.f32 %v699_v52, %v2130_v38 }
  0xdc   :  { %v558_v57 = vmul.f32 %v556_v3, %v2570_v58  ;;  %v2585_v39 = vmul.f32 %v699_v52, %v2133_v21  ;;  %v835_v31 = vstv %s2531_s28  ;;  %v703_v24 = vmul.f32 %v2435_v37, %v2455_v45  ;;  %s3045_s28 = sld [smem:[#allocation9 + $0xf]] }
  0xdd   :  { %v1088_v42 = vpack.c.bf16 %v1087_v7, %v1086_v46  ;;  %v559_v26 = vmul.f32 %v557_v0, %v2576_v20  ;;  %v704_v49 = vsub.f32 1.0, %v2579_v33  ;;  %v2595_v56 = vmul.f32 %v835_v31, %v1905_v12 }
  0xde   :  { %v2597_v35 = vadd.f32 %v558_v57, %v554_v25  ;;  %v705_v36 = vsub.f32 1.0, %v2585_v39  ;;  %v2603_v28 = vmul.f32 %v835_v31, %v1925_v19  ;;  %v838_v53 = vmul.f32 %v2449_v51, %v2485_v14 }
  0xdf   :  { %1228 = vmatpush1.bf16.msra.mxu0 %v1088_v42  ;;  %1443 = vmatpush1.bf16.msra.mxu1 %v1088_v42  ;;  %v2605_v44 = vadd.f32 %v559_v26, %v555_v32  ;;  %v839_v25 = vmul.f32 %v2458_v27, %v2487_v60  ;;  %v959_v47 = vstv %s2556_s29  ;;  %v840_v45 = vsub.f32 1.0, %v2595_v56  ;;  %s3071_s29 = sld [smem:[#allocation10 + $0xe]] }
  0xe0   :  { %1229 = vmatprep.subr.bf16.mxu0 %v1582_v2  ;;  %1434 = vmatprep.subr.bf16.mxu1 %v1582_v2  ;;  %v706_v37 = vmul.f32 %v704_v49, %v2597_v35  ;;  %v2617_v17 = vmul.f32 %v959_v47, %v1888_v34  ;;  %v2620_v1 = vmul.f32 %v959_v47, %v1892_v6  ;;  %v841_v27 = vsub.f32 1.0, %v2603_v28 }
  0xe1   :  { %v707_v51 = vmul.f32 %v705_v36, %v2605_v44  ;;  %v962_v14 = vmul.f32 %v2474_v30, %v2512_v15  ;;  %v1091_v60 = vstv %s2568_s30  ;;  %v963_v34 = vmul.f32 %v2477_v43, %v2514_v41  ;;  %s3085_s30 = sld [smem:[#allocation10 + $0x1d]] }
  0xe2   :  { %v2631_v3 = vadd.f32 %v706_v37, %v702_v50  ;;  %v964_v6 = vsub.f32 1.0, %v2617_v17  ;;  %v1092_v32 = vsub.f32 %v2358_v40, %v1091_v60  ;;  %v965_v52 = vsub.f32 1.0, %v2620_v1 }
  0xe3   :  { %v2637_v0 = vadd.f32 %v707_v51, %v703_v24  ;;  %v1093_v46 = vsub.f32 %v2361_v5, %v1091_v60  ;;  %v1095_v7 = vstv %s2581_s5  ;;  %v1098_v57 = vmul.f32 %v2498_v10, %v2548_v62  ;;  %s3099_s5 = sld [smem:[#allocation10 + $0x2c]] }
  0xe4   :  { %v842_v30 = vmul.f32 %v840_v45, %v2631_v3  ;;  %v2643_v15 = vmul.f32 %v1095_v7, %v1092_v32  ;;  %v2648_v50 = vstv %s2590_s6  ;;  %v1099_v10 = vmul.f32 %v2503_v29, %v2550_v8  ;;  %s3126_s6 = sld [smem:[#allocation10 + $0x3b]] }
  0xe5   :  { %v843_v43 = vmul.f32 %v841_v27, %v2637_v0  ;;  %v2651_v41 = vmul.f32 %v1095_v7, %v1093_v46  ;;  %vm210_vm8 = vcmp.ge.f32.partialorder %v2358_v40, %v2648_v50  ;;  %vm211_vm9 = vcmp.ge.f32.partialorder %v2361_v5, %v2648_v50 }
  0xe6   :  { %v844_v31 = vadd.f32 %v842_v30, %v838_v53  ;;  %v2662_v62 = vsel %vm210_vm8, 1.0, %v3204_v4  ;;  %v2665_v42 = vsel %vm211_vm9, 1.0, %v3204_v4  ;;  %v1100_v49 = vsub.f32 1.0, %v2643_v15 }
  0xe7   :  { %v2667_v26 = vadd.f32 %v843_v43, %v839_v25  ;;  %v1101_v24 = vsub.f32 1.0, %v2651_v41  ;;  %v2673_v36 = vsub.f32 %v2518_v16, %v2662_v62  ;;  %v2679_v29 = vsub.f32 %v2358_v40, %v2501_v54 }
  0xe8   :  { %v966_v53 = vmul.f32 %v964_v6, %v844_v31  ;;  %v2683_v8 = vsub.f32 %v2361_v5, %v2501_v54  ;;  %v397_v25 = vstv %s2622_s7  ;;  %v2689_v37 = vsub.f32 %v2522_v55, %v2665_v42  ;;  %s3135_s7 = sld [smem:[#allocation10 + $0x4a]] }
  0xe9   :  { %v967_v47 = vmul.f32 %v965_v52, %v2667_v26  ;;  %v400_v16 = vmul.f32 %v2529_v9, %v2526_v11  ;;  %v563_v45 = vstv %s2629_s8  ;;  %v2697_v27 = vmul.f32 %v397_v25, %v2679_v29  ;;  %s3144_s8 = sld [smem:[#allocation9 + $0x9]] }
  0xea   :  { %v2694_v51 = vadd.f32 %v966_v53, %v962_v14  ;;  %v2700_v54 = vmul.f32 %v397_v25, %v2683_v8  ;;  %v2703_v60 = vmul.f32 %v563_v45, %v2399_v13  ;;  %v401_v55 = vmul.f32 %v2540_v48, %v2537_v59 }
  0xeb   :  { %v2705_v6 = vadd.f32 %v967_v47, %v963_v34  ;;  %v2710_v11 = vmul.f32 %v563_v45, %v2402_v61  ;;  %v566_v9 = vmul.f32 %v2554_v63, %v2570_v58  ;;  %v402_v32 = vsub.f32 1.0, %v2697_v27 }
  0xec   :  { %v1102_v14 = vmul.f32 %v1100_v49, %v2694_v51  ;;  %v403_v52 = vsub.f32 1.0, %v2700_v54  ;;  %v567_v34 = vmul.f32 %v2560_v18, %v2576_v20  ;;  %v568_v48 = vsub.f32 1.0, %v2703_v60 }
  0xed   :  { %v1103_v59 = vmul.f32 %v1101_v24, %v2705_v6  ;;  %v569_v63 = vsub.f32 1.0, %v2710_v11  ;;  %v711_v58 = vstv %s2657_s9  ;;  %v404_v7 = vmul.f32 %v402_v32, %v2673_v36  ;;  %s3154_s9 = sld [smem:[#allocation10 + $0x59]] }
  0xee   :  { %v1104_v46 = vadd.f32 %v1102_v14, %v1098_v57  ;;  %v405_v30 = vmul.f32 %v403_v52, %v2689_v37  ;;  %v2732_v43 = vmul.f32 %v711_v58, %v2257_v22  ;;  %v2735_v20 = vmul.f32 %v711_v58, %v2261_v23 }
  0xef   :  { %v1105_v18 = vadd.f32 %v1103_v59, %v1099_v10  ;;  %v714_v49 = vmul.f32 %v2579_v33, %v2597_v35  ;;  %v847_v24 = vstv %s2675_s10  ;;  %v2740_v53 = vadd.f32 %v404_v7, %v400_v16  ;;  %s1584_s10 = smov [#allocation12]  }
  0xf0   :  { %v2742_v25 = vadd.f32 %v405_v30, %v401_v55  ;;  %v715_v57 = vmul.f32 %v2585_v39, %v2605_v44  ;;  %v2747_v47 = vmul.f32 %v847_v24, %v2130_v38  ;;  %v716_v45 = vsub.f32 1.0, %v2732_v43 }
  0xf1   :  { %v1106_v10 = vpack.c.bf16 %v1105_v18, %v1104_v46  ;;  %v717_v14 = vsub.f32 1.0, %v2735_v20  ;;  %v2754_v33 = vmul.f32 %v847_v24, %v2133_v21  ;;  %v570_v35 = vmul.f32 %v568_v48, %v2740_v53 }
  0xf2   :  { %v571_v16 = vmul.f32 %v569_v63, %v2742_v25  ;;  %v850_v39 = vmul.f32 %v2595_v56, %v2631_v3  ;;  %v851_v44 = vmul.f32 %v2603_v28, %v2637_v0  ;;  %v852_v55 = vsub.f32 1.0, %v2747_v47 }
  0xf3   :  { %1230 = vmatpush1.bf16.msra.mxu0 %v1106_v10  ;;  %1444 = vmatpush1.bf16.msra.mxu1 %v1106_v10  ;;  %v853_v32 = vsub.f32 1.0, %v2754_v33  ;;  %v971_v52 = vstv %s2714_s11  ;;  %v974_v59 = vmul.f32 %v2617_v17, %v844_v31  ;;  %v2770_v56 = vadd.f32 %v570_v35, %v566_v9  ;;  %s1277_s11 = sshll.u32 %s1584_s10, 4  ;;  %s1278_s11 = int_to_ptr.vmem [resolvable:$true] %s1277_s11 }
  0xf4   :  { %1231 = vmatprep.subr.bf16.mxu0 %v1582_v2  ;;  %1435 = vmatprep.subr.bf16.mxu1 %v1582_v2  ;;  %v2772_v3 = vadd.f32 %v571_v16, %v567_v34  ;;  %v2775_v28 = vmul.f32 %v971_v52, %v1905_v12  ;;  %v1109_v0 = vstv %s2721_s12  ;;  %v2779_v48 = vmul.f32 %v971_v52, %v1925_v19  ;;  %s1544_s12 = scalar_lea.vmem %s1278_s11, 512  ;;  %p1549_p13 = scmp.lt.s32.totalorder %s1278_s11, %s1278_s11 }
  0xf5   :  { %v1110_v17 = vsub.f32 %v2358_v40, %v1109_v0  ;;  %v1111_v31 = vsub.f32 %v2361_v5, %v1109_v0  ;;  %v1113_v63 = vstv %s2727_s13  ;;  %v718_v9 = vmul.f32 %v716_v45, %v2770_v56  ;;  %p1545_p12 = scmp.ne.s32.totalorder %s1278_s11, %s1544_s12  ;;  %p1550_p0 = scmp.lt.s32.totalorder %s1544_s12, %s1544_s12 }
  0xf6   :  { %v719_v34 = vmul.f32 %v717_v14, %v2772_v3  ;;  %v975_v12 = vmul.f32 %v2620_v1, %v2667_v26  ;;  %v976_v58 = vsub.f32 1.0, %v2775_v28  ;;  %v977_v19 = vsub.f32 1.0, %v2779_v48 }
  0xf7   :  { %v2792_v46 = vmul.f32 %v1113_v63, %v1110_v17  ;;  %v2794_v7 = vmul.f32 %v1113_v63, %v1111_v31  ;;  %v1116_v30 = vmul.f32 %v2643_v15, %v2694_v51  ;;  %v2800_v18 = vadd.f32 %v718_v9, %v714_v49  ;;  %p1551_p1 = por %p1550_p0, %p1549_p13 }
  0xf8   :  { %v2802_v24 = vadd.f32 %v719_v34, %v715_v57  ;;  %v2805_v10 = vstv %s2749_s14  ;;  %v2809_v1 = vsub.f32 %v2358_v40, %v2648_v50  ;;  %v1117_v26 = vmul.f32 %v2651_v41, %v2705_v6 }
  0xf9   :  { %v1118_v45 = vsub.f32 1.0, %v2792_v46  ;;  %vm220_vm10 = vcmp.ge.f32.partialorder %v2358_v40, %v2805_v10  ;;  %vm221_vm11 = vcmp.ge.f32.partialorder %v2361_v5, %v2805_v10  ;;  %v854_v15 = vmul.f32 %v852_v55, %v2800_v18  ;;  %p1552_p2 = pnand %p1551_p1, %p1545_p12 }
  0xfa   :  { %v855_v51 = vmul.f32 %v853_v32, %v2802_v24  ;;  %v2821_v49 = vsel %vm220_vm10, 1.0, %v3204_v4  ;;  %v2824_v57 = vsel %vm221_vm11, 1.0, %v3204_v4  ;;  %v1119_v41 = vsub.f32 1.0, %v2794_v7 }
  0xfb   :  { %v2829_v6 = vsub.f32 %v2662_v62, %v2821_v49  ;;  %v2833_v14 = vsub.f32 %v2361_v5, %v2648_v50  ;;  %v411_v35 = vstv %s2766_s0  ;;  %v856_v16 = vadd.f32 %v854_v15, %v850_v39 }
  0xfc   :  { %v2836_v55 = vadd.f32 %v855_v51, %v851_v44  ;;  %v2840_v32 = vsub.f32 %v2665_v42, %v2824_v57  ;;  %v2843_v52 = vmul.f32 %v411_v35, %v2809_v1  ;;  %v414_v50 = vmul.f32 %v2697_v27, %v2673_v36 }
  0xfd   :  { %v2848_v62 = vmul.f32 %v411_v35, %v2833_v14  ;;  %v415_v39 = vmul.f32 %v2700_v54, %v2689_v37  ;;  %v575_v44 = vstv %s2784_s2  ;;  %v978_v0 = vmul.f32 %v976_v58, %v856_v16 }
  0xfe   :  { %v979_v17 = vmul.f32 %v977_v19, %v2836_v55  ;;  %v416_v42 = vsub.f32 1.0, %v2843_v52  ;;  %v2858_v31 = vmul.f32 %v575_v44, %v2679_v29  ;;  %v2864_v9 = vmul.f32 %v575_v44, %v2683_v8 }
  0xff   :  { %v417_v63 = vsub.f32 1.0, %v2848_v62  ;;  %v578_v36 = vmul.f32 %v2703_v60, %v2740_v53  ;;  %v723_v37 = vstv %s2798_s15  ;;  %v980_v27 = vadd.f32 %v978_v0, %v974_v59 }
 0x100   :  { %v981_v54 = vadd.f32 %v979_v17, %v975_v12  ;;  %v418_v34 = vmul.f32 %v416_v42, %v2829_v6  ;;  %v580_v58 = vsub.f32 1.0, %v2858_v31  ;;  %v581_v15 = vsub.f32 1.0, %v2864_v9 }
 0x101   :  { %v419_v19 = vmul.f32 %v417_v63, %v2840_v32  ;;  %v2876_v51 = vmul.f32 %v723_v37, %v2399_v13  ;;  %v2879_v35 = vmul.f32 %v723_v37, %v2402_v61  ;;  %v1120_v60 = vmul.f32 %v1118_v45, %v980_v27 }
 0x102   :  { %v1121_v53 = vmul.f32 %v1119_v41, %v981_v54  ;;  %v2881_v59 = vadd.f32 %v418_v34, %v414_v50  ;;  %v579_v12 = vmul.f32 %v2710_v11, %v2742_v25  ;;  %v726_v0 = vmul.f32 %v2732_v43, %v2770_v56 }
 0x103   :  { %v2887_v44 = vadd.f32 %v419_v19, %v415_v39  ;;  %v727_v17 = vmul.f32 %v2735_v20, %v2772_v3  ;;  %v728_v42 = vsub.f32 1.0, %v2876_v51  ;;  %v1122_v45 = vadd.f32 %v1120_v60, %v1116_v30 }
 0x104   :  { %v1123_v41 = vadd.f32 %v1121_v53, %v1117_v26  ;;  %v582_v50 = vmul.f32 %v580_v58, %v2881_v59  ;;  %v859_v63 = vstv %s2845_s16  ;;  %v729_v25 = vsub.f32 1.0, %v2879_v35 }
 0x105   :  { %v583_v11 = vmul.f32 %v581_v15, %v2887_v44  ;;  %v2901_v39 = vmul.f32 %v859_v63, %v2257_v22  ;;  %v2904_v43 = vmul.f32 %v859_v63, %v2261_v23  ;;  %v862_v3 = vmul.f32 %v2747_v47, %v2800_v18 }
 0x106   :  { %v1124_v20 = vpack.c.bf16 %v1123_v41, %v1122_v45  ;;  %v2906_v56 = vadd.f32 %v582_v50, %v578_v36  ;;  %v983_v30 = vstv %s2860_s17  ;;  %v863_v37 = vmul.f32 %v2754_v33, %v2802_v24 }
 0x107   :  { %v2911_v26 = vadd.f32 %v583_v11, %v579_v12  ;;  %v864_v34 = vsub.f32 1.0, %v2901_v39  ;;  %v2917_v58 = vmul.f32 %v983_v30, %v2130_v38  ;;  %v2921_v19 = vmul.f32 %v983_v30, %v2133_v21 }
 0x108   :  { %1232 = vmatpush1.bf16.msra.mxu0 %v1124_v20  ;;  %1445 = vmatpush1.bf16.msra.mxu1 %v1124_v20  ;;  %v730_v36 = vmul.f32 %v728_v42, %v2906_v56  ;;  %v986_v47 = vmul.f32 %v2775_v28, %v856_v16  ;;  %v1127_v18 = vstv %s2871_s18  ;;  %v865_v33 = vsub.f32 1.0, %v2904_v43 }
 0x109   :  { %1233 = vmatprep.subr.bf16.mxu0 %v1582_v2  ;;  %1436 = vmatprep.subr.bf16.mxu1 %v1582_v2  ;;  %v731_v38 = vmul.f32 %v729_v25, %v2911_v26  ;;  %v987_v24 = vmul.f32 %v2779_v48, %v2836_v55  ;;  %v1128_v21 = vsub.f32 %v2358_v40, %v1127_v18  ;;  %v988_v16 = vsub.f32 1.0, %v2917_v58 }
 0x10a   :  { %v2936_v28 = vadd.f32 %v730_v36, %v726_v0  ;;  %v1129_v15 = vsub.f32 %v2361_v5, %v1127_v18  ;;  %v1131_v60 = vstv %s2885_s19  ;;  %v989_v12 = vsub.f32 1.0, %v2921_v19 }
 0x10b   :  { %v2941_v53 = vadd.f32 %v731_v38, %v727_v17  ;;  %v2944_v42 = vmul.f32 %v1131_v60, %v1128_v21  ;;  %v1134_v45 = vmul.f32 %v2792_v46, %v980_v27  ;;  %v1135_v0 = vmul.f32 %v2794_v7, %v981_v54 }
 0x10c   :  { %v866_v48 = vmul.f32 %v864_v34, %v2936_v28  ;;  %v2948_v55 = vmul.f32 %v1131_v60, %v1129_v15  ;;  %v2952_v41 = vstv %s2896_s20  ;;  %v2963_v46 = vsub.f32 %v2358_v40, %v2805_v10 }
 0x10d   :  { %v867_v17 = vmul.f32 %v865_v33, %v2941_v53  ;;  %vm230_vm12 = vcmp.ge.f32.partialorder %v2358_v40, %v2952_v41  ;;  %vm231_vm13 = vcmp.ge.f32.partialorder %v2361_v5, %v2952_v41  ;;  %v1136_v7 = vsub.f32 1.0, %v2944_v42 }
 0x10e   :  { %v868_v27 = vadd.f32 %v866_v48, %v862_v3  ;;  %v2967_v54 = vsel %vm230_vm12, 1.0, %v3204_v4  ;;  %v2970_v50 = vsel %vm231_vm13, 1.0, %v3204_v4  ;;  %v1137_v11 = vsub.f32 1.0, %v2948_v55 }
 0x10f   :  { %v2972_v63 = vadd.f32 %v867_v17, %v863_v37  ;;  %v2977_v25 = vsub.f32 %v2821_v49, %v2967_v54  ;;  %v2981_v20 = vsub.f32 %v2361_v5, %v2805_v10  ;;  %v2985_v30 = vsub.f32 %v2824_v57, %v2970_v50 }
 0x110   :  { %v990_v3 = vmul.f32 %v988_v16, %v868_v27  ;;  %v425_v34 = vstv %s2925_s21  ;;  %v428_v37 = vmul.f32 %v2843_v52, %v2829_v6  ;;  %v587_v18 = vstv %s2934_s1 }
 0x111   :  { %v991_v36 = vmul.f32 %v989_v12, %v2972_v63  ;;  %v2994_v49 = vmul.f32 %v425_v34, %v2963_v46  ;;  %v2997_v10 = vmul.f32 %v425_v34, %v2981_v20  ;;  %v429_v57 = vmul.f32 %v2848_v62, %v2840_v32 }
 0x112   :  { %v3000_v38 = vadd.f32 %v990_v3, %v986_v47  ;;  %v3005_v33 = vmul.f32 %v587_v18, %v2809_v1  ;;  %v3008_v6 = vmul.f32 %v587_v18, %v2833_v14  ;;  %v590_v47 = vmul.f32 %v2858_v31, %v2881_v59 }
 0x113   :  { %v3012_v52 = vadd.f32 %v991_v36, %v987_v24  ;;  %v430_v21 = vsub.f32 1.0, %v2994_v49  ;;  %v431_v16 = vsub.f32 1.0, %v2997_v10  ;;  %v735_v60 = vstv %s2954_s3 }
 0x114   :  { %v1138_v15 = vmul.f32 %v1136_v7, %v3000_v38  ;;  %v592_v32 = vsub.f32 1.0, %v3005_v33  ;;  %v593_v62 = vsub.f32 1.0, %v3008_v6  ;;  %v3030_v31 = vmul.f32 %v735_v60, %v2679_v29 }
 0x115   :  { %v1139_v24 = vmul.f32 %v1137_v11, %v3012_v52  ;;  %v432_v12 = vmul.f32 %v430_v21, %v2977_v25  ;;  %v433_v48 = vmul.f32 %v431_v16, %v2985_v30  ;;  %v591_v17 = vmul.f32 %v2864_v9, %v2887_v44 }
 0x116   :  { %v1140_v59 = vadd.f32 %v1138_v15, %v1134_v45  ;;  %v3035_v7 = vmul.f32 %v735_v60, %v2683_v8  ;;  %v738_v3 = vmul.f32 %v2876_v51, %v2906_v56  ;;  %v739_v18 = vmul.f32 %v2879_v35, %v2911_v26 }
 0x117   :  { %v1141_v34 = vadd.f32 %v1139_v24, %v1135_v0  ;;  %v3039_v11 = vadd.f32 %v432_v12, %v428_v37  ;;  %v3041_v36 = vadd.f32 %v433_v48, %v429_v57  ;;  %v740_v45 = vsub.f32 1.0, %v3030_v31 }
 0x118   :  { %v741_v9 = vsub.f32 1.0, %v3035_v7  ;;  %v871_v44 = vstv %s2990_s22  ;;  %v874_v21 = vmul.f32 %v2901_v39, %v2936_v28  ;;  %v875_v26 = vmul.f32 %v2904_v43, %v2941_v53 }
 0x119   :  { %v1142_v51 = vpack.c.bf16 %v1141_v34, %v1140_v59  ;;  %v594_v56 = vmul.f32 %v592_v32, %v3039_v11  ;;  %v595_v0 = vmul.f32 %v593_v62, %v3041_v36  ;;  %v3055_v37 = vmul.f32 %v871_v44, %v2399_v13 }
 0x11a   :  { %v3058_v35 = vmul.f32 %v871_v44, %v2402_v61  ;;  %v995_v57 = vstv %s3010_s23  ;;  %v998_v16 = vmul.f32 %v2917_v58, %v868_v27  ;;  %v1145_v53 = vstv %s3022_s24 }
 0x11b   :  { %1234 = vmatpush1.bf16.msra.mxu0 %v1142_v51  ;;  %1446 = vmatpush1.bf16.msra.mxu1 %v1142_v51  ;;  %v3064_v39 = vadd.f32 %v594_v56, %v590_v47  ;;  %v3066_v28 = vadd.f32 %v595_v0, %v591_v17  ;;  %v3069_v15 = vmul.f32 %v995_v57, %v2257_v22  ;;  %v876_v43 = vsub.f32 1.0, %v3055_v37 }
 0x11c   :  { %1235 = vmatprep.subr.bf16.mxu0 %v1582_v2  ;;  %1437 = vmatprep.subr.bf16.mxu1 %v1582_v2  ;;  %v3077_v58 = vmul.f32 %v995_v57, %v2261_v23  ;;  %v1149_v27 = vstv %s3024_s27  ;;  %v877_v22 = vsub.f32 1.0, %v3058_v35  ;;  %v1146_v62 = vsub.f32 %v2358_v40, %v1145_v53 }
 0x11d   :  { %v742_v47 = vmul.f32 %v740_v45, %v3064_v39  ;;  %v743_v32 = vmul.f32 %v741_v9, %v3066_v28  ;;  %v999_v60 = vmul.f32 %v2921_v19, %v2972_v63  ;;  %v1000_v24 = vsub.f32 1.0, %v3069_v15 }
 0x11e   :  { %v1001_v23 = vsub.f32 1.0, %v3077_v58  ;;  %v1147_v12 = vsub.f32 %v2361_v5, %v1145_v53  ;;  %v3096_v17 = vmul.f32 %v1149_v27, %v1146_v62  ;;  %v239_v34 = vstv %s3045_s28 }
 0x11f   :  { %v3092_v48 = vadd.f32 %v742_v47, %v738_v3  ;;  %v3094_v59 = vadd.f32 %v743_v32, %v739_v18  ;;  %vm240_vm14 = vcmp.ge.f32.partialorder %v2358_v40, %v239_v34  ;;  %vm241_vm15 = vcmp.ge.f32.partialorder %v2361_v5, %v239_v34 }
 0x120   :  { %v3101_v45 = vmul.f32 %v1149_v27, %v1147_v12  ;;  %v436_v19 = vsub.f32 %v2358_v40, %v2952_v41  ;;  %v1152_v18 = vmul.f32 %v2944_v42, %v3000_v38  ;;  %v1339_v9 = vsel %vm240_vm14, 1.0, %v3204_v4 }
 0x121   :  { %v878_v63 = vmul.f32 %v876_v43, %v3092_v48  ;;  %v879_v3 = vmul.f32 %v877_v22, %v3094_v59  ;;  %v1154_v44 = vsub.f32 1.0, %v3096_v17  ;;  %v1340_v56 = vsel %vm241_vm15, 1.0, %v3204_v4 }
 0x122   :  { %v1155_v51 = vsub.f32 1.0, %v3101_v45  ;;  %v437_v0 = vsub.f32 %v2361_v5, %v2952_v41  ;;  %v246_v43 = vsub.f32 %v2967_v54, %v1339_v9  ;;  %v439_v53 = vstv %s3071_s29 }
 0x123   :  { %v3117_v40 = vadd.f32 %v878_v63, %v874_v21  ;;  %v3119_v57 = vadd.f32 %v879_v3, %v875_v26  ;;  %v247_v42 = vsub.f32 %v2970_v50, %v1340_v56  ;;  %v440_v38 = vmul.f32 %v439_v53, %v436_v19 }
 0x124   :  { %v441_v27 = vmul.f32 %v439_v53, %v437_v0  ;;  %v442_v47 = vmul.f32 %v2994_v49, %v2977_v25  ;;  %v443_v41 = vmul.f32 %v2997_v10, %v2985_v30  ;;  %v599_v21 = vstv %s3085_s30 }
 0x125   :  { %v1002_v4 = vmul.f32 %v1000_v24, %v3117_v40  ;;  %v1003_v5 = vmul.f32 %v1001_v23, %v3119_v57  ;;  %v444_v54 = vsub.f32 1.0, %v440_v38  ;;  %v600_v50 = vmul.f32 %v599_v21, %v2963_v46  ;;  %v1460_v38 = vld [vmem:[#allocation7 + $0x4] ss:$8 sps:$4 sm:$0xff]  }
 0x126   :  { %v445_v26 = vsub.f32 1.0, %v441_v27  ;;  %v601_v32 = vmul.f32 %v599_v21, %v2981_v20  ;;  %v1153_v49 = vmul.f32 %v2948_v55, %v3012_v52  ;;  %v747_v62 = vstv %s3099_s5  ;;  %v1463_v27 = vld [vmem:[#allocation7 + $0x14] ss:$8 sps:$4 sm:$0xff]  }
 0x127   :  { %v3137_v22 = vadd.f32 %v1002_v4, %v998_v16  ;;  %v3139_v25 = vadd.f32 %v1003_v5, %v999_v60  ;;  %v446_v24 = vmul.f32 %v444_v54, %v246_v43  ;;  %v604_v30 = vsub.f32 1.0, %v600_v50  ;;  %v1475_v4 = vld [vmem:[#allocation3 + $0x8] sm:$0xff] }
 0x128   :  { %v447_v23 = vmul.f32 %v445_v26, %v247_v42  ;;  %v605_v10 = vsub.f32 1.0, %v601_v32  ;;  %v748_v16 = vmul.f32 %v747_v62, %v2809_v1  ;;  %v749_v60 = vmul.f32 %v747_v62, %v2833_v14 }
 0x129   :  { %v1156_v46 = vmul.f32 %v1154_v44, %v3137_v22  ;;  %v1157_v20 = vmul.f32 %v1155_v51, %v3139_v25  ;;  %v448_v12 = vadd.f32 %v446_v24, %v442_v47  ;;  %v602_v55 = vmul.f32 %v3005_v33, %v3039_v11 }
 0x12a   :  { %v449_v34 = vadd.f32 %v447_v23, %v443_v41  ;;  %v603_v52 = vmul.f32 %v3008_v6, %v3041_v36  ;;  %v752_v3 = vsub.f32 1.0, %v748_v16  ;;  %v753_v51 = vsub.f32 1.0, %v749_v60 }
 0x12b   :  { %v1158_v19 = vadd.f32 %v1156_v46, %v1152_v18  ;;  %v1159_v63 = vadd.f32 %v1157_v20, %v1153_v49  ;;  %v606_v9 = vmul.f32 %v604_v30, %v448_v12  ;;  %v883_v1 = vstv %s3126_s6 }
 0x12c   :  { %v607_v44 = vmul.f32 %v605_v10, %v449_v34  ;;  %v750_v14 = vmul.f32 %v3030_v31, %v3064_v39  ;;  %v884_v0 = vmul.f32 %v883_v1, %v2679_v29  ;;  %v885_v33 = vmul.f32 %v883_v1, %v2683_v8 }
 0x12d   :  { %v1160_v56 = vpack.c.bf16 %v1159_v63, %v1158_v19  ;;  %v608_v6 = vadd.f32 %v606_v9, %v602_v55  ;;  %v751_v36 = vmul.f32 %v3035_v7, %v3066_v28  ;;  %v1007_v18 = vstv %s3135_s7  ;;  %v1474_v28 = vld [vmem:[#allocation3] sm:$0xff] }
 0x12e   :  { %v609_v11 = vadd.f32 %v607_v44, %v603_v52  ;;  %v888_v43 = vsub.f32 1.0, %v884_v0  ;;  %v889_v53 = vsub.f32 1.0, %v885_v33  ;;  %v1008_v42 = vmul.f32 %v1007_v18, %v2399_v13  ;;  %v1461_v52 = vld [vmem:[#allocation7 + $0x10] ss:$8 sps:$4 sm:$0xff]  }
 0x12f   :  { %1236 = vmatpush1.bf16.msra.mxu0 %v1160_v56  ;;  %1447 = vmatpush1.bf16.msra.mxu1 %v1160_v56  ;;  %v754_v29 = vmul.f32 %v752_v3, %v608_v6  ;;  %v1009_v8 = vmul.f32 %v1007_v18, %v2402_v61  ;;  %v1163_v39 = vstv %s3144_s8  ;;  %v886_v7 = vmul.f32 %v3055_v37, %v3092_v48 }
 0x130   :  { %1237 = vmatprep.subr.bf16.mxu0 %v1582_v2  ;;  %1438 = vmatprep.subr.bf16.mxu1 %v1582_v2  ;;  %v755_v31 = vmul.f32 %v753_v51, %v609_v11  ;;  %v1164_v47 = vsub.f32 %v1474_v28, %v1163_v39  ;;  %v1165_v5 = vsub.f32 %v1475_v4, %v1163_v39  ;;  %v1167_v2 = vstv %s3154_s9 }
 0x131   :  { %v756_v13 = vadd.f32 %v754_v29, %v750_v14  ;;  %v887_v21 = vmul.f32 %v3058_v35, %v3094_v59  ;;  %v1012_v54 = vsub.f32 1.0, %v1008_v42  ;;  %vm1212_vm0 = vcmask 261120  }
 0x132   :  { %v757_v41 = vadd.f32 %v755_v31, %v751_v36  ;;  %v1168_v26 = vmul.f32 %v1167_v2, %v1164_v47  ;;  %v1013_v32 = vsub.f32 1.0, %v1009_v8  ;;  %v1169_v49 = vmul.f32 %v1167_v2, %v1165_v5  ;;  %1427 = vmatprep.mubr.msk.bf16.mxu0 %vm1212_vm0, %v1460_v38  ;;  %1428 = vmatprep.mubr.msk.bf16.mxu1 %vm1212_vm0, %v1463_v27 }
 0x133   :  { %v890_v61 = vmul.f32 %v888_v43, %v756_v13  ;;  %v1010_v62 = vmul.f32 %v3069_v15, %v3117_v40  ;;  %v1011_v24 = vmul.f32 %v3077_v58, %v3119_v57  ;;  %v1170_v20 = vmul.f32 %v3096_v17, %v3137_v22  ;;  %v1458_v40 = vld [vmem:[#allocation7] ss:$8 sps:$4 sm:$0xff]  }
 0x134   :  { %v891_v50 = vmul.f32 %v889_v53, %v757_v41  ;;  %v1172_v59 = vsub.f32 1.0, %v1168_v26  ;;  %v1173_v30 = vsub.f32 1.0, %v1169_v49  ;;  %v1171_v16 = vmul.f32 %v3101_v45, %v3139_v25 }
 0x135   :  { %v892_v37 = vadd.f32 %v890_v61, %v886_v7 }
 0x136   :  { %v893_v48 = vadd.f32 %v891_v50, %v887_v21 }
 0x137   :  { %v1014_v23 = vmul.f32 %v1012_v54, %v892_v37 }
 0x138   :  { %v1015_v35 = vmul.f32 %v1013_v32, %v893_v48 }
 0x139   :  { %v1016_v10 = vadd.f32 %v1014_v23, %v1010_v62 }
 0x13a   :  { %v1017_v46 = vadd.f32 %v1015_v35, %v1011_v24 }
 0x13b   :  { %v1174_v60 = vmul.f32 %v1172_v59, %v1016_v10 }
 0x13c   :  { %v1175_v12 = vmul.f32 %v1173_v30, %v1017_v46 }
 0x13d   :  { %v1176_v34 = vadd.f32 %v1174_v60, %v1170_v20 }
 0x13e   :  { %v1177_v55 = vadd.f32 %v1175_v12, %v1171_v16 }
 0x140   :  { %v1178_v15 = vpack.c.bf16 %v1177_v55, %v1176_v34 }
 0x142   :  { %1238 = vmatpush1.bf16.msra.mxu0 %v1178_v15  ;;  %1448 = vmatpush1.bf16.msra.mxu1 %v1178_v15 }
 0x145   :  { %1252 = vmatmul.mubr.bf16.vlgmr.msra.gmra.mrb[0].mxu0 %v1458_v40  ;;  %1260 = vmatmul.mubr.bf16.vlgmr.msra.gmra.mrb[0].mxu1 %v1461_v52 }
 0x218   :  { %v1253_v58 = vpop.f32.mrb[0].mxu0  ;;  %v1261_v57 = vpop.f32.mrb[0].mxu1 }
 0x219   :  { %1268 = vst [vmem:[#allocation12] sm:$0xff] %v1253_v58  ;;  %1270 = vst [vmem:[#allocation12 + $0x10] sm:$0xff] %v1261_v57  ;;  %v1255_v17 = vpop.f32.mrb[1].mxu0  ;;  %v1263_v22 = vpop.f32.mrb[1].mxu1 }
 0x21a   :  { %v1256_v45 = vpop.f32.mrb[2].mxu0  ;;  %v1264_v25 = vpop.f32.mrb[2].mxu1 }
 0x21b   :  { %1269 = vst [vmem:[#allocation12 + $0x8] sm:$0xff] %v1256_v45  ;;  %1271 = vst [vmem:[#allocation12 + $0x18] sm:$0xff] %v1264_v25  ;;  %v1258_v19 = vpop.f32.mrb[3].mxu0  ;;  %v1266_v63 = vpop.f32.mrb[3].mxu1 }
 0x21c   :  { %1555 = shalt.err (!%p1552_p2)
}
 0x21d   :  { %s1556_s0 = scalar_lea.hbm %s3201_s4, 512 }
 0x21e   :  { %p1557_p3 = scmp.ne.s32.totalorder %s3201_s4, %s1556_s0  ;;  %p1560_p4 = scmp.lt.u32.totalorder %s1556_s0, %s3201_s4 }
 0x220   :  { %p1562_p5 = pnand %p1560_p4, %p1557_p3 }
 0x222   :  { %1565 = shalt.err (!%p1562_p5)
}
 0x223   :  { %1283 = dma.vmem_to_hbm [thread:$0]  %s1278_s11, 512, %s3201_s4, [#allocation5], %s1577_s25, %s1577_s25, %s1578_s26  }
 0x224   :  { %1574 = dma.done.wait [#allocation5], 512  }
 0x225   :  { %1575 = vsyncadd [#allocation5], 4294966784 }
 0x226   :  { %1287 = vsyncpa [#allocation4], 1 }
 0x227   :  { %1288 = vsyncpa [#allocation8], 1 }
 0x228   :  { %1289 = vsyncpa [#allocation5], 1 }
 0x229   :  { %1290 = vsyncpa [#allocation6], 1 }
 0x22a   :  { %1291 = vsyncpa [#allocation11], 1 }

</bundles_post_ra>
